<compile_context>
chip_gen: v7x
topology: tpu7x:2x2x1
jax: 0.10.0
libtpu: 0.0.40
codegen_flags: <defaults>
</compile_context>

<pallas_src>
import math

import jax
import jax.numpy as jnp
from jax.experimental import pallas as pl
from jax.experimental.pallas import tpu as pltpu

# ----------------------------- model hyper-parameters -----------------------------
DIM = 64           # d_model
NUM_HEADS = 8
HEAD_DIM = DIM // NUM_HEADS
FFN_DIM = 256
NUM_LAYERS_POINT = 6
NUM_JOINTS = 13
NUM_FEATURES = 2
LN_EPS = 1e-5
BN_EPS = 1e-5


def _layernorm(x, g, b):
    mu = jnp.mean(x, axis=-1, keepdims=True)
    var = jnp.mean(jnp.square(x - mu), axis=-1, keepdims=True)
    return (x - mu) * jax.lax.rsqrt(var + LN_EPS) * g + b


def _row_block(m, cap):
    """Row block for 2-D row kernels: multiple of 8, >=2 blocks when the shape allows."""
    if m <= 8 or m % 8 != 0:
        return m
    bm = min(cap, (m // 8) * 8)
    if m // bm < 2:
        half = ((m // 2) // 8) * 8
        if half >= 8:
            bm = half
    return bm


def _lead_block(m, cap):
    """Leading-dim block (unconstrained by (8,128)); >=2 blocks when possible (megacore)."""
    bm = min(cap, m)
    if m >= 2 and m // bm < 2:
        bm = (m + 1) // 2
    return max(bm, 1)


# ------------------------------------------------------------------------------
# Kernel 1: fused point encoder  (pos_enc || feat_enc) -> concatenated (M, 64)
# row-blocked; rows are independent, so it is fed point-major rows directly.
# ------------------------------------------------------------------------------
def _point_enc_kernel(x_ref,
                      pw1_ref, pb1_ref, pg_ref, pbe_ref, pw2_ref, pb2_ref,
                      fw1_ref, fb1_ref, fg_ref, fbe_ref, fw2_ref, fb2_ref,
                      o_ref):
    x = x_ref[...]
    coords = x[:, :3]
    feats = x[:, 3:]
    hp = jnp.dot(coords, pw1_ref[...], preferred_element_type=jnp.float32) + pb1_ref[...]
    hp = jnp.maximum(_layernorm(hp, pg_ref[...], pbe_ref[...]), 0.0)
    op = jnp.dot(hp, pw2_ref[...], preferred_element_type=jnp.float32) + pb2_ref[...]
    hf = jnp.dot(feats, fw1_ref[...], preferred_element_type=jnp.float32) + fb1_ref[...]
    hf = jnp.maximum(_layernorm(hf, fg_ref[...], fbe_ref[...]), 0.0)
    of = jnp.dot(hf, fw2_ref[...], preferred_element_type=jnp.float32) + fb2_ref[...]
    o_ref[...] = jnp.concatenate([op, of], axis=-1)


def point_encoder(x, p_pos, p_feat, block_rows=1024):
    m, c = x.shape
    bm = _row_block(m, block_rows)
    weights = (p_pos["w1"], p_pos["b1"], p_pos["g"], p_pos["be"], p_pos["w2"], p_pos["b2"],
               p_feat["w1"], p_feat["b1"], p_feat["g"], p_feat["be"], p_feat["w2"], p_feat["b2"])
    in_specs = [pl.BlockSpec((bm, c), lambda i: (i, 0))]
    in_specs += [pl.BlockSpec(w.shape, lambda i: (0, 0)) for w in weights]
    return pl.pallas_call(
        _point_enc_kernel,
        out_shape=jax.ShapeDtypeStruct((m, DIM), jnp.float32),
        grid=(pl.cdiv(m, bm),),
        in_specs=in_specs,
        out_specs=pl.BlockSpec((bm, DIM), lambda i: (i, 0)),
        compiler_params=pltpu.CompilerParams(dimension_semantics=("parallel",)),
    )(x, *weights)


# ------------------------------------------------------------------------------
# Kernel 2: fused 6-layer TransformerEncoder (point_mixer), point-major input.
# grid = (point blocks, layers).  All layers' weights live in VMEM with constant
# block indices (DMA'd once); the (bp, seq, D) activation stays in a VMEM scratch
# across the (arbitrary) layer axis and is written to HBM once, at the last layer.
# PyTorch layer is batch_first=False: sequence dim = B*T, batch dim = N (points).
# ------------------------------------------------------------------------------
def _point_mixer_kernel(x_ref, wqkv_ref, bqkv_ref, wo_ref, bo_ref, g1_ref, be1_ref,
                        w1_ref, b1_ref, w2_ref, b2_ref, g2_ref, be2_ref,
                        o_ref, act_ref):
    layer = pl.program_id(1)

    @pl.when(layer == 0)
    def _():
        act_ref[...] = x_ref[...]

    x3 = act_ref[...]                                      # (bp, seq, D)
    bp, seq, d = x3.shape
    rows = bp * seq
    x2 = x3.reshape(rows, d)
    scale = 1.0 / math.sqrt(HEAD_DIM)

    # fused QKV projection over all bp*seq rows (full MXU feed).
    qkv2 = jnp.dot(x2, wqkv_ref[layer], preferred_element_type=jnp.float32) + bqkv_ref[layer]
    qkv = qkv2.reshape(bp, seq, 3 * d)

    # Attention batched over the bp points (single-batch-dim einsums).  Per-head
    # contexts are folded straight through sublane slices of the output projection
    # instead of an 8-way lane concat.
    # TODO(synk): tile the (seq, seq) scores flash-style for long sequences (seq >~ 1-2K,
    #             especially on v7x's 64 MiB VMEM).
    wo_l = wo_ref[layer]
    attn2 = jnp.zeros((rows, d), jnp.float32)
    for h in range(NUM_HEADS):
        lo = h * HEAD_DIM
        q = qkv[..., lo:lo + HEAD_DIM]
        k = qkv[..., d + lo:d + lo + HEAD_DIM]
        v = qkv[..., 2 * d + lo:2 * d + lo + HEAD_DIM]
        s = jnp.einsum('bqd,bkd->bqk', q, k, preferred_element_type=jnp.float32) * scale
        s = s - jnp.max(s, axis=-1, keepdims=True)
        e = jnp.exp(s)
        pr = e * pl.reciprocal(jnp.sum(e, axis=-1, keepdims=True), approx=True)
        ctx = jnp.einsum('bqk,bkd->bqd', pr, v, preferred_element_type=jnp.float32)
        attn2 = attn2 + jnp.dot(ctx.reshape(rows, HEAD_DIM), wo_l[lo:lo + HEAD_DIM, :],
                                preferred_element_type=jnp.float32)
    attn2 = attn2 + bo_ref[layer]

    h1 = _layernorm(x2 + attn2, g1_ref[layer], be1_ref[layer])
    ff = jnp.maximum(
        jnp.dot(h1, w1_ref[layer], preferred_element_type=jnp.float32) + b1_ref[layer], 0.0)
    ff = jnp.dot(ff, w2_ref[layer], preferred_element_type=jnp.float32) + b2_ref[layer]
    out = _layernorm(h1 + ff, g2_ref[layer], be2_ref[layer]).reshape(bp, seq, d)

    act_ref[...] = out

    @pl.when(layer == pl.num_programs(1) - 1)
    def _():
        o_ref[...] = out


def point_mixer(x, p):
    n, seq, d = x.shape                               # point-major: (N, B*T, D)
    nl = p["wqkv"].shape[0]
    bp = _lead_block(n, 16)
    names = ("wqkv", "bqkv", "wo", "bo", "g1", "be1", "w1", "b1", "w2", "b2", "g2", "be2")
    weights = tuple(p[k] for k in names)
    in_specs = [pl.BlockSpec((bp, seq, d), lambda i, l: (i, 0, 0))]
    # full weight stacks, constant block index -> DMA'd to VMEM once, resident thereafter.
    in_specs += [pl.BlockSpec(w.shape, lambda i, l: (0, 0, 0)) for w in weights]
    return pl.pallas_call(
        _point_mixer_kernel,
        out_shape=jax.ShapeDtypeStruct((n, seq, d), jnp.float32),
        grid=(pl.cdiv(n, bp), nl),
        in_specs=in_specs,
        out_specs=pl.BlockSpec((bp, seq, d), lambda i, l: (i, 0, 0)),
        scratch_shapes=[pltpu.VMEM((bp, seq, d), jnp.float32)],
        compiler_params=pltpu.CompilerParams(
            dimension_semantics=("parallel", "arbitrary")),
    )(x, *weights)


# ------------------------------------------------------------------------------
# Kernel 3: fused JointAttention + joint_ff, batched over B*T frames per grid step.
# Fused (D, 2D) kv projection; softmax over the *points* dim (exactly like the module);
# the joint_ff MLP is applied to the (bb, J, D) context in the same kernel.
# ------------------------------------------------------------------------------
def _joint_attn_ff_kernel(x_ref, wkv_ref, bkv_ref, jet_ref,
                          w1_ref, b1_ref, g_ref, be_ref, w2_ref, b2_ref, o_ref):
    x = x_ref[...]                                        # (bb, N, D)
    bb, n, d = x.shape
    j = jet_ref.shape[1]
    kv = jnp.dot(x.reshape(bb * n, d), wkv_ref[...],
                 preferred_element_type=jnp.float32) + bkv_ref[...]          # (bb*N, 2D)
    logits = jnp.dot(kv[:, :d], jet_ref[...],
                     preferred_element_type=jnp.float32).reshape(bb, n, j)   # (bb, N, J)
    v = kv[:, d:].reshape(bb, n, d)
    logits = logits - jnp.max(logits, axis=1, keepdims=True)                 # softmax over points
    e = jnp.exp(logits)
    attn = e * pl.reciprocal(jnp.sum(e, axis=1, keepdims=True), approx=True)  # (bb, N, J)
    ctx = jnp.einsum('bjn,bnd->bjd', jnp.swapaxes(attn, 1, 2), v,
                     preferred_element_type=jnp.float32)                     # (bb, J, D)
    # joint_ff: Linear -> LayerNorm -> ReLU -> Linear, fused (weights VMEM-resident).
    c2 = ctx.reshape(bb * j, d)
    hf = jnp.dot(c2, w1_ref[...], preferred_element_type=jnp.float32) + b1_ref[...]
    hf = jnp.maximum(_layernorm(hf, g_ref[...], be_ref[...]), 0.0)
    out = jnp.dot(hf, w2_ref[...], preferred_element_type=jnp.float32) + b2_ref[...]
    o_ref[...] = out.reshape(bb, j, d)


def joint_attn_ff(x, p_attn, p_ff):
    bt, n, d = x.shape
    j = p_attn["jet"].shape[1]
    bb = _lead_block(bt, 16)
    weights = (p_attn["wkv"], p_attn["bkv"], p_attn["jet"],
               p_ff["w1"], p_ff["b1"], p_ff["g"], p_ff["be"], p_ff["w2"], p_ff["b2"])
    in_specs = [pl.BlockSpec((bb, n, d), lambda i: (i, 0, 0))]
    in_specs += [pl.BlockSpec(w.shape, lambda i: (0, 0)) for w in weights]
    return pl.pallas_call(
        _joint_attn_ff_kernel,
        out_shape=jax.ShapeDtypeStruct((bt, j, d), jnp.float32),
        grid=(pl.cdiv(bt, bb),),
        in_specs=in_specs,
        out_specs=pl.BlockSpec((bb, j, d), lambda i: (i, 0, 0)),
        compiler_params=pltpu.CompilerParams(dimension_semantics=("parallel",)),
    )(x, *weights)


# ------------------------------------------------------------------------------
# Kernel 4: per-row BN affine (CTRGCN data_bn, eval) fused into the pos_dec MLP.
# ------------------------------------------------------------------------------
def _bn_mlp_kernel(x_ref, sc_ref, sh_ref,
                   w1_ref, b1_ref, g_ref, be_ref, w2_ref, b2_ref, o_ref):
    x = x_ref[...] * sc_ref[...] + sh_ref[...]
    h = jnp.dot(x, w1_ref[...], preferred_element_type=jnp.float32) + b1_ref[...]
    h = jnp.maximum(_layernorm(h, g_ref[...], be_ref[...]), 0.0)
    o_ref[...] = jnp.dot(h, w2_ref[...], preferred_element_type=jnp.float32) + b2_ref[...]


def bn_mlp_block(x, scale, shift, p, block_rows=512):
    m, din = x.shape
    dout = p["w2"].shape[1]
    bm = _row_block(m, block_rows)
    weights = (p["w1"], p["b1"], p["g"], p["be"], p["w2"], p["b2"])
    row_spec = pl.BlockSpec((bm, din), lambda i: (i, 0))
    in_specs = [row_spec, row_spec, row_spec]
    in_specs += [pl.BlockSpec(w.shape, lambda i: (0, 0)) for w in weights]
    return pl.pallas_call(
        _bn_mlp_kernel,
        out_shape=jax.ShapeDtypeStruct((m, dout), jnp.float32),
        grid=(pl.cdiv(m, bm),),
        in_specs=in_specs,
        out_specs=pl.BlockSpec((bm, dout), lambda i: (i, 0)),
        compiler_params=pltpu.CompilerParams(dimension_semantics=("parallel",)),
    )(x, scale, shift, *weights)


# ------------------------------------------------------------------------------
# Full DGModel forward
# ------------------------------------------------------------------------------
@jax.jit
def dg_model_forward(params, inp):
    b, t, n, c = inp.shape
    bt = b * t

    # point-major raw input (cheap transpose of the 5-channel tensor, 13x fewer bytes
    # than transposing the 64-d activation) -> the encoder emits point-major rows that
    # feed the mixer with no activation transpose.
    x_raw = jnp.transpose(inp.reshape(bt, n, c), (1, 0, 2)).reshape(n * bt, c)
    x = point_encoder(x_raw, params["pos_enc"], params["feat_enc"])
    x = x.reshape(n, bt, DIM)                              # (N, B*T, D), point-major

    # point mixer (PyTorch batch_first=False): sequence dim = B*T, batch dim = N points.
    x = point_mixer(x, params["point_mixer"])              # (N, B*T, D)

    # frame-major for the joint stage.
    # TODO(synk): fold this remaining transpose into the mixer out BlockSpec.
    x = jnp.transpose(x, (1, 0, 2))                        # (B*T, N, D)

    x = joint_attn_ff(x, params["joint_attn"], params["joint_ff"])   # (B*T, J, D)
    j = x.shape[1]
    x = x.reshape(b, t, j, DIM)

    # CTRGCN: data_bn (eval, running stats) + GCN stages + centre-frame slice.
    # TODO(synk): CTRGCNBlock / MMWaveGraph not defined in source -> stages are identity,
    # so the elementwise data_bn commutes with the centre-frame slice and is applied on
    # the slice only (fused into the pos_dec kernel).
    gcn = params["gcn"]
    scale = gcn["w"] * jax.lax.rsqrt(gcn["rv"] + BN_EPS)           # (J, D)
    shift = gcn["b"] - gcn["rm"] * scale                           # (J, D)
    xc = x[:, t // 2].reshape(b * j, DIM)                          # centre frame, (B*J, D)
    sc = jnp.tile(scale, (b, 1))
    sh = jnp.tile(shift, (b, 1))

    skl = bn_mlp_block(xc, sc, sh, params["pos_dec"])              # (B*J, 3)
    return skl.reshape(b, 1, j, 3)


# ------------------------------------------------------------------------------
# deterministic parameter construction
# ------------------------------------------------------------------------------
def _dense(key, din, dout):
    return (math.sqrt(2.0 / din) * jax.random.normal(key, (din, dout))).astype(jnp.float32)


def _mlp_params(key, din, dh, dout):
    k1, k2 = jax.random.split(key)
    return dict(w1=_dense(k1, din, dh), b1=jnp.zeros((1, dh), jnp.float32),
                g=jnp.ones((1, dh), jnp.float32), be=jnp.zeros((1, dh), jnp.float32),
                w2=_dense(k2, dh, dout), b2=jnp.zeros((1, dout), jnp.float32))


def _enc_stack_params(key, num_layers):
    d, f = DIM, FFN_DIM

    def one(k):
        ks = jax.random.split(k, 6)
        wq, wk, wv, wo = (_dense(ks[i], d, d) for i in range(4))
        return dict(
            wqkv=jnp.concatenate([wq, wk, wv], axis=1),            # (D, 3D), fused QKV
            bqkv=jnp.zeros((1, 3 * d), jnp.float32),
            wo=wo, bo=jnp.zeros((1, d), jnp.float32),
            g1=jnp.ones((1, d), jnp.float32), be1=jnp.zeros((1, d), jnp.float32),
            w1=_dense(ks[4], d, f), b1=jnp.zeros((1, f), jnp.float32),
            w2=_dense(ks[5], f, d), b2=jnp.zeros((1, d), jnp.float32),
            g2=jnp.ones((1, d), jnp.float32), be2=jnp.zeros((1, d), jnp.float32))

    layers = [one(k) for k in jax.random.split(key, num_layers)]
    # stack each parameter on a leading "layer" axis -> one VMEM-resident stack per tensor.
    return {name: jnp.stack([lyr[name] for lyr in layers], axis=0) for name in layers[0]}


def init_params(key):
    keys = jax.random.split(key, 8)
    d, j = DIM, NUM_JOINTS
    wk = _dense(keys[3], d, d)
    wv = _dense(keys[4], d, d)
    je = jax.random.normal(keys[5], (j, d)).astype(jnp.float32)    # joint_emb
    return dict(
        pos_enc=_mlp_params(keys[0], 3, d // 4, d // 2),
        feat_enc=_mlp_params(keys[1], NUM_FEATURES, d // 4, d // 2),
        point_mixer=_enc_stack_params(keys[2], NUM_LAYERS_POINT),
        joint_attn=dict(
            wkv=jnp.concatenate([wk, wv], axis=1),                 # (D, 2D), fused to_kv
            bkv=jnp.zeros((1, 2 * d), jnp.float32),
            jet=jnp.transpose(je)),                                # joint_emb^T, (D, J)
        joint_ff=_mlp_params(keys[6], d, 2 * d, d),
        gcn=dict(w=jnp.ones((j, d), jnp.float32), b=jnp.zeros((j, d), jnp.float32),
                 rm=jnp.zeros((j, d), jnp.float32), rv=jnp.ones((j, d), jnp.float32)),
        pos_dec=_mlp_params(keys[7], d, d // 2, 3),
    )


if __name__ == "__main__":
    key = jax.random.PRNGKey(0)
    pkey, xkey = jax.random.split(key)
    params = init_params(pkey)

    B, T, N = 2, 4, 8
    x = jax.random.normal(xkey, (B, T, N, 3 + NUM_FEATURES), dtype=jnp.float32)

    skl = dg_model_forward(params, x)
    skl = jax.block_until_ready(skl)
    assert skl.shape == (B, 1, NUM_JOINTS, 3), skl.shape
    assert bool(jnp.all(jnp.isfinite(skl)))
    print("KERNEL_OK")
</pallas_src>

<mosaic_0001>
module attributes {stable_mosaic.version = 11 : i64} {
  func.func @_point_enc_kernel(%arg0: i32, %arg1: memref<32x5xf32, #tpu.memory_space<vmem>>, %arg2: memref<3x16xf32, #tpu.memory_space<vmem>>, %arg3: memref<1x16xf32, #tpu.memory_space<vmem>>, %arg4: memref<1x16xf32, #tpu.memory_space<vmem>>, %arg5: memref<1x16xf32, #tpu.memory_space<vmem>>, %arg6: memref<16x32xf32, #tpu.memory_space<vmem>>, %arg7: memref<1x32xf32, #tpu.memory_space<vmem>>, %arg8: memref<2x16xf32, #tpu.memory_space<vmem>>, %arg9: memref<1x16xf32, #tpu.memory_space<vmem>>, %arg10: memref<1x16xf32, #tpu.memory_space<vmem>>, %arg11: memref<1x16xf32, #tpu.memory_space<vmem>>, %arg12: memref<16x32xf32, #tpu.memory_space<vmem>>, %arg13: memref<1x32xf32, #tpu.memory_space<vmem>>, %arg14: memref<32x64xf32, #tpu.memory_space<vmem>>) attributes {dimension_semantics = [#tpu.dimension_semantics<parallel>], iteration_bounds = array<i64: 2>, scalar_prefetch = 0 : i64, scratch_operands = 0 : i64, tpu.core_type = #tpu.core_type<tc>, window_params = [{transform_indices = @transform_0, window_bounds = array<i64: 32, 5>}, {pipeline_mode = #tpu.pipeline_mode<synchronous>, transform_indices = @transform_1, window_bounds = array<i64: 3, 16>}, {pipeline_mode = #tpu.pipeline_mode<synchronous>, transform_indices = @transform_2, window_bounds = array<i64: 1, 16>}, {pipeline_mode = #tpu.pipeline_mode<synchronous>, transform_indices = @transform_3, window_bounds = array<i64: 1, 16>}, {pipeline_mode = #tpu.pipeline_mode<synchronous>, transform_indices = @transform_4, window_bounds = array<i64: 1, 16>}, {pipeline_mode = #tpu.pipeline_mode<synchronous>, transform_indices = @transform_5, window_bounds = array<i64: 16, 32>}, {pipeline_mode = #tpu.pipeline_mode<synchronous>, transform_indices = @transform_6, window_bounds = array<i64: 1, 32>}, {pipeline_mode = #tpu.pipeline_mode<synchronous>, transform_indices = @transform_7, window_bounds = array<i64: 2, 16>}, {pipeline_mode = #tpu.pipeline_mode<synchronous>, transform_indices = @transform_8, window_bounds = array<i64: 1, 16>}, {pipeline_mode = #tpu.pipeline_mode<synchronous>, transform_indices = @transform_9, window_bounds = array<i64: 1, 16>}, {pipeline_mode = #tpu.pipeline_mode<synchronous>, transform_indices = @transform_10, window_bounds = array<i64: 1, 16>}, {pipeline_mode = #tpu.pipeline_mode<synchronous>, transform_indices = @transform_11, window_bounds = array<i64: 16, 32>}, {pipeline_mode = #tpu.pipeline_mode<synchronous>, transform_indices = @transform_12, window_bounds = array<i64: 1, 32>}, {transform_indices = @transform_13, window_bounds = array<i64: 32, 64>}]} {
    %c0 = arith.constant 0 : index
    %c0_0 = arith.constant 0 : index
    %0 = vector.load %arg1[%c0, %c0_0] : memref<32x5xf32, #tpu.memory_space<vmem>>, vector<32x5xf32>
    %1 = vector.extract_strided_slice %0 {offsets = [0, 0], sizes = [32, 3], strides = [1, 1]} : vector<32x5xf32> to vector<32x3xf32>
    %2 = vector.extract_strided_slice %0 {offsets = [0, 3], sizes = [32, 2], strides = [1, 1]} : vector<32x5xf32> to vector<32x2xf32>
    %c0_1 = arith.constant 0 : index
    %c0_2 = arith.constant 0 : index
    %3 = vector.load %arg2[%c0_1, %c0_2] : memref<3x16xf32, #tpu.memory_space<vmem>>, vector<3x16xf32>
    %cst = arith.constant dense<0.000000e+00> : vector<32x16xf32>
    %4 = tpu.matmul %1, %3, %cst {dimension_numbers = #tpu.dot_dimension_numbers<[1], [0], [0], [1], [0, 0, 1, 1], [], []>} : vector<32x3xf32>, vector<3x16xf32>, vector<32x16xf32> -> vector<32x16xf32>
    %c0_3 = arith.constant 0 : index
    %c0_4 = arith.constant 0 : index
    %5 = vector.load %arg3[%c0_3, %c0_4] : memref<1x16xf32, #tpu.memory_space<vmem>>, vector<1x16xf32>
    %6 = vector.broadcast %5 : vector<1x16xf32> to vector<32x16xf32>
    %7 = arith.addf %4, %6 : vector<32x16xf32>
    %c0_5 = arith.constant 0 : index
    %c0_6 = arith.constant 0 : index
    %8 = vector.load %arg4[%c0_5, %c0_6] : memref<1x16xf32, #tpu.memory_space<vmem>>, vector<1x16xf32>
    %c0_7 = arith.constant 0 : index
    %c0_8 = arith.constant 0 : index
    %9 = vector.load %arg5[%c0_7, %c0_8] : memref<1x16xf32, #tpu.memory_space<vmem>>, vector<1x16xf32>
    %cst_9 = arith.constant dense<0.000000e+00> : vector<32xf32>
    %10 = vector.multi_reduction <add>, %7, %cst_9 [1] : vector<32x16xf32> to vector<32xf32>
    %11 = vector.shape_cast %10 : vector<32xf32> to vector<32x1xf32>
    %cst_10 = arith.constant 1.600000e+01 : f32
    %12 = vector.broadcast %cst_10 : f32 to vector<32x1xf32>
    %13 = arith.divf %11, %12 : vector<32x1xf32>
    %14 = vector.broadcast %13 : vector<32x1xf32> to vector<32x16xf32>
    %15 = arith.subf %7, %14 : vector<32x16xf32>
    %16 = arith.mulf %15, %15 : vector<32x16xf32>
    %cst_11 = arith.constant dense<0.000000e+00> : vector<32xf32>
    %17 = vector.multi_reduction <add>, %16, %cst_11 [1] : vector<32x16xf32> to vector<32xf32>
    %18 = vector.shape_cast %17 : vector<32xf32> to vector<32x1xf32>
    %cst_12 = arith.constant 1.600000e+01 : f32
    %19 = vector.broadcast %cst_12 : f32 to vector<32x1xf32>
    %20 = arith.divf %18, %19 : vector<32x1xf32>
    %21 = vector.broadcast %13 : vector<32x1xf32> to vector<32x16xf32>
    %22 = arith.subf %7, %21 : vector<32x16xf32>
    %cst_13 = arith.constant 9.99999974E-6 : f32
    %23 = vector.broadcast %cst_13 : f32 to vector<32x1xf32>
    %24 = arith.addf %20, %23 : vector<32x1xf32>
    %25 = math.rsqrt %24 : vector<32x1xf32>
    %26 = vector.broadcast %25 : vector<32x1xf32> to vector<32x16xf32>
    %27 = arith.mulf %22, %26 : vector<32x16xf32>
    %28 = vector.broadcast %8 : vector<1x16xf32> to vector<32x16xf32>
    %29 = arith.mulf %27, %28 : vector<32x16xf32>
    %30 = vector.broadcast %9 : vector<1x16xf32> to vector<32x16xf32>
    %31 = arith.addf %29, %30 : vector<32x16xf32>
    %cst_14 = arith.constant 0.000000e+00 : f32
    %32 = vector.broadcast %cst_14 : f32 to vector<32x16xf32>
    %33 = arith.maximumf %31, %32 : vector<32x16xf32>
    %c0_15 = arith.constant 0 : index
    %c0_16 = arith.constant 0 : index
    %34 = vector.load %arg6[%c0_15, %c0_16] : memref<16x32xf32, #tpu.memory_space<vmem>>, vector<16x32xf32>
    %cst_17 = arith.constant dense<0.000000e+00> : vector<32x32xf32>
    %35 = tpu.matmul %33, %34, %cst_17 {dimension_numbers = #tpu.dot_dimension_numbers<[1], [0], [0], [1], [0, 0, 1, 1], [], []>} : vector<32x16xf32>, vector<16x32xf32>, vector<32x32xf32> -> vector<32x32xf32>
    %c0_18 = arith.constant 0 : index
    %c0_19 = arith.constant 0 : index
    %36 = vector.load %arg7[%c0_18, %c0_19] : memref<1x32xf32, #tpu.memory_space<vmem>>, vector<1x32xf32>
    %37 = vector.broadcast %36 : vector<1x32xf32> to vector<32x32xf32>
    %38 = arith.addf %35, %37 : vector<32x32xf32>
    %c0_20 = arith.constant 0 : index
    %c0_21 = arith.constant 0 : index
    %39 = vector.load %arg8[%c0_20, %c0_21] : memref<2x16xf32, #tpu.memory_space<vmem>>, vector<2x16xf32>
    %cst_22 = arith.constant dense<0.000000e+00> : vector<32x16xf32>
    %40 = tpu.matmul %2, %39, %cst_22 {dimension_numbers = #tpu.dot_dimension_numbers<[1], [0], [0], [1], [0, 0, 1, 1], [], []>} : vector<32x2xf32>, vector<2x16xf32>, vector<32x16xf32> -> vector<32x16xf32>
    %c0_23 = arith.constant 0 : index
    %c0_24 = arith.constant 0 : index
    %41 = vector.load %arg9[%c0_23, %c0_24] : memref<1x16xf32, #tpu.memory_space<vmem>>, vector<1x16xf32>
    %42 = vector.broadcast %41 : vector<1x16xf32> to vector<32x16xf32>
    %43 = arith.addf %40, %42 : vector<32x16xf32>
    %c0_25 = arith.constant 0 : index
    %c0_26 = arith.constant 0 : index
    %44 = vector.load %arg10[%c0_25, %c0_26] : memref<1x16xf32, #tpu.memory_space<vmem>>, vector<1x16xf32>
    %c0_27 = arith.constant 0 : index
    %c0_28 = arith.constant 0 : index
    %45 = vector.load %arg11[%c0_27, %c0_28] : memref<1x16xf32, #tpu.memory_space<vmem>>, vector<1x16xf32>
    %cst_29 = arith.constant dense<0.000000e+00> : vector<32xf32>
    %46 = vector.multi_reduction <add>, %43, %cst_29 [1] : vector<32x16xf32> to vector<32xf32>
    %47 = vector.shape_cast %46 : vector<32xf32> to vector<32x1xf32>
    %cst_30 = arith.constant 1.600000e+01 : f32
    %48 = vector.broadcast %cst_30 : f32 to vector<32x1xf32>
    %49 = arith.divf %47, %48 : vector<32x1xf32>
    %50 = vector.broadcast %49 : vector<32x1xf32> to vector<32x16xf32>
    %51 = arith.subf %43, %50 : vector<32x16xf32>
    %52 = arith.mulf %51, %51 : vector<32x16xf32>
    %cst_31 = arith.constant dense<0.000000e+00> : vector<32xf32>
    %53 = vector.multi_reduction <add>, %52, %cst_31 [1] : vector<32x16xf32> to vector<32xf32>
    %54 = vector.shape_cast %53 : vector<32xf32> to vector<32x1xf32>
    %cst_32 = arith.constant 1.600000e+01 : f32
    %55 = vector.broadcast %cst_32 : f32 to vector<32x1xf32>
    %56 = arith.divf %54, %55 : vector<32x1xf32>
    %57 = vector.broadcast %49 : vector<32x1xf32> to vector<32x16xf32>
    %58 = arith.subf %43, %57 : vector<32x16xf32>
    %cst_33 = arith.constant 9.99999974E-6 : f32
    %59 = vector.broadcast %cst_33 : f32 to vector<32x1xf32>
    %60 = arith.addf %56, %59 : vector<32x1xf32>
    %61 = math.rsqrt %60 : vector<32x1xf32>
    %62 = vector.broadcast %61 : vector<32x1xf32> to vector<32x16xf32>
    %63 = arith.mulf %58, %62 : vector<32x16xf32>
    %64 = vector.broadcast %44 : vector<1x16xf32> to vector<32x16xf32>
    %65 = arith.mulf %63, %64 : vector<32x16xf32>
    %66 = vector.broadcast %45 : vector<1x16xf32> to vector<32x16xf32>
    %67 = arith.addf %65, %66 : vector<32x16xf32>
    %cst_34 = arith.constant 0.000000e+00 : f32
    %68 = vector.broadcast %cst_34 : f32 to vector<32x16xf32>
    %69 = arith.maximumf %67, %68 : vector<32x16xf32>
    %c0_35 = arith.constant 0 : index
    %c0_36 = arith.constant 0 : index
    %70 = vector.load %arg12[%c0_35, %c0_36] : memref<16x32xf32, #tpu.memory_space<vmem>>, vector<16x32xf32>
    %cst_37 = arith.constant dense<0.000000e+00> : vector<32x32xf32>
    %71 = tpu.matmul %69, %70, %cst_37 {dimension_numbers = #tpu.dot_dimension_numbers<[1], [0], [0], [1], [0, 0, 1, 1], [], []>} : vector<32x16xf32>, vector<16x32xf32>, vector<32x32xf32> -> vector<32x32xf32>
    %c0_38 = arith.constant 0 : index
    %c0_39 = arith.constant 0 : index
    %72 = vector.load %arg13[%c0_38, %c0_39] : memref<1x32xf32, #tpu.memory_space<vmem>>, vector<1x32xf32>
    %73 = vector.broadcast %72 : vector<1x32xf32> to vector<32x32xf32>
    %74 = arith.addf %71, %73 : vector<32x32xf32>
    %75 = tpu.concatenate %38, %74 in 1 : vector<32x32xf32>, vector<32x32xf32> -> vector<32x64xf32>
    %c0_40 = arith.constant 0 : index
    %c0_41 = arith.constant 0 : index
    %76 = vector.load %arg14[%c0_40, %c0_41] : memref<32x64xf32, #tpu.memory_space<vmem>>, vector<32x64xf32>
    tpu.vector_store %arg14[%c0_40, %c0_41], %75 {strides = array<i32>} : memref<32x64xf32, #tpu.memory_space<vmem>>, vector<32x64xf32>,
    return
  }
  func.func @transform_0(%arg0: i32) -> (i32, i32) {
    %c0_i32 = arith.constant 0 : i32
    %c0_i32_0 = arith.constant 0 : i32
    return %arg0, %c0_i32 : i32, i32
  }
  func.func @transform_1(%arg0: i32) -> (i32, i32) {
    %c0_i32 = arith.constant 0 : i32
    %c0_i32_0 = arith.constant 0 : i32
    %c0_i32_1 = arith.constant 0 : i32
    return %c0_i32, %c0_i32_0 : i32, i32
  }
  func.func @transform_2(%arg0: i32) -> (i32, i32) {
    %c0_i32 = arith.constant 0 : i32
    %c0_i32_0 = arith.constant 0 : i32
    %c0_i32_1 = arith.constant 0 : i32
    return %c0_i32, %c0_i32_0 : i32, i32
  }
  func.func @transform_3(%arg0: i32) -> (i32, i32) {
    %c0_i32 = arith.constant 0 : i32
    %c0_i32_0 = arith.constant 0 : i32
    %c0_i32_1 = arith.constant 0 : i32
    return %c0_i32, %c0_i32_0 : i32, i32
  }
  func.func @transform_4(%arg0: i32) -> (i32, i32) {
    %c0_i32 = arith.constant 0 : i32
    %c0_i32_0 = arith.constant 0 : i32
    %c0_i32_1 = arith.constant 0 : i32
    return %c0_i32, %c0_i32_0 : i32, i32
  }
  func.func @transform_5(%arg0: i32) -> (i32, i32) {
    %c0_i32 = arith.constant 0 : i32
    %c0_i32_0 = arith.constant 0 : i32
    %c0_i32_1 = arith.constant 0 : i32
    return %c0_i32, %c0_i32_0 : i32, i32
  }
  func.func @transform_6(%arg0: i32) -> (i32, i32) {
    %c0_i32 = arith.constant 0 : i32
    %c0_i32_0 = arith.constant 0 : i32
    %c0_i32_1 = arith.constant 0 : i32
    return %c0_i32, %c0_i32_0 : i32, i32
  }
  func.func @transform_7(%arg0: i32) -> (i32, i32) {
    %c0_i32 = arith.constant 0 : i32
    %c0_i32_0 = arith.constant 0 : i32
    %c0_i32_1 = arith.constant 0 : i32
    return %c0_i32, %c0_i32_0 : i32, i32
  }
  func.func @transform_8(%arg0: i32) -> (i32, i32) {
    %c0_i32 = arith.constant 0 : i32
    %c0_i32_0 = arith.constant 0 : i32
    %c0_i32_1 = arith.constant 0 : i32
    return %c0_i32, %c0_i32_0 : i32, i32
  }
  func.func @transform_9(%arg0: i32) -> (i32, i32) {
    %c0_i32 = arith.constant 0 : i32
    %c0_i32_0 = arith.constant 0 : i32
    %c0_i32_1 = arith.constant 0 : i32
    return %c0_i32, %c0_i32_0 : i32, i32
  }
  func.func @transform_10(%arg0: i32) -> (i32, i32) {
    %c0_i32 = arith.constant 0 : i32
    %c0_i32_0 = arith.constant 0 : i32
    %c0_i32_1 = arith.constant 0 : i32
    return %c0_i32, %c0_i32_0 : i32, i32
  }
  func.func @transform_11(%arg0: i32) -> (i32, i32) {
    %c0_i32 = arith.constant 0 : i32
    %c0_i32_0 = arith.constant 0 : i32
    %c0_i32_1 = arith.constant 0 : i32
    return %c0_i32, %c0_i32_0 : i32, i32
  }
  func.func @transform_12(%arg0: i32) -> (i32, i32) {
    %c0_i32 = arith.constant 0 : i32
    %c0_i32_0 = arith.constant 0 : i32
    %c0_i32_1 = arith.constant 0 : i32
    return %c0_i32, %c0_i32_0 : i32, i32
  }
  func.func @transform_13(%arg0: i32) -> (i32, i32) {
    %c0_i32 = arith.constant 0 : i32
    %c0_i32_0 = arith.constant 0 : i32
    return %arg0, %c0_i32 : i32, i32
  }
}

module attributes {stable_mosaic.version = 11 : i64} {
  func.func @_point_mixer_kernel(%arg0: i32, %arg1: i32, %arg2: memref<4x8x64xf32, #tpu.memory_space<vmem>>, %arg3: memref<6x64x192xf32, #tpu.memory_space<vmem>>, %arg4: memref<6x1x192xf32, #tpu.memory_space<vmem>>, %arg5: memref<6x64x64xf32, #tpu.memory_space<vmem>>, %arg6: memref<6x1x64xf32, #tpu.memory_space<vmem>>, %arg7: memref<6x1x64xf32, #tpu.memory_space<vmem>>, %arg8: memref<6x1x64xf32, #tpu.memory_space<vmem>>, %arg9: memref<6x64x256xf32, #tpu.memory_space<vmem>>, %arg10: memref<6x1x256xf32, #tpu.memory_space<vmem>>, %arg11: memref<6x256x64xf32, #tpu.memory_space<vmem>>, %arg12: memref<6x1x64xf32, #tpu.memory_space<vmem>>, %arg13: memref<6x1x64xf32, #tpu.memory_space<vmem>>, %arg14: memref<6x1x64xf32, #tpu.memory_space<vmem>>, %arg15: memref<4x8x64xf32, #tpu.memory_space<vmem>>, %arg16: memref<4x8x64xf32, #tpu.memory_space<vmem>>) attributes {dimension_semantics = [#tpu.dimension_semantics<parallel>, #tpu.dimension_semantics<arbitrary>], iteration_bounds = array<i64: 2, 6>, scalar_prefetch = 0 : i64, scratch_operands = 1 : i64, tpu.core_type = #tpu.core_type<tc>, window_params = [{transform_indices = @transform_0, window_bounds = array<i64: 4, 8, 64>}, {pipeline_mode = #tpu.pipeline_mode<synchronous>, transform_indices = @transform_1, window_bounds = array<i64: 6, 64, 192>}, {pipeline_mode = #tpu.pipeline_mode<synchronous>, transform_indices = @transform_2, window_bounds = array<i64: 6, 1, 192>}, {pipeline_mode = #tpu.pipeline_mode<synchronous>, transform_indices = @transform_3, window_bounds = array<i64: 6, 64, 64>}, {pipeline_mode = #tpu.pipeline_mode<synchronous>, transform_indices = @transform_4, window_bounds = array<i64: 6, 1, 64>}, {pipeline_mode = #tpu.pipeline_mode<synchronous>, transform_indices = @transform_5, window_bounds = array<i64: 6, 1, 64>}, {pipeline_mode = #tpu.pipeline_mode<synchronous>, transform_indices = @transform_6, window_bounds = array<i64: 6, 1, 64>}, {pipeline_mode = #tpu.pipeline_mode<synchronous>, transform_indices = @transform_7, window_bounds = array<i64: 6, 64, 256>}, {pipeline_mode = #tpu.pipeline_mode<synchronous>, transform_indices = @transform_8, window_bounds = array<i64: 6, 1, 256>}, {pipeline_mode = #tpu.pipeline_mode<synchronous>, transform_indices = @transform_9, window_bounds = array<i64: 6, 256, 64>}, {pipeline_mode = #tpu.pipeline_mode<synchronous>, transform_indices = @transform_10, window_bounds = array<i64: 6, 1, 64>}, {pipeline_mode = #tpu.pipeline_mode<synchronous>, transform_indices = @transform_11, window_bounds = array<i64: 6, 1, 64>}, {pipeline_mode = #tpu.pipeline_mode<synchronous>, transform_indices = @transform_12, window_bounds = array<i64: 6, 1, 64>}, {transform_indices = @transform_13, window_bounds = array<i64: 4, 8, 64>}]} {
    %c0_i32 = arith.constant 0 : i32
    %0 = arith.cmpi eq, %arg1, %c0_i32 : i32
    %1 = arith.extui %0 : i1 to i32
    %c0_i32_0 = arith.constant 0 : i32
    %2 = arith.cmpi ne, %1, %c0_i32_0 : i32
    scf.if %2 {
      %c0_93 = arith.constant 0 : index
      %c0_94 = arith.constant 0 : index
      %c0_95 = arith.constant 0 : index
      %275 = vector.load %arg2[%c0_93, %c0_94, %c0_95] : memref<4x8x64xf32, #tpu.memory_space<vmem>>, vector<4x8x64xf32>
      %c0_96 = arith.constant 0 : index
      %c0_97 = arith.constant 0 : index
      %c0_98 = arith.constant 0 : index
      %276 = vector.load %arg16[%c0_96, %c0_97, %c0_98] : memref<4x8x64xf32, #tpu.memory_space<vmem>>, vector<4x8x64xf32>
      tpu.vector_store %arg16[%c0_96, %c0_97, %c0_98], %275 {strides = array<i32>} : memref<4x8x64xf32, #tpu.memory_space<vmem>>, vector<4x8x64xf32>,
    } else {
    }
    %c0 = arith.constant 0 : index
    %c0_1 = arith.constant 0 : index
    %c0_2 = arith.constant 0 : index
    %3 = vector.load %arg16[%c0, %c0_1, %c0_2] : memref<4x8x64xf32, #tpu.memory_space<vmem>>, vector<4x8x64xf32>
    %4 = vector.shape_cast %3 : vector<4x8x64xf32> to vector<32x64xf32>
    %5 = arith.index_cast %arg1 : i32 to index
    %c0_3 = arith.constant 0 : index
    %c0_4 = arith.constant 0 : index
    %6 = vector.load %arg3[%5, %c0_3, %c0_4] : memref<6x64x192xf32, #tpu.memory_space<vmem>>, vector<1x64x192xf32>
    %7 = vector.shape_cast %6 : vector<1x64x192xf32> to vector<64x192xf32>
    %cst = arith.constant dense<0.000000e+00> : vector<32x192xf32>
    %8 = tpu.matmul %4, %7, %cst {dimension_numbers = #tpu.dot_dimension_numbers<[1], [0], [0], [1], [0, 0, 1, 1], [], []>} : vector<32x64xf32>, vector<64x192xf32>, vector<32x192xf32> -> vector<32x192xf32>
    %9 = arith.index_cast %arg1 : i32 to index
    %c0_5 = arith.constant 0 : index
    %c0_6 = arith.constant 0 : index
    %10 = vector.load %arg4[%9, %c0_5, %c0_6] : memref<6x1x192xf32, #tpu.memory_space<vmem>>, vector<1x1x192xf32>
    %11 = vector.shape_cast %10 : vector<1x1x192xf32> to vector<1x192xf32>
    %12 = vector.broadcast %11 : vector<1x192xf32> to vector<32x192xf32>
    %13 = arith.addf %8, %12 : vector<32x192xf32>
    %14 = vector.shape_cast %13 : vector<32x192xf32> to vector<4x8x192xf32>
    %15 = arith.index_cast %arg1 : i32 to index
    %c0_7 = arith.constant 0 : index
    %c0_8 = arith.constant 0 : index
    %16 = vector.load %arg5[%15, %c0_7, %c0_8] : memref<6x64x64xf32, #tpu.memory_space<vmem>>, vector<1x64x64xf32>
    %17 = vector.shape_cast %16 : vector<1x64x64xf32> to vector<64x64xf32>
    %cst_9 = arith.constant 0.000000e+00 : f32
    %18 = vector.broadcast %cst_9 : f32 to vector<32x64xf32>
    %19 = vector.extract_strided_slice %14 {offsets = [0, 0, 0], sizes = [4, 8, 8], strides = [1, 1, 1]} : vector<4x8x192xf32> to vector<4x8x8xf32>
    %20 = vector.extract_strided_slice %14 {offsets = [0, 0, 64], sizes = [4, 8, 8], strides = [1, 1, 1]} : vector<4x8x192xf32> to vector<4x8x8xf32>
    %21 = vector.extract_strided_slice %14 {offsets = [0, 0, 128], sizes = [4, 8, 8], strides = [1, 1, 1]} : vector<4x8x192xf32> to vector<4x8x8xf32>
    "tpu.trace_start"() <{level = 10 : i32, message = "bqd,bkd->bqk"}> : () -> ()
    %cst_10 = arith.constant dense<0.000000e+00> : vector<4x8x8xf32>
    %22 = tpu.matmul %19, %20, %cst_10 {dimension_numbers = #tpu.dot_dimension_numbers<[2], [2], [1], [1], [0, 0, 0, 1, 1, 1], [0], [0]>} : vector<4x8x8xf32>, vector<4x8x8xf32>, vector<4x8x8xf32> -> vector<4x8x8xf32>
    "tpu.trace_stop"() : () -> ()
    %cst_11 = arith.constant 0.353553385 : f32
    %23 = vector.broadcast %cst_11 : f32 to vector<4x8x8xf32>
    %24 = arith.mulf %22, %23 : vector<4x8x8xf32>
    %cst_12 = arith.constant dense<0xFF800000> : vector<4x8xf32>
    %25 = vector.multi_reduction <maximumf>, %24, %cst_12 [2] : vector<4x8x8xf32> to vector<4x8xf32>
    %26 = vector.shape_cast %25 : vector<4x8xf32> to vector<4x8x1xf32>
    %27 = vector.broadcast %26 : vector<4x8x1xf32> to vector<4x8x8xf32>
    %28 = arith.subf %24, %27 : vector<4x8x8xf32>
    %29 = math.exp %28 : vector<4x8x8xf32>
    %cst_13 = arith.constant dense<0.000000e+00> : vector<4x8xf32>
    %30 = vector.multi_reduction <add>, %29, %cst_13 [2] : vector<4x8x8xf32> to vector<4x8xf32>
    %31 = vector.shape_cast %30 : vector<4x8xf32> to vector<4x8x1xf32>
    %32 = tpu.reciprocal %31 {approx = true} : vector<4x8x1xf32> -> vector<4x8x1xf32>
    %33 = vector.broadcast %32 : vector<4x8x1xf32> to vector<4x8x8xf32>
    %34 = arith.mulf %29, %33 : vector<4x8x8xf32>
    "tpu.trace_start"() <{level = 10 : i32, message = "bqk,bkd->bqd"}> : () -> ()
    %cst_14 = arith.constant dense<0.000000e+00> : vector<4x8x8xf32>
    %35 = tpu.matmul %34, %21, %cst_14 {dimension_numbers = #tpu.dot_dimension_numbers<[2], [1], [1], [2], [0, 0, 0, 1, 1, 2], [0], [0]>} : vector<4x8x8xf32>, vector<4x8x8xf32>, vector<4x8x8xf32> -> vector<4x8x8xf32>
    "tpu.trace_stop"() : () -> ()
    %36 = vector.shape_cast %35 : vector<4x8x8xf32> to vector<32x8xf32>
    %37 = vector.extract_strided_slice %17 {offsets = [0, 0], sizes = [8, 64], strides = [1, 1]} : vector<64x64xf32> to vector<8x64xf32>
    %cst_15 = arith.constant dense<0.000000e+00> : vector<32x64xf32>
    %38 = tpu.matmul %36, %37, %cst_15 {dimension_numbers = #tpu.dot_dimension_numbers<[1], [0], [0], [1], [0, 0, 1, 1], [], []>} : vector<32x8xf32>, vector<8x64xf32>, vector<32x64xf32> -> vector<32x64xf32>
    %39 = arith.addf %18, %38 : vector<32x64xf32>
    %40 = vector.extract_strided_slice %14 {offsets = [0, 0, 8], sizes = [4, 8, 8], strides = [1, 1, 1]} : vector<4x8x192xf32> to vector<4x8x8xf32>
    %41 = vector.extract_strided_slice %14 {offsets = [0, 0, 72], sizes = [4, 8, 8], strides = [1, 1, 1]} : vector<4x8x192xf32> to vector<4x8x8xf32>
    %42 = vector.extract_strided_slice %14 {offsets = [0, 0, 136], sizes = [4, 8, 8], strides = [1, 1, 1]} : vector<4x8x192xf32> to vector<4x8x8xf32>
    "tpu.trace_start"() <{level = 10 : i32, message = "bqd,bkd->bqk"}> : () -> ()
    %cst_16 = arith.constant dense<0.000000e+00> : vector<4x8x8xf32>
    %43 = tpu.matmul %40, %41, %cst_16 {dimension_numbers = #tpu.dot_dimension_numbers<[2], [2], [1], [1], [0, 0, 0, 1, 1, 1], [0], [0]>} : vector<4x8x8xf32>, vector<4x8x8xf32>, vector<4x8x8xf32> -> vector<4x8x8xf32>
    "tpu.trace_stop"() : () -> ()
    %cst_17 = arith.constant 0.353553385 : f32
    %44 = vector.broadcast %cst_17 : f32 to vector<4x8x8xf32>
    %45 = arith.mulf %43, %44 : vector<4x8x8xf32>
    %cst_18 = arith.constant dense<0xFF800000> : vector<4x8xf32>
    %46 = vector.multi_reduction <maximumf>, %45, %cst_18 [2] : vector<4x8x8xf32> to vector<4x8xf32>
    %47 = vector.shape_cast %46 : vector<4x8xf32> to vector<4x8x1xf32>
    %48 = vector.broadcast %47 : vector<4x8x1xf32> to vector<4x8x8xf32>
    %49 = arith.subf %45, %48 : vector<4x8x8xf32>
    %50 = math.exp %49 : vector<4x8x8xf32>
    %cst_19 = arith.constant dense<0.000000e+00> : vector<4x8xf32>
    %51 = vector.multi_reduction <add>, %50, %cst_19 [2] : vector<4x8x8xf32> to vector<4x8xf32>
    %52 = vector.shape_cast %51 : vector<4x8xf32> to vector<4x8x1xf32>
    %53 = tpu.reciprocal %52 {approx = true} : vector<4x8x1xf32> -> vector<4x8x1xf32>
    %54 = vector.broadcast %53 : vector<4x8x1xf32> to vector<4x8x8xf32>
    %55 = arith.mulf %50, %54 : vector<4x8x8xf32>
    "tpu.trace_start"() <{level = 10 : i32, message = "bqk,bkd->bqd"}> : () -> ()
    %cst_20 = arith.constant dense<0.000000e+00> : vector<4x8x8xf32>
    %56 = tpu.matmul %55, %42, %cst_20 {dimension_numbers = #tpu.dot_dimension_numbers<[2], [1], [1], [2], [0, 0, 0, 1, 1, 2], [0], [0]>} : vector<4x8x8xf32>, vector<4x8x8xf32>, vector<4x8x8xf32> -> vector<4x8x8xf32>
    "tpu.trace_stop"() : () -> ()
    %57 = vector.shape_cast %56 : vector<4x8x8xf32> to vector<32x8xf32>
    %58 = vector.extract_strided_slice %17 {offsets = [8, 0], sizes = [8, 64], strides = [1, 1]} : vector<64x64xf32> to vector<8x64xf32>
    %cst_21 = arith.constant dense<0.000000e+00> : vector<32x64xf32>
    %59 = tpu.matmul %57, %58, %cst_21 {dimension_numbers = #tpu.dot_dimension_numbers<[1], [0], [0], [1], [0, 0, 1, 1], [], []>} : vector<32x8xf32>, vector<8x64xf32>, vector<32x64xf32> -> vector<32x64xf32>
    %60 = arith.addf %39, %59 : vector<32x64xf32>
    %61 = vector.extract_strided_slice %14 {offsets = [0, 0, 16], sizes = [4, 8, 8], strides = [1, 1, 1]} : vector<4x8x192xf32> to vector<4x8x8xf32>
    %62 = vector.extract_strided_slice %14 {offsets = [0, 0, 80], sizes = [4, 8, 8], strides = [1, 1, 1]} : vector<4x8x192xf32> to vector<4x8x8xf32>
    %63 = vector.extract_strided_slice %14 {offsets = [0, 0, 144], sizes = [4, 8, 8], strides = [1, 1, 1]} : vector<4x8x192xf32> to vector<4x8x8xf32>
    "tpu.trace_start"() <{level = 10 : i32, message = "bqd,bkd->bqk"}> : () -> ()
    %cst_22 = arith.constant dense<0.000000e+00> : vector<4x8x8xf32>
    %64 = tpu.matmul %61, %62, %cst_22 {dimension_numbers = #tpu.dot_dimension_numbers<[2], [2], [1], [1], [0, 0, 0, 1, 1, 1], [0], [0]>} : vector<4x8x8xf32>, vector<4x8x8xf32>, vector<4x8x8xf32> -> vector<4x8x8xf32>
    "tpu.trace_stop"() : () -> ()
    %cst_23 = arith.constant 0.353553385 : f32
    %65 = vector.broadcast %cst_23 : f32 to vector<4x8x8xf32>
    %66 = arith.mulf %64, %65 : vector<4x8x8xf32>
    %cst_24 = arith.constant dense<0xFF800000> : vector<4x8xf32>
    %67 = vector.multi_reduction <maximumf>, %66, %cst_24 [2] : vector<4x8x8xf32> to vector<4x8xf32>
    %68 = vector.shape_cast %67 : vector<4x8xf32> to vector<4x8x1xf32>
    %69 = vector.broadcast %68 : vector<4x8x1xf32> to vector<4x8x8xf32>
    %70 = arith.subf %66, %69 : vector<4x8x8xf32>
    %71 = math.exp %70 : vector<4x8x8xf32>
    %cst_25 = arith.constant dense<0.000000e+00> : vector<4x8xf32>
    %72 = vector.multi_reduction <add>, %71, %cst_25 [2] : vector<4x8x8xf32> to vector<4x8xf32>
    %73 = vector.shape_cast %72 : vector<4x8xf32> to vector<4x8x1xf32>
    %74 = tpu.reciprocal %73 {approx = true} : vector<4x8x1xf32> -> vector<4x8x1xf32>
    %75 = vector.broadcast %74 : vector<4x8x1xf32> to vector<4x8x8xf32>
    %76 = arith.mulf %71, %75 : vector<4x8x8xf32>
    "tpu.trace_start"() <{level = 10 : i32, message = "bqk,bkd->bqd"}> : () -> ()
    %cst_26 = arith.constant dense<0.000000e+00> : vector<4x8x8xf32>
    %77 = tpu.matmul %76, %63, %cst_26 {dimension_numbers = #tpu.dot_dimension_numbers<[2], [1], [1], [2], [0, 0, 0, 1, 1, 2], [0], [0]>} : vector<4x8x8xf32>, vector<4x8x8xf32>, vector<4x8x8xf32> -> vector<4x8x8xf32>
    "tpu.trace_stop"() : () -> ()
    %78 = vector.shape_cast %77 : vector<4x8x8xf32> to vector<32x8xf32>
    %79 = vector.extract_strided_slice %17 {offsets = [16, 0], sizes = [8, 64], strides = [1, 1]} : vector<64x64xf32> to vector<8x64xf32>
    %cst_27 = arith.constant dense<0.000000e+00> : vector<32x64xf32>
    %80 = tpu.matmul %78, %79, %cst_27 {dimension_numbers = #tpu.dot_dimension_numbers<[1], [0], [0], [1], [0, 0, 1, 1], [], []>} : vector<32x8xf32>, vector<8x64xf32>, vector<32x64xf32> -> vector<32x64xf32>
    %81 = arith.addf %60, %80 : vector<32x64xf32>
    %82 = vector.extract_strided_slice %14 {offsets = [0, 0, 24], sizes = [4, 8, 8], strides = [1, 1, 1]} : vector<4x8x192xf32> to vector<4x8x8xf32>
    %83 = vector.extract_strided_slice %14 {offsets = [0, 0, 88], sizes = [4, 8, 8], strides = [1, 1, 1]} : vector<4x8x192xf32> to vector<4x8x8xf32>
    %84 = vector.extract_strided_slice %14 {offsets = [0, 0, 152], sizes = [4, 8, 8], strides = [1, 1, 1]} : vector<4x8x192xf32> to vector<4x8x8xf32>
    "tpu.trace_start"() <{level = 10 : i32, message = "bqd,bkd->bqk"}> : () -> ()
    %cst_28 = arith.constant dense<0.000000e+00> : vector<4x8x8xf32>
    %85 = tpu.matmul %82, %83, %cst_28 {dimension_numbers = #tpu.dot_dimension_numbers<[2], [2], [1], [1], [0, 0, 0, 1, 1, 1], [0], [0]>} : vector<4x8x8xf32>, vector<4x8x8xf32>, vector<4x8x8xf32> -> vector<4x8x8xf32>
    "tpu.trace_stop"() : () -> ()
    %cst_29 = arith.constant 0.353553385 : f32
    %86 = vector.broadcast %cst_29 : f32 to vector<4x8x8xf32>
    %87 = arith.mulf %85, %86 : vector<4x8x8xf32>
    %cst_30 = arith.constant dense<0xFF800000> : vector<4x8xf32>
    %88 = vector.multi_reduction <maximumf>, %87, %cst_30 [2] : vector<4x8x8xf32> to vector<4x8xf32>
    %89 = vector.shape_cast %88 : vector<4x8xf32> to vector<4x8x1xf32>
    %90 = vector.broadcast %89 : vector<4x8x1xf32> to vector<4x8x8xf32>
    %91 = arith.subf %87, %90 : vector<4x8x8xf32>
    %92 = math.exp %91 : vector<4x8x8xf32>
    %cst_31 = arith.constant dense<0.000000e+00> : vector<4x8xf32>
    %93 = vector.multi_reduction <add>, %92, %cst_31 [2] : vector<4x8x8xf32> to vector<4x8xf32>
    %94 = vector.shape_cast %93 : vector<4x8xf32> to vector<4x8x1xf32>
    %95 = tpu.reciprocal %94 {approx = true} : vector<4x8x1xf32> -> vector<4x8x1xf32>
    %96 = vector.broadcast %95 : vector<4x8x1xf32> to vector<4x8x8xf32>
    %97 = arith.mulf %92, %96 : vector<4x8x8xf32>
    "tpu.trace_start"() <{level = 10 : i32, message = "bqk,bkd->bqd"}> : () -> ()
    %cst_32 = arith.constant dense<0.000000e+00> : vector<4x8x8xf32>
    %98 = tpu.matmul %97, %84, %cst_32 {dimension_numbers = #tpu.dot_dimension_numbers<[2], [1], [1], [2], [0, 0, 0, 1, 1, 2], [0], [0]>} : vector<4x8x8xf32>, vector<4x8x8xf32>, vector<4x8x8xf32> -> vector<4x8x8xf32>
    "tpu.trace_stop"() : () -> ()
    %99 = vector.shape_cast %98 : vector<4x8x8xf32> to vector<32x8xf32>
    %100 = vector.extract_strided_slice %17 {offsets = [24, 0], sizes = [8, 64], strides = [1, 1]} : vector<64x64xf32> to vector<8x64xf32>
    %cst_33 = arith.constant dense<0.000000e+00> : vector<32x64xf32>
    %101 = tpu.matmul %99, %100, %cst_33 {dimension_numbers = #tpu.dot_dimension_numbers<[1], [0], [0], [1], [0, 0, 1, 1], [], []>} : vector<32x8xf32>, vector<8x64xf32>, vector<32x64xf32> -> vector<32x64xf32>
    %102 = arith.addf %81, %101 : vector<32x64xf32>
    %103 = vector.extract_strided_slice %14 {offsets = [0, 0, 32], sizes = [4, 8, 8], strides = [1, 1, 1]} : vector<4x8x192xf32> to vector<4x8x8xf32>
    %104 = vector.extract_strided_slice %14 {offsets = [0, 0, 96], sizes = [4, 8, 8], strides = [1, 1, 1]} : vector<4x8x192xf32> to vector<4x8x8xf32>
    %105 = vector.extract_strided_slice %14 {offsets = [0, 0, 160], sizes = [4, 8, 8], strides = [1, 1, 1]} : vector<4x8x192xf32> to vector<4x8x8xf32>
    "tpu.trace_start"() <{level = 10 : i32, message = "bqd,bkd->bqk"}> : () -> ()
    %cst_34 = arith.constant dense<0.000000e+00> : vector<4x8x8xf32>
    %106 = tpu.matmul %103, %104, %cst_34 {dimension_numbers = #tpu.dot_dimension_numbers<[2], [2], [1], [1], [0, 0, 0, 1, 1, 1], [0], [0]>} : vector<4x8x8xf32>, vector<4x8x8xf32>, vector<4x8x8xf32> -> vector<4x8x8xf32>
    "tpu.trace_stop"() : () -> ()
    %cst_35 = arith.constant 0.353553385 : f32
    %107 = vector.broadcast %cst_35 : f32 to vector<4x8x8xf32>
    %108 = arith.mulf %106, %107 : vector<4x8x8xf32>
    %cst_36 = arith.constant dense<0xFF800000> : vector<4x8xf32>
    %109 = vector.multi_reduction <maximumf>, %108, %cst_36 [2] : vector<4x8x8xf32> to vector<4x8xf32>
    %110 = vector.shape_cast %109 : vector<4x8xf32> to vector<4x8x1xf32>
    %111 = vector.broadcast %110 : vector<4x8x1xf32> to vector<4x8x8xf32>
    %112 = arith.subf %108, %111 : vector<4x8x8xf32>
    %113 = math.exp %112 : vector<4x8x8xf32>
    %cst_37 = arith.constant dense<0.000000e+00> : vector<4x8xf32>
    %114 = vector.multi_reduction <add>, %113, %cst_37 [2] : vector<4x8x8xf32> to vector<4x8xf32>
    %115 = vector.shape_cast %114 : vector<4x8xf32> to vector<4x8x1xf32>
    %116 = tpu.reciprocal %115 {approx = true} : vector<4x8x1xf32> -> vector<4x8x1xf32>
    %117 = vector.broadcast %116 : vector<4x8x1xf32> to vector<4x8x8xf32>
    %118 = arith.mulf %113, %117 : vector<4x8x8xf32>
    "tpu.trace_start"() <{level = 10 : i32, message = "bqk,bkd->bqd"}> : () -> ()
    %cst_38 = arith.constant dense<0.000000e+00> : vector<4x8x8xf32>
    %119 = tpu.matmul %118, %105, %cst_38 {dimension_numbers = #tpu.dot_dimension_numbers<[2], [1], [1], [2], [0, 0, 0, 1, 1, 2], [0], [0]>} : vector<4x8x8xf32>, vector<4x8x8xf32>, vector<4x8x8xf32> -> vector<4x8x8xf32>
    "tpu.trace_stop"() : () -> ()
    %120 = vector.shape_cast %119 : vector<4x8x8xf32> to vector<32x8xf32>
    %121 = vector.extract_strided_slice %17 {offsets = [32, 0], sizes = [8, 64], strides = [1, 1]} : vector<64x64xf32> to vector<8x64xf32>
    %cst_39 = arith.constant dense<0.000000e+00> : vector<32x64xf32>
    %122 = tpu.matmul %120, %121, %cst_39 {dimension_numbers = #tpu.dot_dimension_numbers<[1], [0], [0], [1], [0, 0, 1, 1], [], []>} : vector<32x8xf32>, vector<8x64xf32>, vector<32x64xf32> -> vector<32x64xf32>
    %123 = arith.addf %102, %122 : vector<32x64xf32>
    %124 = vector.extract_strided_slice %14 {offsets = [0, 0, 40], sizes = [4, 8, 8], strides = [1, 1, 1]} : vector<4x8x192xf32> to vector<4x8x8xf32>
    %125 = vector.extract_strided_slice %14 {offsets = [0, 0, 104], sizes = [4, 8, 8], strides = [1, 1, 1]} : vector<4x8x192xf32> to vector<4x8x8xf32>
    %126 = vector.extract_strided_slice %14 {offsets = [0, 0, 168], sizes = [4, 8, 8], strides = [1, 1, 1]} : vector<4x8x192xf32> to vector<4x8x8xf32>
    "tpu.trace_start"() <{level = 10 : i32, message = "bqd,bkd->bqk"}> : () -> ()
    %cst_40 = arith.constant dense<0.000000e+00> : vector<4x8x8xf32>
    %127 = tpu.matmul %124, %125, %cst_40 {dimension_numbers = #tpu.dot_dimension_numbers<[2], [2], [1], [1], [0, 0, 0, 1, 1, 1], [0], [0]>} : vector<4x8x8xf32>, vector<4x8x8xf32>, vector<4x8x8xf32> -> vector<4x8x8xf32>
    "tpu.trace_stop"() : () -> ()
    %cst_41 = arith.constant 0.353553385 : f32
    %128 = vector.broadcast %cst_41 : f32 to vector<4x8x8xf32>
    %129 = arith.mulf %127, %128 : vector<4x8x8xf32>
    %cst_42 = arith.constant dense<0xFF800000> : vector<4x8xf32>
    %130 = vector.multi_reduction <maximumf>, %129, %cst_42 [2] : vector<4x8x8xf32> to vector<4x8xf32>
    %131 = vector.shape_cast %130 : vector<4x8xf32> to vector<4x8x1xf32>
    %132 = vector.broadcast %131 : vector<4x8x1xf32> to vector<4x8x8xf32>
    %133 = arith.subf %129, %132 : vector<4x8x8xf32>
    %134 = math.exp %133 : vector<4x8x8xf32>
    %cst_43 = arith.constant dense<0.000000e+00> : vector<4x8xf32>
    %135 = vector.multi_reduction <add>, %134, %cst_43 [2] : vector<4x8x8xf32> to vector<4x8xf32>
    %136 = vector.shape_cast %135 : vector<4x8xf32> to vector<4x8x1xf32>
    %137 = tpu.reciprocal %136 {approx = true} : vector<4x8x1xf32> -> vector<4x8x1xf32>
    %138 = vector.broadcast %137 : vector<4x8x1xf32> to vector<4x8x8xf32>
    %139 = arith.mulf %134, %138 : vector<4x8x8xf32>
    "tpu.trace_start"() <{level = 10 : i32, message = "bqk,bkd->bqd"}> : () -> ()
    %cst_44 = arith.constant dense<0.000000e+00> : vector<4x8x8xf32>
    %140 = tpu.matmul %139, %126, %cst_44 {dimension_numbers = #tpu.dot_dimension_numbers<[2], [1], [1], [2], [0, 0, 0, 1, 1, 2], [0], [0]>} : vector<4x8x8xf32>, vector<4x8x8xf32>, vector<4x8x8xf32> -> vector<4x8x8xf32>
    "tpu.trace_stop"() : () -> ()
    %141 = vector.shape_cast %140 : vector<4x8x8xf32> to vector<32x8xf32>
    %142 = vector.extract_strided_slice %17 {offsets = [40, 0], sizes = [8, 64], strides = [1, 1]} : vector<64x64xf32> to vector<8x64xf32>
    %cst_45 = arith.constant dense<0.000000e+00> : vector<32x64xf32>
    %143 = tpu.matmul %141, %142, %cst_45 {dimension_numbers = #tpu.dot_dimension_numbers<[1], [0], [0], [1], [0, 0, 1, 1], [], []>} : vector<32x8xf32>, vector<8x64xf32>, vector<32x64xf32> -> vector<32x64xf32>
    %144 = arith.addf %123, %143 : vector<32x64xf32>
    %145 = vector.extract_strided_slice %14 {offsets = [0, 0, 48], sizes = [4, 8, 8], strides = [1, 1, 1]} : vector<4x8x192xf32> to vector<4x8x8xf32>
    %146 = vector.extract_strided_slice %14 {offsets = [0, 0, 112], sizes = [4, 8, 8], strides = [1, 1, 1]} : vector<4x8x192xf32> to vector<4x8x8xf32>
    %147 = vector.extract_strided_slice %14 {offsets = [0, 0, 176], sizes = [4, 8, 8], strides = [1, 1, 1]} : vector<4x8x192xf32> to vector<4x8x8xf32>
    "tpu.trace_start"() <{level = 10 : i32, message = "bqd,bkd->bqk"}> : () -> ()
    %cst_46 = arith.constant dense<0.000000e+00> : vector<4x8x8xf32>
    %148 = tpu.matmul %145, %146, %cst_46 {dimension_numbers = #tpu.dot_dimension_numbers<[2], [2], [1], [1], [0, 0, 0, 1, 1, 1], [0], [0]>} : vector<4x8x8xf32>, vector<4x8x8xf32>, vector<4x8x8xf32> -> vector<4x8x8xf32>
    "tpu.trace_stop"() : () -> ()
    %cst_47 = arith.constant 0.353553385 : f32
    %149 = vector.broadcast %cst_47 : f32 to vector<4x8x8xf32>
    %150 = arith.mulf %148, %149 : vector<4x8x8xf32>
    %cst_48 = arith.constant dense<0xFF800000> : vector<4x8xf32>
    %151 = vector.multi_reduction <maximumf>, %150, %cst_48 [2] : vector<4x8x8xf32> to vector<4x8xf32>
    %152 = vector.shape_cast %151 : vector<4x8xf32> to vector<4x8x1xf32>
    %153 = vector.broadcast %152 : vector<4x8x1xf32> to vector<4x8x8xf32>
    %154 = arith.subf %150, %153 : vector<4x8x8xf32>
    %155 = math.exp %154 : vector<4x8x8xf32>
    %cst_49 = arith.constant dense<0.000000e+00> : vector<4x8xf32>
    %156 = vector.multi_reduction <add>, %155, %cst_49 [2] : vector<4x8x8xf32> to vector<4x8xf32>
    %157 = vector.shape_cast %156 : vector<4x8xf32> to vector<4x8x1xf32>
    %158 = tpu.reciprocal %157 {approx = true} : vector<4x8x1xf32> -> vector<4x8x1xf32>
    %159 = vector.broadcast %158 : vector<4x8x1xf32> to vector<4x8x8xf32>
    %160 = arith.mulf %155, %159 : vector<4x8x8xf32>
    "tpu.trace_start"() <{level = 10 : i32, message = "bqk,bkd->bqd"}> : () -> ()
    %cst_50 = arith.constant dense<0.000000e+00> : vector<4x8x8xf32>
    %161 = tpu.matmul %160, %147, %cst_50 {dimension_numbers = #tpu.dot_dimension_numbers<[2], [1], [1], [2], [0, 0, 0, 1, 1, 2], [0], [0]>} : vector<4x8x8xf32>, vector<4x8x8xf32>, vector<4x8x8xf32> -> vector<4x8x8xf32>
    "tpu.trace_stop"() : () -> ()
    %162 = vector.shape_cast %161 : vector<4x8x8xf32> to vector<32x8xf32>
    %163 = vector.extract_strided_slice %17 {offsets = [48, 0], sizes = [8, 64], strides = [1, 1]} : vector<64x64xf32> to vector<8x64xf32>
    %cst_51 = arith.constant dense<0.000000e+00> : vector<32x64xf32>
    %164 = tpu.matmul %162, %163, %cst_51 {dimension_numbers = #tpu.dot_dimension_numbers<[1], [0], [0], [1], [0, 0, 1, 1], [], []>} : vector<32x8xf32>, vector<8x64xf32>, vector<32x64xf32> -> vector<32x64xf32>
    %165 = arith.addf %144, %164 : vector<32x64xf32>
    %166 = vector.extract_strided_slice %14 {offsets = [0, 0, 56], sizes = [4, 8, 8], strides = [1, 1, 1]} : vector<4x8x192xf32> to vector<4x8x8xf32>
    %167 = vector.extract_strided_slice %14 {offsets = [0, 0, 120], sizes = [4, 8, 8], strides = [1, 1, 1]} : vector<4x8x192xf32> to vector<4x8x8xf32>
    %168 = vector.extract_strided_slice %14 {offsets = [0, 0, 184], sizes = [4, 8, 8], strides = [1, 1, 1]} : vector<4x8x192xf32> to vector<4x8x8xf32>
    "tpu.trace_start"() <{level = 10 : i32, message = "bqd,bkd->bqk"}> : () -> ()
    %cst_52 = arith.constant dense<0.000000e+00> : vector<4x8x8xf32>
    %169 = tpu.matmul %166, %167, %cst_52 {dimension_numbers = #tpu.dot_dimension_numbers<[2], [2], [1], [1], [0, 0, 0, 1, 1, 1], [0], [0]>} : vector<4x8x8xf32>, vector<4x8x8xf32>, vector<4x8x8xf32> -> vector<4x8x8xf32>
    "tpu.trace_stop"() : () -> ()
    %cst_53 = arith.constant 0.353553385 : f32
    %170 = vector.broadcast %cst_53 : f32 to vector<4x8x8xf32>
    %171 = arith.mulf %169, %170 : vector<4x8x8xf32>
    %cst_54 = arith.constant dense<0xFF800000> : vector<4x8xf32>
    %172 = vector.multi_reduction <maximumf>, %171, %cst_54 [2] : vector<4x8x8xf32> to vector<4x8xf32>
    %173 = vector.shape_cast %172 : vector<4x8xf32> to vector<4x8x1xf32>
    %174 = vector.broadcast %173 : vector<4x8x1xf32> to vector<4x8x8xf32>
    %175 = arith.subf %171, %174 : vector<4x8x8xf32>
    %176 = math.exp %175 : vector<4x8x8xf32>
    %cst_55 = arith.constant dense<0.000000e+00> : vector<4x8xf32>
    %177 = vector.multi_reduction <add>, %176, %cst_55 [2] : vector<4x8x8xf32> to vector<4x8xf32>
    %178 = vector.shape_cast %177 : vector<4x8xf32> to vector<4x8x1xf32>
    %179 = tpu.reciprocal %178 {approx = true} : vector<4x8x1xf32> -> vector<4x8x1xf32>
    %180 = vector.broadcast %179 : vector<4x8x1xf32> to vector<4x8x8xf32>
    %181 = arith.mulf %176, %180 : vector<4x8x8xf32>
    "tpu.trace_start"() <{level = 10 : i32, message = "bqk,bkd->bqd"}> : () -> ()
    %cst_56 = arith.constant dense<0.000000e+00> : vector<4x8x8xf32>
    %182 = tpu.matmul %181, %168, %cst_56 {dimension_numbers = #tpu.dot_dimension_numbers<[2], [1], [1], [2], [0, 0, 0, 1, 1, 2], [0], [0]>} : vector<4x8x8xf32>, vector<4x8x8xf32>, vector<4x8x8xf32> -> vector<4x8x8xf32>
    "tpu.trace_stop"() : () -> ()
    %183 = vector.shape_cast %182 : vector<4x8x8xf32> to vector<32x8xf32>
    %184 = vector.extract_strided_slice %17 {offsets = [56, 0], sizes = [8, 64], strides = [1, 1]} : vector<64x64xf32> to vector<8x64xf32>
    %cst_57 = arith.constant dense<0.000000e+00> : vector<32x64xf32>
    %185 = tpu.matmul %183, %184, %cst_57 {dimension_numbers = #tpu.dot_dimension_numbers<[1], [0], [0], [1], [0, 0, 1, 1], [], []>} : vector<32x8xf32>, vector<8x64xf32>, vector<32x64xf32> -> vector<32x64xf32>
    %186 = arith.addf %165, %185 : vector<32x64xf32>
    %187 = arith.index_cast %arg1 : i32 to index
    %c0_58 = arith.constant 0 : index
    %c0_59 = arith.constant 0 : index
    %188 = vector.load %arg6[%187, %c0_58, %c0_59] : memref<6x1x64xf32, #tpu.memory_space<vmem>>, vector<1x1x64xf32>
    %189 = vector.shape_cast %188 : vector<1x1x64xf32> to vector<1x64xf32>
    %190 = vector.broadcast %189 : vector<1x64xf32> to vector<32x64xf32>
    %191 = arith.addf %186, %190 : vector<32x64xf32>
    %192 = arith.addf %4, %191 : vector<32x64xf32>
    %193 = arith.index_cast %arg1 : i32 to index
    %c0_60 = arith.constant 0 : index
    %c0_61 = arith.constant 0 : index
    %194 = vector.load %arg7[%193, %c0_60, %c0_61] : memref<6x1x64xf32, #tpu.memory_space<vmem>>, vector<1x1x64xf32>
    %195 = vector.shape_cast %194 : vector<1x1x64xf32> to vector<1x64xf32>
    %196 = arith.index_cast %arg1 : i32 to index
    %c0_62 = arith.constant 0 : index
    %c0_63 = arith.constant 0 : index
    %197 = vector.load %arg8[%196, %c0_62, %c0_63] : memref<6x1x64xf32, #tpu.memory_space<vmem>>, vector<1x1x64xf32>
    %198 = vector.shape_cast %197 : vector<1x1x64xf32> to vector<1x64xf32>
    %cst_64 = arith.constant dense<0.000000e+00> : vector<32xf32>
    %199 = vector.multi_reduction <add>, %192, %cst_64 [1] : vector<32x64xf32> to vector<32xf32>
    %200 = vector.shape_cast %199 : vector<32xf32> to vector<32x1xf32>
    %cst_65 = arith.constant 6.400000e+01 : f32
    %201 = vector.broadcast %cst_65 : f32 to vector<32x1xf32>
    %202 = arith.divf %200, %201 : vector<32x1xf32>
    %203 = vector.broadcast %202 : vector<32x1xf32> to vector<32x64xf32>
    %204 = arith.subf %192, %203 : vector<32x64xf32>
    %205 = arith.mulf %204, %204 : vector<32x64xf32>
    %cst_66 = arith.constant dense<0.000000e+00> : vector<32xf32>
    %206 = vector.multi_reduction <add>, %205, %cst_66 [1] : vector<32x64xf32> to vector<32xf32>
    %207 = vector.shape_cast %206 : vector<32xf32> to vector<32x1xf32>
    %cst_67 = arith.constant 6.400000e+01 : f32
    %208 = vector.broadcast %cst_67 : f32 to vector<32x1xf32>
    %209 = arith.divf %207, %208 : vector<32x1xf32>
    %210 = vector.broadcast %202 : vector<32x1xf32> to vector<32x64xf32>
    %211 = arith.subf %192, %210 : vector<32x64xf32>
    %cst_68 = arith.constant 9.99999974E-6 : f32
    %212 = vector.broadcast %cst_68 : f32 to vector<32x1xf32>
    %213 = arith.addf %209, %212 : vector<32x1xf32>
    %214 = math.rsqrt %213 : vector<32x1xf32>
    %215 = vector.broadcast %214 : vector<32x1xf32> to vector<32x64xf32>
    %216 = arith.mulf %211, %215 : vector<32x64xf32>
    %217 = vector.broadcast %195 : vector<1x64xf32> to vector<32x64xf32>
    %218 = arith.mulf %216, %217 : vector<32x64xf32>
    %219 = vector.broadcast %198 : vector<1x64xf32> to vector<32x64xf32>
    %220 = arith.addf %218, %219 : vector<32x64xf32>
    %221 = arith.index_cast %arg1 : i32 to index
    %c0_69 = arith.constant 0 : index
    %c0_70 = arith.constant 0 : index
    %222 = vector.load %arg9[%221, %c0_69, %c0_70] : memref<6x64x256xf32, #tpu.memory_space<vmem>>, vector<1x64x256xf32>
    %223 = vector.shape_cast %222 : vector<1x64x256xf32> to vector<64x256xf32>
    %cst_71 = arith.constant dense<0.000000e+00> : vector<32x256xf32>
    %224 = tpu.matmul %220, %223, %cst_71 {dimension_numbers = #tpu.dot_dimension_numbers<[1], [0], [0], [1], [0, 0, 1, 1], [], []>} : vector<32x64xf32>, vector<64x256xf32>, vector<32x256xf32> -> vector<32x256xf32>
    %225 = arith.index_cast %arg1 : i32 to index
    %c0_72 = arith.constant 0 : index
    %c0_73 = arith.constant 0 : index
    %226 = vector.load %arg10[%225, %c0_72, %c0_73] : memref<6x1x256xf32, #tpu.memory_space<vmem>>, vector<1x1x256xf32>
    %227 = vector.shape_cast %226 : vector<1x1x256xf32> to vector<1x256xf32>
    %228 = vector.broadcast %227 : vector<1x256xf32> to vector<32x256xf32>
    %229 = arith.addf %224, %228 : vector<32x256xf32>
    %cst_74 = arith.constant 0.000000e+00 : f32
    %230 = vector.broadcast %cst_74 : f32 to vector<32x256xf32>
    %231 = arith.maximumf %229, %230 : vector<32x256xf32>
    %232 = arith.index_cast %arg1 : i32 to index
    %c0_75 = arith.constant 0 : index
    %c0_76 = arith.constant 0 : index
    %233 = vector.load %arg11[%232, %c0_75, %c0_76] : memref<6x256x64xf32, #tpu.memory_space<vmem>>, vector<1x256x64xf32>
    %234 = vector.shape_cast %233 : vector<1x256x64xf32> to vector<256x64xf32>
    %cst_77 = arith.constant dense<0.000000e+00> : vector<32x64xf32>
    %235 = tpu.matmul %231, %234, %cst_77 {dimension_numbers = #tpu.dot_dimension_numbers<[1], [0], [0], [1], [0, 0, 1, 1], [], []>} : vector<32x256xf32>, vector<256x64xf32>, vector<32x64xf32> -> vector<32x64xf32>
    %236 = arith.index_cast %arg1 : i32 to index
    %c0_78 = arith.constant 0 : index
    %c0_79 = arith.constant 0 : index
    %237 = vector.load %arg12[%236, %c0_78, %c0_79] : memref<6x1x64xf32, #tpu.memory_space<vmem>>, vector<1x1x64xf32>
    %238 = vector.shape_cast %237 : vector<1x1x64xf32> to vector<1x64xf32>
    %239 = vector.broadcast %238 : vector<1x64xf32> to vector<32x64xf32>
    %240 = arith.addf %235, %239 : vector<32x64xf32>
    %241 = arith.addf %220, %240 : vector<32x64xf32>
    %242 = arith.index_cast %arg1 : i32 to index
    %c0_80 = arith.constant 0 : index
    %c0_81 = arith.constant 0 : index
    %243 = vector.load %arg13[%242, %c0_80, %c0_81] : memref<6x1x64xf32, #tpu.memory_space<vmem>>, vector<1x1x64xf32>
    %244 = vector.shape_cast %243 : vector<1x1x64xf32> to vector<1x64xf32>
    %245 = arith.index_cast %arg1 : i32 to index
    %c0_82 = arith.constant 0 : index
    %c0_83 = arith.constant 0 : index
    %246 = vector.load %arg14[%245, %c0_82, %c0_83] : memref<6x1x64xf32, #tpu.memory_space<vmem>>, vector<1x1x64xf32>
    %247 = vector.shape_cast %246 : vector<1x1x64xf32> to vector<1x64xf32>
    %cst_84 = arith.constant dense<0.000000e+00> : vector<32xf32>
    %248 = vector.multi_reduction <add>, %241, %cst_84 [1] : vector<32x64xf32> to vector<32xf32>
    %249 = vector.shape_cast %248 : vector<32xf32> to vector<32x1xf32>
    %cst_85 = arith.constant 6.400000e+01 : f32
    %250 = vector.broadcast %cst_85 : f32 to vector<32x1xf32>
    %251 = arith.divf %249, %250 : vector<32x1xf32>
    %252 = vector.broadcast %251 : vector<32x1xf32> to vector<32x64xf32>
    %253 = arith.subf %241, %252 : vector<32x64xf32>
    %254 = arith.mulf %253, %253 : vector<32x64xf32>
    %cst_86 = arith.constant dense<0.000000e+00> : vector<32xf32>
    %255 = vector.multi_reduction <add>, %254, %cst_86 [1] : vector<32x64xf32> to vector<32xf32>
    %256 = vector.shape_cast %255 : vector<32xf32> to vector<32x1xf32>
    %cst_87 = arith.constant 6.400000e+01 : f32
    %257 = vector.broadcast %cst_87 : f32 to vector<32x1xf32>
    %258 = arith.divf %256, %257 : vector<32x1xf32>
    %259 = vector.broadcast %251 : vector<32x1xf32> to vector<32x64xf32>
    %260 = arith.subf %241, %259 : vector<32x64xf32>
    %cst_88 = arith.constant 9.99999974E-6 : f32
    %261 = vector.broadcast %cst_88 : f32 to vector<32x1xf32>
    %262 = arith.addf %258, %261 : vector<32x1xf32>
    %263 = math.rsqrt %262 : vector<32x1xf32>
    %264 = vector.broadcast %263 : vector<32x1xf32> to vector<32x64xf32>
    %265 = arith.mulf %260, %264 : vector<32x64xf32>
    %266 = vector.broadcast %244 : vector<1x64xf32> to vector<32x64xf32>
    %267 = arith.mulf %265, %266 : vector<32x64xf32>
    %268 = vector.broadcast %247 : vector<1x64xf32> to vector<32x64xf32>
    %269 = arith.addf %267, %268 : vector<32x64xf32>
    %270 = vector.shape_cast %269 : vector<32x64xf32> to vector<4x8x64xf32>
    %c0_89 = arith.constant 0 : index
    %c0_90 = arith.constant 0 : index
    %c0_91 = arith.constant 0 : index
    %271 = vector.load %arg16[%c0_89, %c0_90, %c0_91] : memref<4x8x64xf32, #tpu.memory_space<vmem>>, vector<4x8x64xf32>
    tpu.vector_store %arg16[%c0_89, %c0_90, %c0_91], %270 {strides = array<i32>} : memref<4x8x64xf32, #tpu.memory_space<vmem>>, vector<4x8x64xf32>,
    %c5_i32 = arith.constant 5 : i32
    %272 = arith.cmpi eq, %arg1, %c5_i32 : i32
    %273 = arith.extui %272 : i1 to i32
    %c0_i32_92 = arith.constant 0 : i32
    %274 = arith.cmpi ne, %273, %c0_i32_92 : i32
    scf.if %274 {
      %c0_93 = arith.constant 0 : index
      %c0_94 = arith.constant 0 : index
      %c0_95 = arith.constant 0 : index
      %275 = vector.load %arg15[%c0_93, %c0_94, %c0_95] : memref<4x8x64xf32, #tpu.memory_space<vmem>>, vector<4x8x64xf32>
      tpu.vector_store %arg15[%c0_93, %c0_94, %c0_95], %270 {strides = array<i32>} : memref<4x8x64xf32, #tpu.memory_space<vmem>>, vector<4x8x64xf32>,
    } else {
    }
    return
  }
  func.func @transform_0(%arg0: i32, %arg1: i32) -> (i32, i32, i32) {
    %c0_i32 = arith.constant 0 : i32
    %c0_i32_0 = arith.constant 0 : i32
    %c0_i32_1 = arith.constant 0 : i32
    return %arg0, %c0_i32, %c0_i32_0 : i32, i32, i32
  }
  func.func @transform_1(%arg0: i32, %arg1: i32) -> (i32, i32, i32) {
    %c0_i32 = arith.constant 0 : i32
    %c0_i32_0 = arith.constant 0 : i32
    %c0_i32_1 = arith.constant 0 : i32
    %c0_i32_2 = arith.constant 0 : i32
    return %c0_i32, %c0_i32_0, %c0_i32_1 : i32, i32, i32
  }
  func.func @transform_2(%arg0: i32, %arg1: i32) -> (i32, i32, i32) {
    %c0_i32 = arith.constant 0 : i32
    %c0_i32_0 = arith.constant 0 : i32
    %c0_i32_1 = arith.constant 0 : i32
    %c0_i32_2 = arith.constant 0 : i32
    return %c0_i32, %c0_i32_0, %c0_i32_1 : i32, i32, i32
  }
  func.func @transform_3(%arg0: i32, %arg1: i32) -> (i32, i32, i32) {
    %c0_i32 = arith.constant 0 : i32
    %c0_i32_0 = arith.constant 0 : i32
    %c0_i32_1 = arith.constant 0 : i32
    %c0_i32_2 = arith.constant 0 : i32
    return %c0_i32, %c0_i32_0, %c0_i32_1 : i32, i32, i32
  }
  func.func @transform_4(%arg0: i32, %arg1: i32) -> (i32, i32, i32) {
    %c0_i32 = arith.constant 0 : i32
    %c0_i32_0 = arith.constant 0 : i32
    %c0_i32_1 = arith.constant 0 : i32
    %c0_i32_2 = arith.constant 0 : i32
    return %c0_i32, %c0_i32_0, %c0_i32_1 : i32, i32, i32
  }
  func.func @transform_5(%arg0: i32, %arg1: i32) -> (i32, i32, i32) {
    %c0_i32 = arith.constant 0 : i32
    %c0_i32_0 = arith.constant 0 : i32
    %c0_i32_1 = arith.constant 0 : i32
    %c0_i32_2 = arith.constant 0 : i32
    return %c0_i32, %c0_i32_0, %c0_i32_1 : i32, i32, i32
  }
  func.func @transform_6(%arg0: i32, %arg1: i32) -> (i32, i32, i32) {
    %c0_i32 = arith.constant 0 : i32
    %c0_i32_0 = arith.constant 0 : i32
    %c0_i32_1 = arith.constant 0 : i32
    %c0_i32_2 = arith.constant 0 : i32
    return %c0_i32, %c0_i32_0, %c0_i32_1 : i32, i32, i32
  }
  func.func @transform_7(%arg0: i32, %arg1: i32) -> (i32, i32, i32) {
    %c0_i32 = arith.constant 0 : i32
    %c0_i32_0 = arith.constant 0 : i32
    %c0_i32_1 = arith.constant 0 : i32
    %c0_i32_2 = arith.constant 0 : i32
    return %c0_i32, %c0_i32_0, %c0_i32_1 : i32, i32, i32
  }
  func.func @transform_8(%arg0: i32, %arg1: i32) -> (i32, i32, i32) {
    %c0_i32 = arith.constant 0 : i32
    %c0_i32_0 = arith.constant 0 : i32
    %c0_i32_1 = arith.constant 0 : i32
    %c0_i32_2 = arith.constant 0 : i32
    return %c0_i32, %c0_i32_0, %c0_i32_1 : i32, i32, i32
  }
  func.func @transform_9(%arg0: i32, %arg1: i32) -> (i32, i32, i32) {
    %c0_i32 = arith.constant 0 : i32
    %c0_i32_0 = arith.constant 0 : i32
    %c0_i32_1 = arith.constant 0 : i32
    %c0_i32_2 = arith.constant 0 : i32
    return %c0_i32, %c0_i32_0, %c0_i32_1 : i32, i32, i32
  }
  func.func @transform_10(%arg0: i32, %arg1: i32) -> (i32, i32, i32) {
    %c0_i32 = arith.constant 0 : i32
    %c0_i32_0 = arith.constant 0 : i32
    %c0_i32_1 = arith.constant 0 : i32
    %c0_i32_2 = arith.constant 0 : i32
    return %c0_i32, %c0_i32_0, %c0_i32_1 : i32, i32, i32
  }
  func.func @transform_11(%arg0: i32, %arg1: i32) -> (i32, i32, i32) {
    %c0_i32 = arith.constant 0 : i32
    %c0_i32_0 = arith.constant 0 : i32
    %c0_i32_1 = arith.constant 0 : i32
    %c0_i32_2 = arith.constant 0 : i32
    return %c0_i32, %c0_i32_0, %c0_i32_1 : i32, i32, i32
  }
  func.func @transform_12(%arg0: i32, %arg1: i32) -> (i32, i32, i32) {
    %c0_i32 = arith.constant 0 : i32
    %c0_i32_0 = arith.constant 0 : i32
    %c0_i32_1 = arith.constant 0 : i32
    %c0_i32_2 = arith.constant 0 : i32
    return %c0_i32, %c0_i32_0, %c0_i32_1 : i32, i32, i32
  }
  func.func @transform_13(%arg0: i32, %arg1: i32) -> (i32, i32, i32) {
    %c0_i32 = arith.constant 0 : i32
    %c0_i32_0 = arith.constant 0 : i32
    %c0_i32_1 = arith.constant 0 : i32
    return %arg0, %c0_i32, %c0_i32_0 : i32, i32, i32
  }
}

module attributes {stable_mosaic.version = 11 : i64} {
  func.func @_joint_attn_ff_kernel(%arg0: i32, %arg1: memref<4x8x64xf32, #tpu.memory_space<vmem>>, %arg2: memref<64x128xf32, #tpu.memory_space<vmem>>, %arg3: memref<1x128xf32, #tpu.memory_space<vmem>>, %arg4: memref<64x13xf32, #tpu.memory_space<vmem>>, %arg5: memref<64x128xf32, #tpu.memory_space<vmem>>, %arg6: memref<1x128xf32, #tpu.memory_space<vmem>>, %arg7: memref<1x128xf32, #tpu.memory_space<vmem>>, %arg8: memref<1x128xf32, #tpu.memory_space<vmem>>, %arg9: memref<128x64xf32, #tpu.memory_space<vmem>>, %arg10: memref<1x64xf32, #tpu.memory_space<vmem>>, %arg11: memref<4x13x64xf32, #tpu.memory_space<vmem>>) attributes {dimension_semantics = [#tpu.dimension_semantics<parallel>], iteration_bounds = array<i64: 2>, scalar_prefetch = 0 : i64, scratch_operands = 0 : i64, tpu.core_type = #tpu.core_type<tc>, window_params = [{transform_indices = @transform_0, window_bounds = array<i64: 4, 8, 64>}, {pipeline_mode = #tpu.pipeline_mode<synchronous>, transform_indices = @transform_1, window_bounds = array<i64: 64, 128>}, {pipeline_mode = #tpu.pipeline_mode<synchronous>, transform_indices = @transform_2, window_bounds = array<i64: 1, 128>}, {pipeline_mode = #tpu.pipeline_mode<synchronous>, transform_indices = @transform_3, window_bounds = array<i64: 64, 13>}, {pipeline_mode = #tpu.pipeline_mode<synchronous>, transform_indices = @transform_4, window_bounds = array<i64: 64, 128>}, {pipeline_mode = #tpu.pipeline_mode<synchronous>, transform_indices = @transform_5, window_bounds = array<i64: 1, 128>}, {pipeline_mode = #tpu.pipeline_mode<synchronous>, transform_indices = @transform_6, window_bounds = array<i64: 1, 128>}, {pipeline_mode = #tpu.pipeline_mode<synchronous>, transform_indices = @transform_7, window_bounds = array<i64: 1, 128>}, {pipeline_mode = #tpu.pipeline_mode<synchronous>, transform_indices = @transform_8, window_bounds = array<i64: 128, 64>}, {pipeline_mode = #tpu.pipeline_mode<synchronous>, transform_indices = @transform_9, window_bounds = array<i64: 1, 64>}, {transform_indices = @transform_10, window_bounds = array<i64: 4, 13, 64>}]} {
    %c0 = arith.constant 0 : index
    %c0_0 = arith.constant 0 : index
    %c0_1 = arith.constant 0 : index
    %0 = vector.load %arg1[%c0, %c0_0, %c0_1] : memref<4x8x64xf32, #tpu.memory_space<vmem>>, vector<4x8x64xf32>
    %1 = vector.shape_cast %0 : vector<4x8x64xf32> to vector<32x64xf32>
    %c0_2 = arith.constant 0 : index
    %c0_3 = arith.constant 0 : index
    %2 = vector.load %arg2[%c0_2, %c0_3] : memref<64x128xf32, #tpu.memory_space<vmem>>, vector<64x128xf32>
    %cst = arith.constant dense<0.000000e+00> : vector<32x128xf32>
    %3 = tpu.matmul %1, %2, %cst {dimension_numbers = #tpu.dot_dimension_numbers<[1], [0], [0], [1], [0, 0, 1, 1], [], []>} : vector<32x64xf32>, vector<64x128xf32>, vector<32x128xf32> -> vector<32x128xf32>
    %c0_4 = arith.constant 0 : index
    %c0_5 = arith.constant 0 : index
    %4 = vector.load %arg3[%c0_4, %c0_5] : memref<1x128xf32, #tpu.memory_space<vmem>>, vector<1x128xf32>
    %5 = vector.broadcast %4 : vector<1x128xf32> to vector<32x128xf32>
    %6 = arith.addf %3, %5 : vector<32x128xf32>
    %7 = vector.extract_strided_slice %6 {offsets = [0, 0], sizes = [32, 64], strides = [1, 1]} : vector<32x128xf32> to vector<32x64xf32>
    %c0_6 = arith.constant 0 : index
    %c0_7 = arith.constant 0 : index
    %8 = vector.load %arg4[%c0_6, %c0_7] : memref<64x13xf32, #tpu.memory_space<vmem>>, vector<64x13xf32>
    %cst_8 = arith.constant dense<0.000000e+00> : vector<32x13xf32>
    %9 = tpu.matmul %7, %8, %cst_8 {dimension_numbers = #tpu.dot_dimension_numbers<[1], [0], [0], [1], [0, 0, 1, 1], [], []>} : vector<32x64xf32>, vector<64x13xf32>, vector<32x13xf32> -> vector<32x13xf32>
    %10 = vector.shape_cast %9 : vector<32x13xf32> to vector<4x8x13xf32>
    %11 = vector.extract_strided_slice %6 {offsets = [0, 64], sizes = [32, 64], strides = [1, 1]} : vector<32x128xf32> to vector<32x64xf32>
    %12 = vector.shape_cast %11 : vector<32x64xf32> to vector<4x8x64xf32>
    %cst_9 = arith.constant dense<0xFF800000> : vector<4x13xf32>
    %13 = vector.multi_reduction <maximumf>, %10, %cst_9 [1] : vector<4x8x13xf32> to vector<4x13xf32>
    %14 = vector.shape_cast %13 : vector<4x13xf32> to vector<4x1x13xf32>
    %15 = vector.broadcast %14 : vector<4x1x13xf32> to vector<4x8x13xf32>
    %16 = arith.subf %10, %15 : vector<4x8x13xf32>
    %17 = math.exp %16 : vector<4x8x13xf32>
    %cst_10 = arith.constant dense<0.000000e+00> : vector<4x13xf32>
    %18 = vector.multi_reduction <add>, %17, %cst_10 [1] : vector<4x8x13xf32> to vector<4x13xf32>
    %19 = vector.shape_cast %18 : vector<4x13xf32> to vector<4x1x13xf32>
    %20 = tpu.reciprocal %19 {approx = true} : vector<4x1x13xf32> -> vector<4x1x13xf32>
    %21 = vector.broadcast %20 : vector<4x1x13xf32> to vector<4x8x13xf32>
    %22 = arith.mulf %17, %21 : vector<4x8x13xf32>
    %23 = tpu.transpose %22, [0, 2, 1] : vector<4x8x13xf32> -> vector<4x13x8xf32>
    "tpu.trace_start"() <{level = 10 : i32, message = "bjn,bnd->bjd"}> : () -> ()
    %cst_11 = arith.constant dense<0.000000e+00> : vector<4x13x64xf32>
    %24 = tpu.matmul %23, %12, %cst_11 {dimension_numbers = #tpu.dot_dimension_numbers<[2], [1], [1], [2], [0, 0, 0, 1, 1, 2], [0], [0]>} : vector<4x13x8xf32>, vector<4x8x64xf32>, vector<4x13x64xf32> -> vector<4x13x64xf32>
    "tpu.trace_stop"() : () -> ()
    %25 = vector.shape_cast %24 : vector<4x13x64xf32> to vector<52x64xf32>
    %c0_12 = arith.constant 0 : index
    %c0_13 = arith.constant 0 : index
    %26 = vector.load %arg5[%c0_12, %c0_13] : memref<64x128xf32, #tpu.memory_space<vmem>>, vector<64x128xf32>
    %cst_14 = arith.constant dense<0.000000e+00> : vector<52x128xf32>
    %27 = tpu.matmul %25, %26, %cst_14 {dimension_numbers = #tpu.dot_dimension_numbers<[1], [0], [0], [1], [0, 0, 1, 1], [], []>} : vector<52x64xf32>, vector<64x128xf32>, vector<52x128xf32> -> vector<52x128xf32>
    %c0_15 = arith.constant 0 : index
    %c0_16 = arith.constant 0 : index
    %28 = vector.load %arg6[%c0_15, %c0_16] : memref<1x128xf32, #tpu.memory_space<vmem>>, vector<1x128xf32>
    %29 = vector.broadcast %28 : vector<1x128xf32> to vector<52x128xf32>
    %30 = arith.addf %27, %29 : vector<52x128xf32>
    %c0_17 = arith.constant 0 : index
    %c0_18 = arith.constant 0 : index
    %31 = vector.load %arg7[%c0_17, %c0_18] : memref<1x128xf32, #tpu.memory_space<vmem>>, vector<1x128xf32>
    %c0_19 = arith.constant 0 : index
    %c0_20 = arith.constant 0 : index
    %32 = vector.load %arg8[%c0_19, %c0_20] : memref<1x128xf32, #tpu.memory_space<vmem>>, vector<1x128xf32>
    %cst_21 = arith.constant dense<0.000000e+00> : vector<52xf32>
    %33 = vector.multi_reduction <add>, %30, %cst_21 [1] : vector<52x128xf32> to vector<52xf32>
    %34 = vector.shape_cast %33 : vector<52xf32> to vector<52x1xf32>
    %cst_22 = arith.constant 1.280000e+02 : f32
    %35 = vector.broadcast %cst_22 : f32 to vector<52x1xf32>
    %36 = arith.divf %34, %35 : vector<52x1xf32>
    %37 = vector.broadcast %36 : vector<52x1xf32> to vector<52x128xf32>
    %38 = arith.subf %30, %37 : vector<52x128xf32>
    %39 = arith.mulf %38, %38 : vector<52x128xf32>
    %cst_23 = arith.constant dense<0.000000e+00> : vector<52xf32>
    %40 = vector.multi_reduction <add>, %39, %cst_23 [1] : vector<52x128xf32> to vector<52xf32>
    %41 = vector.shape_cast %40 : vector<52xf32> to vector<52x1xf32>
    %cst_24 = arith.constant 1.280000e+02 : f32
    %42 = vector.broadcast %cst_24 : f32 to vector<52x1xf32>
    %43 = arith.divf %41, %42 : vector<52x1xf32>
    %44 = vector.broadcast %36 : vector<52x1xf32> to vector<52x128xf32>
    %45 = arith.subf %30, %44 : vector<52x128xf32>
    %cst_25 = arith.constant 9.99999974E-6 : f32
    %46 = vector.broadcast %cst_25 : f32 to vector<52x1xf32>
    %47 = arith.addf %43, %46 : vector<52x1xf32>
    %48 = math.rsqrt %47 : vector<52x1xf32>
    %49 = vector.broadcast %48 : vector<52x1xf32> to vector<52x128xf32>
    %50 = arith.mulf %45, %49 : vector<52x128xf32>
    %51 = vector.broadcast %31 : vector<1x128xf32> to vector<52x128xf32>
    %52 = arith.mulf %50, %51 : vector<52x128xf32>
    %53 = vector.broadcast %32 : vector<1x128xf32> to vector<52x128xf32>
    %54 = arith.addf %52, %53 : vector<52x128xf32>
    %cst_26 = arith.constant 0.000000e+00 : f32
    %55 = vector.broadcast %cst_26 : f32 to vector<52x128xf32>
    %56 = arith.maximumf %54, %55 : vector<52x128xf32>
    %c0_27 = arith.constant 0 : index
    %c0_28 = arith.constant 0 : index
    %57 = vector.load %arg9[%c0_27, %c0_28] : memref<128x64xf32, #tpu.memory_space<vmem>>, vector<128x64xf32>
    %cst_29 = arith.constant dense<0.000000e+00> : vector<52x64xf32>
    %58 = tpu.matmul %56, %57, %cst_29 {dimension_numbers = #tpu.dot_dimension_numbers<[1], [0], [0], [1], [0, 0, 1, 1], [], []>} : vector<52x128xf32>, vector<128x64xf32>, vector<52x64xf32> -> vector<52x64xf32>
    %c0_30 = arith.constant 0 : index
    %c0_31 = arith.constant 0 : index
    %59 = vector.load %arg10[%c0_30, %c0_31] : memref<1x64xf32, #tpu.memory_space<vmem>>, vector<1x64xf32>
    %60 = vector.broadcast %59 : vector<1x64xf32> to vector<52x64xf32>
    %61 = arith.addf %58, %60 : vector<52x64xf32>
    %62 = vector.shape_cast %61 : vector<52x64xf32> to vector<4x13x64xf32>
    %c0_32 = arith.constant 0 : index
    %c0_33 = arith.constant 0 : index
    %c0_34 = arith.constant 0 : index
    %63 = vector.load %arg11[%c0_32, %c0_33, %c0_34] : memref<4x13x64xf32, #tpu.memory_space<vmem>>, vector<4x13x64xf32>
    tpu.vector_store %arg11[%c0_32, %c0_33, %c0_34], %62 {strides = array<i32>} : memref<4x13x64xf32, #tpu.memory_space<vmem>>, vector<4x13x64xf32>,
    return
  }
  func.func @transform_0(%arg0: i32) -> (i32, i32, i32) {
    %c0_i32 = arith.constant 0 : i32
    %c0_i32_0 = arith.constant 0 : i32
    %c0_i32_1 = arith.constant 0 : i32
    return %arg0, %c0_i32, %c0_i32_0 : i32, i32, i32
  }
  func.func @transform_1(%arg0: i32) -> (i32, i32) {
    %c0_i32 = arith.constant 0 : i32
    %c0_i32_0 = arith.constant 0 : i32
    %c0_i32_1 = arith.constant 0 : i32
    return %c0_i32, %c0_i32_0 : i32, i32
  }
  func.func @transform_2(%arg0: i32) -> (i32, i32) {
    %c0_i32 = arith.constant 0 : i32
    %c0_i32_0 = arith.constant 0 : i32
    %c0_i32_1 = arith.constant 0 : i32
    return %c0_i32, %c0_i32_0 : i32, i32
  }
  func.func @transform_3(%arg0: i32) -> (i32, i32) {
    %c0_i32 = arith.constant 0 : i32
    %c0_i32_0 = arith.constant 0 : i32
    %c0_i32_1 = arith.constant 0 : i32
    return %c0_i32, %c0_i32_0 : i32, i32
  }
  func.func @transform_4(%arg0: i32) -> (i32, i32) {
    %c0_i32 = arith.constant 0 : i32
    %c0_i32_0 = arith.constant 0 : i32
    %c0_i32_1 = arith.constant 0 : i32
    return %c0_i32, %c0_i32_0 : i32, i32
  }
  func.func @transform_5(%arg0: i32) -> (i32, i32) {
    %c0_i32 = arith.constant 0 : i32
    %c0_i32_0 = arith.constant 0 : i32
    %c0_i32_1 = arith.constant 0 : i32
    return %c0_i32, %c0_i32_0 : i32, i32
  }
  func.func @transform_6(%arg0: i32) -> (i32, i32) {
    %c0_i32 = arith.constant 0 : i32
    %c0_i32_0 = arith.constant 0 : i32
    %c0_i32_1 = arith.constant 0 : i32
    return %c0_i32, %c0_i32_0 : i32, i32
  }
  func.func @transform_7(%arg0: i32) -> (i32, i32) {
    %c0_i32 = arith.constant 0 : i32
    %c0_i32_0 = arith.constant 0 : i32
    %c0_i32_1 = arith.constant 0 : i32
    return %c0_i32, %c0_i32_0 : i32, i32
  }
  func.func @transform_8(%arg0: i32) -> (i32, i32) {
    %c0_i32 = arith.constant 0 : i32
    %c0_i32_0 = arith.constant 0 : i32
    %c0_i32_1 = arith.constant 0 : i32
    return %c0_i32, %c0_i32_0 : i32, i32
  }
  func.func @transform_9(%arg0: i32) -> (i32, i32) {
    %c0_i32 = arith.constant 0 : i32
    %c0_i32_0 = arith.constant 0 : i32
    %c0_i32_1 = arith.constant 0 : i32
    return %c0_i32, %c0_i32_0 : i32, i32
  }
  func.func @transform_10(%arg0: i32) -> (i32, i32, i32) {
    %c0_i32 = arith.constant 0 : i32
    %c0_i32_0 = arith.constant 0 : i32
    %c0_i32_1 = arith.constant 0 : i32
    return %arg0, %c0_i32, %c0_i32_0 : i32, i32, i32
  }
}

module attributes {stable_mosaic.version = 11 : i64} {
  func.func @_bn_mlp_kernel(%arg0: i32, %arg1: memref<26x64xf32, #tpu.memory_space<vmem>>, %arg2: memref<26x64xf32, #tpu.memory_space<vmem>>, %arg3: memref<26x64xf32, #tpu.memory_space<vmem>>, %arg4: memref<64x32xf32, #tpu.memory_space<vmem>>, %arg5: memref<1x32xf32, #tpu.memory_space<vmem>>, %arg6: memref<1x32xf32, #tpu.memory_space<vmem>>, %arg7: memref<1x32xf32, #tpu.memory_space<vmem>>, %arg8: memref<32x3xf32, #tpu.memory_space<vmem>>, %arg9: memref<1x3xf32, #tpu.memory_space<vmem>>, %arg10: memref<26x3xf32, #tpu.memory_space<vmem>>) attributes {dimension_semantics = [#tpu.dimension_semantics<parallel>], iteration_bounds = array<i64: 1>, scalar_prefetch = 0 : i64, scratch_operands = 0 : i64, tpu.core_type = #tpu.core_type<tc>, window_params = [{transform_indices = @transform_0, window_bounds = array<i64: 26, 64>}, {transform_indices = @transform_1, window_bounds = array<i64: 26, 64>}, {transform_indices = @transform_2, window_bounds = array<i64: 26, 64>}, {pipeline_mode = #tpu.pipeline_mode<synchronous>, transform_indices = @transform_3, window_bounds = array<i64: 64, 32>}, {pipeline_mode = #tpu.pipeline_mode<synchronous>, transform_indices = @transform_4, window_bounds = array<i64: 1, 32>}, {pipeline_mode = #tpu.pipeline_mode<synchronous>, transform_indices = @transform_5, window_bounds = array<i64: 1, 32>}, {pipeline_mode = #tpu.pipeline_mode<synchronous>, transform_indices = @transform_6, window_bounds = array<i64: 1, 32>}, {pipeline_mode = #tpu.pipeline_mode<synchronous>, transform_indices = @transform_7, window_bounds = array<i64: 32, 3>}, {pipeline_mode = #tpu.pipeline_mode<synchronous>, transform_indices = @transform_8, window_bounds = array<i64: 1, 3>}, {transform_indices = @transform_9, window_bounds = array<i64: 26, 3>}]} {
    %c0 = arith.constant 0 : index
    %c0_0 = arith.constant 0 : index
    %0 = vector.load %arg1[%c0, %c0_0] : memref<26x64xf32, #tpu.memory_space<vmem>>, vector<26x64xf32>
    %c0_1 = arith.constant 0 : index
    %c0_2 = arith.constant 0 : index
    %1 = vector.load %arg2[%c0_1, %c0_2] : memref<26x64xf32, #tpu.memory_space<vmem>>, vector<26x64xf32>
    %2 = arith.mulf %0, %1 : vector<26x64xf32>
    %c0_3 = arith.constant 0 : index
    %c0_4 = arith.constant 0 : index
    %3 = vector.load %arg3[%c0_3, %c0_4] : memref<26x64xf32, #tpu.memory_space<vmem>>, vector<26x64xf32>
    %4 = arith.addf %2, %3 : vector<26x64xf32>
    %c0_5 = arith.constant 0 : index
    %c0_6 = arith.constant 0 : index
    %5 = vector.load %arg4[%c0_5, %c0_6] : memref<64x32xf32, #tpu.memory_space<vmem>>, vector<64x32xf32>
    %cst = arith.constant dense<0.000000e+00> : vector<26x32xf32>
    %6 = tpu.matmul %4, %5, %cst {dimension_numbers = #tpu.dot_dimension_numbers<[1], [0], [0], [1], [0, 0, 1, 1], [], []>} : vector<26x64xf32>, vector<64x32xf32>, vector<26x32xf32> -> vector<26x32xf32>
    %c0_7 = arith.constant 0 : index
    %c0_8 = arith.constant 0 : index
    %7 = vector.load %arg5[%c0_7, %c0_8] : memref<1x32xf32, #tpu.memory_space<vmem>>, vector<1x32xf32>
    %8 = vector.broadcast %7 : vector<1x32xf32> to vector<26x32xf32>
    %9 = arith.addf %6, %8 : vector<26x32xf32>
    %c0_9 = arith.constant 0 : index
    %c0_10 = arith.constant 0 : index
    %10 = vector.load %arg6[%c0_9, %c0_10] : memref<1x32xf32, #tpu.memory_space<vmem>>, vector<1x32xf32>
    %c0_11 = arith.constant 0 : index
    %c0_12 = arith.constant 0 : index
    %11 = vector.load %arg7[%c0_11, %c0_12] : memref<1x32xf32, #tpu.memory_space<vmem>>, vector<1x32xf32>
    %cst_13 = arith.constant dense<0.000000e+00> : vector<26xf32>
    %12 = vector.multi_reduction <add>, %9, %cst_13 [1] : vector<26x32xf32> to vector<26xf32>
    %13 = vector.shape_cast %12 : vector<26xf32> to vector<26x1xf32>
    %cst_14 = arith.constant 3.200000e+01 : f32
    %14 = vector.broadcast %cst_14 : f32 to vector<26x1xf32>
    %15 = arith.divf %13, %14 : vector<26x1xf32>
    %16 = vector.broadcast %15 : vector<26x1xf32> to vector<26x32xf32>
    %17 = arith.subf %9, %16 : vector<26x32xf32>
    %18 = arith.mulf %17, %17 : vector<26x32xf32>
    %cst_15 = arith.constant dense<0.000000e+00> : vector<26xf32>
    %19 = vector.multi_reduction <add>, %18, %cst_15 [1] : vector<26x32xf32> to vector<26xf32>
    %20 = vector.shape_cast %19 : vector<26xf32> to vector<26x1xf32>
    %cst_16 = arith.constant 3.200000e+01 : f32
    %21 = vector.broadcast %cst_16 : f32 to vector<26x1xf32>
    %22 = arith.divf %20, %21 : vector<26x1xf32>
    %23 = vector.broadcast %15 : vector<26x1xf32> to vector<26x32xf32>
    %24 = arith.subf %9, %23 : vector<26x32xf32>
    %cst_17 = arith.constant 9.99999974E-6 : f32
    %25 = vector.broadcast %cst_17 : f32 to vector<26x1xf32>
    %26 = arith.addf %22, %25 : vector<26x1xf32>
    %27 = math.rsqrt %26 : vector<26x1xf32>
    %28 = vector.broadcast %27 : vector<26x1xf32> to vector<26x32xf32>
    %29 = arith.mulf %24, %28 : vector<26x32xf32>
    %30 = vector.broadcast %10 : vector<1x32xf32> to vector<26x32xf32>
    %31 = arith.mulf %29, %30 : vector<26x32xf32>
    %32 = vector.broadcast %11 : vector<1x32xf32> to vector<26x32xf32>
    %33 = arith.addf %31, %32 : vector<26x32xf32>
    %cst_18 = arith.constant 0.000000e+00 : f32
    %34 = vector.broadcast %cst_18 : f32 to vector<26x32xf32>
    %35 = arith.maximumf %33, %34 : vector<26x32xf32>
    %c0_19 = arith.constant 0 : index
    %c0_20 = arith.constant 0 : index
    %36 = vector.load %arg8[%c0_19, %c0_20] : memref<32x3xf32, #tpu.memory_space<vmem>>, vector<32x3xf32>
    %cst_21 = arith.constant dense<0.000000e+00> : vector<26x3xf32>
    %37 = tpu.matmul %35, %36, %cst_21 {dimension_numbers = #tpu.dot_dimension_numbers<[1], [0], [0], [1], [0, 0, 1, 1], [], []>} : vector<26x32xf32>, vector<32x3xf32>, vector<26x3xf32> -> vector<26x3xf32>
    %c0_22 = arith.constant 0 : index
    %c0_23 = arith.constant 0 : index
    %38 = vector.load %arg9[%c0_22, %c0_23] : memref<1x3xf32, #tpu.memory_space<vmem>>, vector<1x3xf32>
    %39 = vector.broadcast %38 : vector<1x3xf32> to vector<26x3xf32>
    %40 = arith.addf %37, %39 : vector<26x3xf32>
    %c0_24 = arith.constant 0 : index
    %c0_25 = arith.constant 0 : index
    %41 = vector.load %arg10[%c0_24, %c0_25] : memref<26x3xf32, #tpu.memory_space<vmem>>, vector<26x3xf32>
    tpu.vector_store %arg10[%c0_24, %c0_25], %40 {strides = array<i32>} : memref<26x3xf32, #tpu.memory_space<vmem>>, vector<26x3xf32>,
    return
  }
  func.func @transform_0(%arg0: i32) -> (i32, i32) {
    %c0_i32 = arith.constant 0 : i32
    %c0_i32_0 = arith.constant 0 : i32
    return %arg0, %c0_i32 : i32, i32
  }
  func.func @transform_1(%arg0: i32) -> (i32, i32) {
    %c0_i32 = arith.constant 0 : i32
    %c0_i32_0 = arith.constant 0 : i32
    return %arg0, %c0_i32 : i32, i32
  }
  func.func @transform_2(%arg0: i32) -> (i32, i32) {
    %c0_i32 = arith.constant 0 : i32
    %c0_i32_0 = arith.constant 0 : i32
    return %arg0, %c0_i32 : i32, i32
  }
  func.func @transform_3(%arg0: i32) -> (i32, i32) {
    %c0_i32 = arith.constant 0 : i32
    %c0_i32_0 = arith.constant 0 : i32
    %c0_i32_1 = arith.constant 0 : i32
    return %c0_i32, %c0_i32_0 : i32, i32
  }
  func.func @transform_4(%arg0: i32) -> (i32, i32) {
    %c0_i32 = arith.constant 0 : i32
    %c0_i32_0 = arith.constant 0 : i32
    %c0_i32_1 = arith.constant 0 : i32
    return %c0_i32, %c0_i32_0 : i32, i32
  }
  func.func @transform_5(%arg0: i32) -> (i32, i32) {
    %c0_i32 = arith.constant 0 : i32
    %c0_i32_0 = arith.constant 0 : i32
    %c0_i32_1 = arith.constant 0 : i32
    return %c0_i32, %c0_i32_0 : i32, i32
  }
  func.func @transform_6(%arg0: i32) -> (i32, i32) {
    %c0_i32 = arith.constant 0 : i32
    %c0_i32_0 = arith.constant 0 : i32
    %c0_i32_1 = arith.constant 0 : i32
    return %c0_i32, %c0_i32_0 : i32, i32
  }
  func.func @transform_7(%arg0: i32) -> (i32, i32) {
    %c0_i32 = arith.constant 0 : i32
    %c0_i32_0 = arith.constant 0 : i32
    %c0_i32_1 = arith.constant 0 : i32
    return %c0_i32, %c0_i32_0 : i32, i32
  }
  func.func @transform_8(%arg0: i32) -> (i32, i32) {
    %c0_i32 = arith.constant 0 : i32
    %c0_i32_0 = arith.constant 0 : i32
    %c0_i32_1 = arith.constant 0 : i32
    return %c0_i32, %c0_i32_0 : i32, i32
  }
  func.func @transform_9(%arg0: i32) -> (i32, i32) {
    %c0_i32 = arith.constant 0 : i32
    %c0_i32_0 = arith.constant 0 : i32
    return %arg0, %c0_i32 : i32, i32
  }
}

</mosaic_0001>

<bundles_post_ra>
// kernel: squeeze.1
= control target key start
LH: loop header
LB: loop body
LE: loop exit
PB: predicated region body
PF: predicated region fallthrough
CT: control target
= control target key end

     0   :  { %vm3_vm0 = vcmask 523264   ;;  %s60_s0 = inlined_call_operand.vmem [shape: f32[2,1,13,64], index: 0, kind: input, shape index: {}]   ;;  %s61_s1 = inlined_call_operand.vmem [shape: f32[26,64], index: 1, kind: output, shape index: {}]  }
   0x1   :  { %v2_v0 = vld [vmem:[%s60_s0] sm:$0xff]   ;;  %v20_v1 = vld [vmem:[%s60_s0 + $0x8] sm:$0x1f]   ;;  %v22_v2 = vld [vmem:[%s60_s0 + $0x10] sm:$0xff]  }
   0x2   :  { %4 = vst.msk [vmem:[%s61_s1] sm:$0xff] %vm3_vm0, %v2_v0   ;;  %21 = vst.msk [vmem:[%s61_s1 + $0x8] sm:$0x1f] %vm3_vm0, %v20_v1   ;;  %v24_v3 = vld [vmem:[%s60_s0 + $0x18] sm:$0x1f]  }
   0x3   :  { %23 = vst.msk [vmem:[%s61_s1 + $0xd] sm:$0xff] %vm3_vm0, %v22_v2   ;;  %25 = vst.msk [vmem:[%s61_s1 + $0x15] sm:$0x1f] %vm3_vm0, %v24_v3  }

// kernel: tile.14
= control target key start
LH: loop header
LB: loop body
LE: loop exit
PB: predicated region body
PF: predicated region fallthrough
CT: control target
= control target key end

     0   :  { %vm3_vm0 = vcmask 523264   ;;  %s60_s0 = inlined_call_operand.vmem [shape: f32[2,13,64], index: 0, kind: input, shape index: {}]   ;;  %s61_s1 = inlined_call_operand.vmem [shape: f32[26,64], index: 1, kind: output, shape index: {}]  }
   0x1   :  { %v2_v0 = vld [vmem:[%s60_s0] sm:$0xff]   ;;  %v20_v1 = vld [vmem:[%s60_s0 + $0x8] sm:$0x1f]   ;;  %v22_v2 = vld [vmem:[%s60_s0 + $0x10] sm:$0xff]  }
   0x2   :  { %4 = vst.msk [vmem:[%s61_s1] sm:$0xff] %vm3_vm0, %v2_v0   ;;  %21 = vst.msk [vmem:[%s61_s1 + $0x8] sm:$0x1f] %vm3_vm0, %v20_v1   ;;  %v24_v3 = vld [vmem:[%s60_s0 + $0x18] sm:$0x1f]  }
   0x3   :  { %23 = vst.msk [vmem:[%s61_s1 + $0xd] sm:$0xff] %vm3_vm0, %v22_v2   ;;  %25 = vst.msk [vmem:[%s61_s1 + $0x15] sm:$0x1f] %vm3_vm0, %v24_v3  }

// kernel: dg_model_forward.4
= control target key start
LH: loop header
LB: loop body
LE: loop exit
PB: predicated region body
PF: predicated region fallthrough
CT: control target
= control target key end

     0   :  { %s1333_s25 = smov 0   ;;  %s1469_s0 = inlined_call_operand.vmem [shape: f32[64,5], index: 0, kind: input, shape index: {}]   ;;  %s1470_s1 = inlined_call_operand.vmem [shape: f32[3,16], index: 1, kind: input, shape index: {}]   ;;  %s1471_s2 = inlined_call_operand.vmem [shape: f32[1,16], index: 2, kind: input, shape index: {}]   ;;  %s1472_s3 = inlined_call_operand.vmem [shape: f32[1,16], index: 3, kind: input, shape index: {}]   ;;  %s1473_s4 = inlined_call_operand.vmem [shape: f32[1,16], index: 4, kind: input, shape index: {}]   ;;  %s1474_s5 = inlined_call_operand.vmem [shape: f32[16,32], index: 5, kind: input, shape index: {}]   ;;  %s1475_s6 = inlined_call_operand.vmem [shape: f32[1,32], index: 6, kind: input, shape index: {}]   ;;  %s1476_s7 = inlined_call_operand.vmem [shape: f32[2,16], index: 7, kind: input, shape index: {}]   ;;  %s1477_s8 = inlined_call_operand.vmem [shape: f32[1,16], index: 8, kind: input, shape index: {}]   ;;  %s1478_s9 = inlined_call_operand.vmem [shape: f32[1,16], index: 9, kind: input, shape index: {}]   ;;  %s1479_s10 = inlined_call_operand.vmem [shape: f32[1,16], index: 10, kind: input, shape index: {}]   ;;  %s1480_s11 = inlined_call_operand.vmem [shape: f32[16,32], index: 11, kind: input, shape index: {}]   ;;  %s1481_s12 = inlined_call_operand.vmem [shape: f32[1,32], index: 12, kind: input, shape index: {}]   ;;  %s1482_s13 = inlined_call_operand.vmem [shape: f32[64,64], index: 13, kind: output, shape index: {}]  }
   0x1 LB: > { %s1124_s26 = sadd.s32 4294967295, %s1259_s25   ;;  %p1128_p0 = scmp.ge.s32.totalorder %s1259_s25, 1  ;;  %s1259_s25 = sphi %s1333_s25, %s23_s25  }
   0x2   : > { %p388_p1 = scmp.lt.s32.totalorder %s1259_s25, 3 }
   0x4   : > { %p389_p2 = pnand %p1128_p0, %p388_p1 }
   0x5   : > { %v448_v0 = vld [vmem:[%s1470_s1] sm:$0x7] (!%p389_p2)  ;;  %vm469_vm0 = vcmask (!%p389_p2), 1042432   ;;  %s1129_s29 = sshll.u32 (!%p389_p2), %s1124_s26, 2  ;;  %vm769_vm1 = vcmask (!%p389_p2), 1041408   ;;  %vm456_vm2 = vcmask (!%p389_p2), 23552  }
   0x6   : > { %392 = sbr.rel (%p389_p2) target bundleno = 1007 (0x3ef), region = 72  ;;  %1183 = vmatprep.subr.msk.mxu0 (!%p389_p2), %vm469_vm0, %v448_v0  ;;  %p433_p3 = scmp.lt.s32.totalorder (!%p389_p2), %s1129_s29, 7  ;;  %v744_v1 = vld [vmem:[%s1476_s7] sm:$0x3] (!%p389_p2)  ;;  %vm760_vm3 = vcmask (!%p389_p2), 15360   ;;  %vm560_vm4 = vcmask (!%p389_p2), 130048  }
   0x7   : > { %1184 = vmatpush3.msk.msra.mxu0 (!%p389_p2), %vm469_vm0, %v448_v0  ;;  %s1261_s19 = smov (!%p389_p2), 125   ;;  %v1133_v10 = vld [vmem:[%s1471_s2] ss:$0 sm:$0xff] (!%p389_p2)  ;;  %v639_v57 = vld [vmem:[%s1474_s5 + $0x8] sm:$0xff] (!%p389_p2)  ;;  %s1262_s30 = smov (!%p389_p2), 32   ;;  %vm1058_vm5 = vcmask (!%p389_p2), 261120  }
   0x8   : > { %1201 = vmatprep.subr.msk.mxu0 (!%p389_p2), %vm769_vm1, %v744_v1  ;;  %v1146_v23 = vld [vmem:[%s1477_s8] ss:$0 sm:$0xff] (!%p389_p2)  ;;  %vm1063_vm6 = vcmask (!%p389_p2), 523264  }
   0x9   : > { %v638_v56 = vld [vmem:[%s1474_s5] sm:$0xff] (!%p389_p2) }
   0xa   : > { %v1219_v58 = vpack.c.bf16 (!%p389_p2), %v639_v57, %v638_v56 }
   0xc   : > { %1220 = vmatprep.subr.bf16.mxu1 (!%p389_p2), %v1219_v58 }
   0xd   : > { %s1484_s29 = smov (!%p433_p3, %s1129_s29), 7  ;;  %1222 = vmatpush3.bf16.msra.mxu1 %v1219_v58 }
   0xe   : > { %s1130_s15 = sshll.u32 %s1484_s29, 3 }
   0xf   : > { %s436_s18 = scalar_lea.vmem %s1469_s0, %s1130_s15 }
  0x10   : > { %v444_v2 = vld [vmem:[%s436_s18] sm:$0xff]  ;;  %v445_v3 = vld [vmem:[%s436_s18 + $0x8] sm:$0xff]  ;;  %v446_v4 = vld [vmem:[%s436_s18 + $0x10] sm:$0xff] }
  0x11   : > { %752 = vrot.lane.b32.xlu0 %v444_v2, %s1261_s19  ;;  %1185 = vmatprep.mubr.msk.f32.mxu0 %vm456_vm2, %v444_v2  ;;  %v447_v5 = vld [vmem:[%s436_s18 + $0x18] sm:$0xff] }
  0x12   : > { %1186 = vmatmul.mubr.msk.f32.vlgmr.msra.gmra.mrb[0].mxu0 %vm456_vm2, %v445_v3  ;;  %756 = vrot.lane.b32.xlu1 %v446_v4, %s1261_s19 }
  0x13   : > { %1188 = vmatprep.mubr.msk.f32.mxu0 %vm456_vm2, %v446_v4  ;;  %1202 = vmatpush3.msk.msra.mxu0 %vm769_vm1, %v744_v1 }
  0x15   : > { %754 = vrot.lane.b32.xlu0 %v445_v3, %s1261_s19 }
  0x16   : > { %1189 = vmatmul.mubr.msk.f32.gmra.mrb[2].mxu0 %vm456_vm2, %v447_v5  ;;  %758 = vrot.lane.b32.xlu1 %v447_v5, %s1261_s19  ;;  %s442_s19 = scalar_lea.vmem %s1482_s13, %s1130_s15 }
  0x83   : > { %v753_v6 = vpop.permute.xlu0 %752 }
  0x84   : > { %1203 = vmatprep.mubr.msk.f32.mxu0 %vm760_vm3, %v753_v6  ;;  %v757_v7 = vpop.permute.xlu1 %756 }
  0x87   : > { %v755_v8 = vpop.permute.xlu0 %754 }
  0x88   : > { %1204 = vmatmul.mubr.msk.f32.vlgmr.msra.gmra.mrb[4].mxu0 %vm760_vm3, %v755_v8  ;;  %v759_v9 = vpop.permute.xlu1 %758 }
  0x89   : > { %1206 = vmatprep.mubr.msk.f32.mxu0 %vm760_vm3, %v757_v7 }
  0x8c   : > { %1207 = vmatmul.mubr.msk.f32.gmra.mrb[6].mxu0 %vm760_vm3, %v759_v9 }
  0xe5   : > { %v1187_v11 = vpop.f32.mrb[0].mxu0 }
  0xe6   : > { %v545_v12 = vadd.f32 %v1187_v11, %v1133_v10  ;;  %v539_v13 = vpop.f32.mrb[1].mxu0 }
  0xe7   : > { %v540_v14 = vadd.f32 %v1133_v10, %v539_v13 }
  0xe8   : > { %v564_v15 = vsel %vm560_vm4, %v545_v12, 0.0 }
  0xe9   : > { %565 = vadd.xlane.f32.xlu1 %v564_v15  ;;  %v1190_v16 = vpop.f32.mrb[2].mxu0  ;;  %v561_v17 = vsel %vm560_vm4, %v540_v14, 0.0 }
  0xea   : > { %v549_v18 = vpop.f32.mrb[3].mxu0  ;;  %562 = vadd.xlane.f32.xlu0 %v561_v17  ;;  %v555_v19 = vadd.f32 %v1190_v16, %v1133_v10 }
  0xeb   : > { %v550_v20 = vadd.f32 %v1133_v10, %v549_v18 }
  0xec   : > { %v570_v22 = vsel %vm560_vm4, %v555_v19, 0.0 }
  0xed   : > { %v567_v21 = vsel %vm560_vm4, %v550_v20, 0.0 }
  0xee   : > { %568 = vadd.xlane.f32.xlu0 %v567_v21 }
  0xf2   : > { %571 = vadd.xlane.f32.xlu0 %v570_v22 }
 0x15b   : > { %v1205_v24 = vpop.f32.mrb[4].mxu0 }
 0x15c   : > { %v845_v25 = vadd.f32 %v1205_v24, %v1146_v23  ;;  %v839_v26 = vpop.f32.mrb[5].mxu0  ;;  %v937_v24 = vld [vmem:[%s1480_s11 + $0x8] sm:$0xff] }
 0x15d   : > { %v840_v27 = vadd.f32 %v1146_v23, %v839_v26 }
 0x15e   : > { %v863_v28 = vsel %vm560_vm4, %v845_v25, 0.0 }
 0x15f   : > { %v1208_v29 = vpop.f32.mrb[6].mxu0  ;;  %864 = vadd.xlane.f32.xlu0 %v863_v28  ;;  %v860_v30 = vsel %vm560_vm4, %v840_v27, 0.0 }
 0x160   : > { %v855_v31 = vadd.f32 %v1208_v29, %v1146_v23  ;;  %v849_v32 = vpop.f32.mrb[7].mxu0  ;;  %861 = vadd.xlane.f32.xlu1 %v860_v30 }
 0x161   : > { %v850_v33 = vadd.f32 %v1146_v23, %v849_v32  ;;  %v936_v23 = vld [vmem:[%s1480_s11] sm:$0xff] }
 0x162   : > { %v869_v34 = vsel %vm560_vm4, %v855_v31, 0.0 }
 0x163   : > { %870 = vadd.xlane.f32.xlu0 %v869_v34  ;;  %v866_v35 = vsel %vm560_vm4, %v850_v33, 0.0  ;;  %v1140_v34 = vld [vmem:[%s1473_s4] ss:$0 sm:$0xff] }
 0x164   : > { %867 = vadd.xlane.f32.xlu1 %v866_v35 }
 0x176   : > { %v566_v36 = vpop.xlane.xlu1 %565 }
 0x177   : > { %v575_v37 = vmul.f32 0.0625, %v566_v36  ;;  %v563_v38 = vpop.xlane.xlu0 %562 }
 0x178   : > { %v574_v39 = vmul.f32 0.0625, %v563_v38 }
 0x179   : > { %v1371_v40 = vsub.f32 %v545_v12, %v575_v37 }
 0x17a   : > { %v1373_v41 = vsub.f32 %v540_v14, %v574_v39 }
 0x17b   : > { %v569_v42 = vpop.xlane.xlu0 %568  ;;  %v583_v43 = vmul.f32 %v1371_v40, %v1371_v40 }
 0x17c   : > { %v576_v44 = vmul.f32 0.0625, %v569_v42  ;;  %v582_v45 = vmul.f32 %v1373_v41, %v1373_v41 }
 0x17d   : > { %v589_v46 = vsel %vm560_vm4, %v583_v43, 0.0 }
 0x17e   : > { %v1380_v47 = vsub.f32 %v550_v20, %v576_v44  ;;  %590 = vadd.xlane.f32.xlu0 %v589_v46  ;;  %v586_v48 = vsel %vm560_vm4, %v582_v45, 0.0 }
 0x17f   : > { %587 = vadd.xlane.f32.xlu1 %v586_v48  ;;  %v572_v49 = vpop.xlane.xlu0 %571 }
 0x180   : > { %v577_v50 = vmul.f32 0.0625, %v572_v49  ;;  %v584_v51 = vmul.f32 %v1380_v47, %v1380_v47 }
 0x182   : > { %v1385_v52 = vsub.f32 %v555_v19, %v577_v50  ;;  %v592_v53 = vsel %vm560_vm4, %v584_v51, 0.0 }
 0x183   : > { %593 = vadd.xlane.f32.xlu1 %v592_v53 }
 0x184   : > { %v585_v54 = vmul.f32 %v1385_v52, %v1385_v52 }
 0x186   : > { %v595_v55 = vsel %vm560_vm4, %v585_v54, 0.0 }
 0x187   : > { %596 = vadd.xlane.f32.xlu0 %v595_v55 }
 0x1ec   : > { %v865_v59 = vpop.xlane.xlu0 %864 }
 0x1ed   : > { %v873_v60 = vmul.f32 0.0625, %v865_v59  ;;  %v862_v61 = vpop.xlane.xlu1 %861 }
 0x1ee   : > { %v872_v62 = vmul.f32 0.0625, %v862_v61 }
 0x1ef   : > { %v1397_v63 = vsub.f32 %v845_v25, %v873_v60  ;;  %v1223_v25 = vpack.c.bf16 %v937_v24, %v936_v23 }
 0x1f0   : > { %v1399_v0 = vsub.f32 %v840_v27, %v872_v62  ;;  %v871_v1 = vpop.xlane.xlu0 %870 }
 0x1f1   : > { %v875_v2 = vmul.f32 0.0625, %v871_v1  ;;  %v868_v3 = vpop.xlane.xlu1 %867  ;;  %v881_v4 = vmul.f32 %v1397_v63, %v1397_v63  ;;  %1224 = vmatprep.subr.bf16.mxu1 %v1223_v25 }
 0x1f2   : > { %v874_v5 = vmul.f32 0.0625, %v868_v3  ;;  %v880_v6 = vmul.f32 %v1399_v0, %v1399_v0  ;;  %v1152_v3 = vld [vmem:[%s1478_s9] ss:$0 sm:$0xff] }
 0x1f3   : > { %v1405_v7 = vsub.f32 %v855_v31, %v875_v2  ;;  %v887_v8 = vsel %vm560_vm4, %v881_v4, 0.0  ;;  %v1139_v31 = vld [vmem:[%s1472_s3] ss:$0 sm:$0xff] }
 0x1f4   : > { %v1408_v9 = vsub.f32 %v850_v33, %v874_v5  ;;  %888 = vadd.xlane.f32.xlu0 %v887_v8  ;;  %v884_v10 = vsel %vm560_vm4, %v880_v6, 0.0  ;;  %v1153_v6 = vld [vmem:[%s1479_s10] ss:$0 sm:$0xff] }
 0x1f5   : > { %885 = vadd.xlane.f32.xlu1 %v884_v10  ;;  %v883_v11 = vmul.f32 %v1405_v7, %v1405_v7 }
 0x1f6   : > { %v882_v12 = vmul.f32 %v1408_v9, %v1408_v9 }
 0x1f7   : > { %v893_v13 = vsel %vm560_vm4, %v883_v11, 0.0 }
 0x1f8   : > { %894 = vadd.xlane.f32.xlu0 %v893_v13  ;;  %v890_v14 = vsel %vm560_vm4, %v882_v12, 0.0 }
 0x1f9   : > { %891 = vadd.xlane.f32.xlu1 %v890_v14 }
 0x20b   : > { %v591_v15 = vpop.xlane.xlu0 %590 }
 0x20c   : > { %v599_v16 = vmul.f32 0.0625, %v591_v15  ;;  %v588_v17 = vpop.xlane.xlu1 %587 }
 0x20d   : > { %v598_v18 = vmul.f32 0.0625, %v588_v17 }
 0x20e   : > { %v603_v19 = vadd.f32 1e-05, %v599_v16 }
 0x20f   : > { %v602_v20 = vadd.f32 1e-05, %v598_v18 }
 0x210   : > { %1237 = vrsqrt.f32 %v603_v19  ;;  %v594_v21 = vpop.xlane.xlu1 %593 }
 0x211   : > { %1239 = vrsqrt.f32 %v602_v20  ;;  %v600_v22 = vmul.f32 0.0625, %v594_v21 }
 0x213   : > { %v604_v26 = vadd.f32 1e-05, %v600_v22 }
 0x214   : > { %v597_v27 = vpop.xlane.xlu0 %596 }
 0x215   : > { %1241 = vrsqrt.f32 %v604_v26  ;;  %v601_v28 = vmul.f32 0.0625, %v597_v27  ;;  %v1154_v26 = vld [vmem:[%s1481_s12] ss:$0 sm:$0xff] }
 0x217   : > { %v605_v29 = vadd.f32 1e-05, %v601_v28 }
 0x219   : > { %1243 = vrsqrt.f32 %v605_v29 }
 0x21a   : > { %v1238_v30 = vpop.eup %1237 }
 0x21b   : > { %v1240_v32 = vpop.eup %1239  ;;  %v611_v33 = vmul.f32 %v1238_v30, %v1371_v40 }
 0x21c   : > { %v610_v35 = vmul.f32 %v1240_v32, %v1373_v41 }
 0x21d   : > { %v621_v36 = vmul.f32 %v1139_v31, %v611_v33 }
 0x21e   : > { %v620_v37 = vmul.f32 %v1139_v31, %v610_v35  ;;  %v1141_v35 = vld [vmem:[%s1475_s6] ss:$0 sm:$0xff] }
 0x21f   : > { %v1242_v38 = vpop.eup %1241  ;;  %v631_v39 = vadd.f32 %v1140_v34, %v621_v36 }
 0x220   : > { %v630_v42 = vadd.f32 %v1140_v34, %v620_v37  ;;  %v612_v43 = vmul.f32 %v1242_v38, %v1380_v47 }
 0x221   : > { %v635_v48 = vmax.f32 %v631_v39, 0.0 }
 0x222   : > { %v634_v44 = vmax.f32 %v630_v42, 0.0  ;;  %v622_v45 = vmul.f32 %v1139_v31, %v612_v43 }
 0x223   : > { %v1244_v46 = vpop.eup %1243 }
 0x224   : > { %1195 = vmatprep.mubr.msk.f32.mxu1 %vm560_vm4, %v634_v44  ;;  %v632_v40 = vadd.f32 %v1140_v34, %v622_v45  ;;  %v613_v49 = vmul.f32 %v1244_v46, %v1385_v52 }
 0x225   : > { %1196 = vmatmul.mubr.msk.f32.vlgmr.msra.gmra.mrb[0].mxu1 %vm560_vm4, %v635_v48 }
 0x226   : > { %v636_v50 = vmax.f32 %v632_v40, 0.0  ;;  %v623_v41 = vmul.f32 %v1139_v31, %v613_v49  ;;  %1226 = vmatpush3.bf16.msra.mxu1 %v1223_v25 }
 0x228   : > { %1198 = vmatprep.mubr.msk.f32.mxu1 %vm560_vm4, %v636_v50  ;;  %v633_v51 = vadd.f32 %v1140_v34, %v623_v41 }
 0x22a   : > { %v637_v53 = vmax.f32 %v633_v51, 0.0 }
 0x22c   : > { %1199 = vmatmul.mubr.msk.f32.gmra.mrb[2].mxu1 %vm560_vm4, %v637_v53 }
 0x281   : > { %v889_v47 = vpop.xlane.xlu0 %888 }
 0x282   : > { %v897_v54 = vmul.f32 0.0625, %v889_v47  ;;  %v886_v55 = vpop.xlane.xlu1 %885 }
 0x283   : > { %v896_v56 = vmul.f32 0.0625, %v886_v55 }
 0x284   : > { %v901_v57 = vadd.f32 1e-05, %v897_v54 }
 0x285   : > { %v900_v58 = vadd.f32 1e-05, %v896_v56  ;;  %v895_v59 = vpop.xlane.xlu0 %894 }
 0x286   : > { %1245 = vrsqrt.f32 %v901_v57  ;;  %v899_v52 = vmul.f32 0.0625, %v895_v59  ;;  %v892_v60 = vpop.xlane.xlu1 %891 }
 0x287   : > { %1247 = vrsqrt.f32 %v900_v58  ;;  %v898_v61 = vmul.f32 0.0625, %v892_v60 }
 0x288   : > { %v903_v62 = vadd.f32 1e-05, %v899_v52 }
 0x289   : > { %v902_v1 = vadd.f32 1e-05, %v898_v61 }
 0x28a   : > { %1249 = vrsqrt.f32 %v903_v62 }
 0x28b   : > { %1251 = vrsqrt.f32 %v902_v1 }
 0x290   : > { %v1246_v2 = vpop.eup %1245 }
 0x291   : > { %v1248_v4 = vpop.eup %1247  ;;  %v909_v5 = vmul.f32 %v1246_v2, %v1397_v63 }
 0x292   : > { %v908_v8 = vmul.f32 %v1248_v4, %v1399_v0 }
 0x293   : > { %v919_v10 = vmul.f32 %v1152_v3, %v909_v5 }
 0x294   : > { %v1250_v11 = vpop.eup %1249  ;;  %v918_v12 = vmul.f32 %v1152_v3, %v908_v8 }
 0x295   : > { %v1252_v13 = vpop.eup %1251  ;;  %v929_v14 = vadd.f32 %v1153_v6, %v919_v10  ;;  %v911_v15 = vmul.f32 %v1250_v11, %v1405_v7 }
 0x296   : > { %v928_v16 = vadd.f32 %v1153_v6, %v918_v12  ;;  %v910_v17 = vmul.f32 %v1252_v13, %v1408_v9 }
 0x297   : > { %v921_v18 = vmul.f32 %v1152_v3, %v911_v15  ;;  %v933_v63 = vmax.f32 %v929_v14, 0.0 }
 0x298   : > { %v932_v19 = vmax.f32 %v928_v16, 0.0  ;;  %v920_v20 = vmul.f32 %v1152_v3, %v910_v17 }
 0x299   : > { %v931_v21 = vadd.f32 %v1153_v6, %v921_v18 }
 0x29a   : > { %1213 = vmatprep.mubr.msk.f32.mxu1 %vm560_vm4, %v932_v19  ;;  %v930_v22 = vadd.f32 %v1153_v6, %v920_v20 }
 0x29b   : > { %1214 = vmatmul.mubr.msk.f32.vlgmr.msra.gmra.mrb[4].mxu1 %vm560_vm4, %v933_v63  ;;  %v935_v23 = vmax.f32 %v931_v21, 0.0 }
 0x29c   : > { %v934_v0 = vmax.f32 %v930_v22, 0.0 }
 0x29e   : > { %1216 = vmatprep.mubr.msk.f32.mxu1 %vm560_vm4, %v934_v0 }
 0x29f   : > { %1217 = vmatmul.mubr.msk.f32.gmra.mrb[6].mxu1 %vm560_vm4, %v935_v23 }
 0x2f8   : > { %v1197_v7 = vpop.f32.mrb[0].mxu1 }
 0x2f9   : > { %v725_v24 = vpop.f32.mrb[1].mxu1  ;;  %v731_v38 = vadd.f32 %v1197_v7, %v1141_v35 }
 0x2fa   : > { %v726_v36 = vadd.f32 %v1141_v35, %v725_v24 }
 0x2ff   : > { %v1200_v25 = vpop.f32.mrb[2].mxu1 }
 0x300   : > { %v735_v9 = vpop.f32.mrb[3].mxu1  ;;  %v741_v48 = vadd.f32 %v1200_v25, %v1141_v35 }
 0x301   : > { %v736_v44 = vadd.f32 %v1141_v35, %v735_v9 }
 0x36e   : > { %v1215_v27 = vpop.f32.mrb[4].mxu1 }
 0x36f   : > { %v1029_v28 = vadd.f32 %v1215_v27, %v1154_v26  ;;  %v1023_v29 = vpop.f32.mrb[5].mxu1 }
 0x370   : > { %v1024_v30 = vadd.f32 %v1154_v26, %v1023_v29 }
 0x371   : > { %1048 = vrot.lane.b32.xlu0 %v1029_v28, %s1262_s30 }
 0x372   : > { %1046 = vrot.lane.b32.xlu1 %v1024_v30, %s1262_s30  ;;  %v1218_v31 = vpop.f32.mrb[6].mxu1 }
 0x373   : > { %v1033_v32 = vpop.f32.mrb[7].mxu1  ;;  %v1039_v34 = vadd.f32 %v1218_v31, %v1154_v26 }
 0x374   : > { %v1034_v33 = vadd.f32 %v1154_v26, %v1033_v32 }
 0x376   : > { %1050 = vrot.lane.b32.xlu1 %v1034_v33, %s1262_s30 }
 0x37a   : > { %1052 = vrot.lane.b32.xlu1 %v1039_v34, %s1262_s30 }
 0x3e3   : > { %v1049_v37 = vpop.permute.xlu0 %1048 }
 0x3e4   : > { %v1047_v39 = vpop.permute.xlu1 %1046  ;;  %v1060_v43 = vsel %vm1058_vm5, %v731_v38, %v1049_v37 }
 0x3e5   : > { %v1059_v42 = vsel %vm1058_vm5, %v726_v36, %v1047_v39  ;;  %1065 = vst.msk [vmem:[%s442_s19 + $0x8] sm:$0xff] %vm1063_vm6, %v1060_v43 }
 0x3e6   : > { %1064 = vst.msk [vmem:[%s442_s19] sm:$0xff] %vm1063_vm6, %v1059_v42 }
 0x3e8   : > { %v1051_v45 = vpop.permute.xlu1 %1050 }
 0x3e9   : > { %v1061_v46 = vsel %vm1058_vm5, %v736_v44, %v1051_v45 }
 0x3ea   : > { %1066 = vst.msk [vmem:[%s442_s19 + $0x10] sm:$0xff] %vm1063_vm6, %v1061_v46 }
 0x3ec   : > { %v1053_v40 = vpop.permute.xlu1 %1052 }
 0x3ed   : > { %v1062_v49 = vsel %vm1058_vm5, %v741_v48, %v1053_v40 }
 0x3ee   : > { %1067 = vst.msk [vmem:[%s442_s19 + $0x18] sm:$0xff] %vm1063_vm6, %v1062_v49 }
 0x3ef PF: > { %s23_s25 = sadd.s32 1, %s1259_s25  }
 0x3f0   : > { %p20_p4 = scmp.ge.s32.totalorder %s23_s25, 4  }
 0x3f2   :  { %22 = sbr.rel (!%p20_p4) target bundleno = 1 (0x1), region = 102 }

// kernel: dg_model_forward.7
= control target key start
LH: loop header
LB: loop body
LE: loop exit
PB: predicated region body
PF: predicated region fallthrough
CT: control target
= control target key end

     0   :  { %vm67_vm0 = vcmask 523264   ;;  %vm167_vm1 = vcmask 261120   ;;  %vm177_vm2 = vcmask 254976   ;;  %vm354_vm3 = vcmask 23552   ;;  %s626_s3 = inlined_call_operand.vmem [shape: f32[64,32], index: 3, kind: input, shape index: {}]   ;;  %s627_s0 = inlined_call_operand.vmem [shape: f32[26,64], index: 0, kind: input, shape index: {}]   ;;  %s628_s1 = inlined_call_operand.vmem [shape: f32[26,64], index: 1, kind: input, shape index: {}]   ;;  %s629_s2 = inlined_call_operand.vmem [shape: f32[26,64], index: 2, kind: input, shape index: {}]   ;;  %s630_s4 = inlined_call_operand.vmem [shape: f32[1,32], index: 4, kind: input, shape index: {}]   ;;  %s631_s7 = inlined_call_operand.vmem [shape: f32[32,3], index: 7, kind: input, shape index: {}]   ;;  %s632_s5 = inlined_call_operand.vmem [shape: f32[1,32], index: 5, kind: input, shape index: {}]   ;;  %s633_s6 = inlined_call_operand.vmem [shape: f32[1,32], index: 6, kind: input, shape index: {}]   ;;  %s634_s8 = inlined_call_operand.vmem [shape: f32[1,3], index: 8, kind: input, shape index: {}]   ;;  %s635_s9 = inlined_call_operand.vmem [shape: f32[26,3], index: 9, kind: output, shape index: {}]  }
   0x1   :  { %v52_v0 = vld [vmem:[%s626_s3] sm:$0xff]  ;;  %v53_v1 = vld [vmem:[%s626_s3 + $0x8] sm:$0xff]  ;;  %v54_v2 = vld [vmem:[%s626_s3 + $0x10] sm:$0xff]  ;;  %vm358_vm4 = vcmask 17408  }
   0x2   :  { %v432_v3 = vpack.c.bf16 %v53_v1, %v52_v0  ;;  %v55_v4 = vld [vmem:[%s626_s3 + $0x18] sm:$0xff]  ;;  %v56_v6 = vld [vmem:[%s626_s3 + $0x20] sm:$0xff]  ;;  %v57_v7 = vld [vmem:[%s626_s3 + $0x28] sm:$0xff] }
   0x3   :  { %v436_v5 = vpack.c.bf16 %v55_v4, %v54_v2  ;;  %v32_v8 = vld [vmem:[%s627_s0] sm:$0xff]  ;;  %v440_v12 = vpack.c.bf16 %v57_v7, %v56_v6  ;;  %v58_v13 = vld [vmem:[%s626_s3 + $0x30] sm:$0xff]  ;;  %v59_v14 = vld [vmem:[%s626_s3 + $0x38] sm:$0xff] }
   0x4   :  { %433 = vmatprep.subr.bf16.mxu0 %v432_v3  ;;  %v36_v9 = vld [vmem:[%s628_s1] sm:$0xff]  ;;  %v33_v16 = vld [vmem:[%s627_s0 + $0x8] sm:$0xff]  ;;  %v444_v18 = vpack.c.bf16 %v59_v14, %v58_v13  ;;  %v34_v19 = vld [vmem:[%s627_s0 + $0x10] sm:$0xff] }
   0x5   :  { %v44_v10 = vld [vmem:[%s629_s2] sm:$0xff]  ;;  %435 = vmatpush3.bf16.msra.mxu0 %v432_v3  ;;  %v40_v11 = vmul.f32 %v36_v9, %v32_v8  ;;  %v37_v17 = vld [vmem:[%s628_s1 + $0x8] sm:$0xff]  ;;  %v38_v20 = vld [vmem:[%s628_s1 + $0x10] sm:$0xff] }
   0x6   :  { %437 = vmatprep.subr.bf16.mxu0 %v436_v5  ;;  %v41_v21 = vmul.f32 %v37_v17, %v33_v16  ;;  %v45_v22 = vld [vmem:[%s629_s2 + $0x8] sm:$0xff]  ;;  %v42_v23 = vmul.f32 %v38_v20, %v34_v19  ;;  %v35_v24 = vld [vmem:[%s627_s0 + $0x18] sm:$0x3]  ;;  %v46_v26 = vld [vmem:[%s629_s2 + $0x10] sm:$0xff] }
   0x7   :  { %v48_v15 = vadd.f32 %v44_v10, %v40_v11  ;;  %v39_v25 = vld [vmem:[%s628_s1 + $0x18] sm:$0x3]  ;;  %v364_v32 = vld [vmem:[%s630_s4] ss:$0 sm:$0xff]  ;;  %v247_v2 = vld [vmem:[%s631_s7 + $0x8] sm:$0xff] }
   0x8   :  { %v49_v27 = vadd.f32 %v45_v22, %v41_v21  ;;  %v43_v28 = vmul.f32 %v39_v25, %v35_v24  ;;  %v50_v29 = vadd.f32 %v46_v26, %v42_v23  ;;  %v47_v30 = vld [vmem:[%s629_s2 + $0x18] sm:$0x3]  ;;  %v246_v1 = vld [vmem:[%s631_s7] sm:$0xff]  ;;  %v248_v4 = vld [vmem:[%s631_s7 + $0x10] sm:$0xff] }
   0x9   :  { %439 = vmatpush3.bf16.msra.mxu0 %v436_v5  ;;  %412 = vmatprep.mubr.msk.f32.mxu0 %vm67_vm0, %v48_v15  ;;  %v448_v3 = vpack.c.bf16 %v247_v2, %v246_v1  ;;  %v249_v5 = vld [vmem:[%s631_s7 + $0x18] sm:$0xff]  ;;  %v369_v20 = vld [vmem:[%s632_s5] ss:$0 sm:$0xff] }
   0xa   :  { %441 = vmatprep.subr.bf16.mxu0 %v440_v12  ;;  %v51_v31 = vadd.f32 %v47_v30, %v43_v28  ;;  %v452_v6 = vpack.c.bf16 %v249_v5, %v248_v4  ;;  %v370_v22 = vld [vmem:[%s633_s6] ss:$0 sm:$0xff] }
   0xb   :  { %449 = vmatprep.subr.bf16.mxu1 %v448_v3 }
   0xc   :  { %451 = vmatpush3.bf16.msra.mxu1 %v448_v3 }
   0xd   :  { %443 = vmatpush3.bf16.msra.mxu0 %v440_v12  ;;  %453 = vmatprep.subr.bf16.mxu1 %v452_v6 }
   0xe   :  { %445 = vmatprep.subr.bf16.mxu0 %v444_v18 }
  0x10   :  { %455 = vmatpush3.bf16.msra.mxu1 %v452_v6 }
  0x11   :  { %447 = vmatpush3.bf16.msra.mxu0 %v444_v18 }
  0x14   :  { %413 = vmatmul.mubr.msk.f32.vlgmr.msra.gmra.mrb[0].mxu0 %vm67_vm0, %v49_v27 }
  0x15   :  { %415 = vmatprep.mubr.msk.f32.mxu0 %vm67_vm0, %v50_v29 }
  0x18   :  { %416 = vmatmul.mubr.msk.f32.gmra.mrb[2].mxu0 %vm67_vm0, %v51_v31 }
  0xe7   :  { %v414_v33 = vpop.f32.mrb[0].mxu0 }
  0xe8   :  { %v146_v34 = vpop.f32.mrb[1].mxu0  ;;  %v152_v36 = vadd.f32 %v414_v33, %v364_v32 }
  0xe9   :  { %v147_v35 = vadd.f32 %v364_v32, %v146_v34 }
  0xea   :  { %v171_v43 = vsel %vm167_vm1, %v152_v36, 0.0 }
  0xeb   :  { %v417_v37 = vpop.f32.mrb[2].mxu0  ;;  %v168_v38 = vsel %vm167_vm1, %v147_v35, 0.0 }
  0xec   :  { %v156_v39 = vpop.f32.mrb[3].mxu0  ;;  %169 = vadd.xlane.f32.xlu0 %v168_v38  ;;  %v162_v41 = vadd.f32 %v417_v37, %v364_v32 }
  0xed   :  { %v157_v40 = vadd.f32 %v364_v32, %v156_v39 }
  0xee   :  { %v178_v44 = vsel %vm177_vm2, %v162_v41, 0.0 }
  0xef   :  { %v174_v42 = vsel %vm167_vm1, %v157_v40, 0.0 }
  0xf0   :  { %175 = vadd.xlane.f32.xlu1 %v174_v42  ;;  %172 = vadd.xlane.f32.xlu0 %v171_v43 }
  0xf4   :  { %179 = vadd.xlane.f32.xlu1 %v178_v44 }
 0x179   :  { %v170_v45 = vpop.xlane.xlu0 %169 }
 0x17a   :  { %v182_v46 = vmul.f32 0.03125, %v170_v45 }
 0x17c   :  { %v186_v47 = vsub.f32 %v147_v35, %v182_v46 }
 0x17d   :  { %v176_v48 = vpop.xlane.xlu1 %175  ;;  %v173_v49 = vpop.xlane.xlu0 %172 }
 0x17e   :  { %v184_v50 = vmul.f32 0.03125, %v176_v48  ;;  %v183_v51 = vmul.f32 0.03125, %v173_v49  ;;  %v190_v52 = vmul.f32 %v186_v47, %v186_v47 }
 0x180   :  { %v188_v53 = vsub.f32 %v157_v40, %v184_v50  ;;  %v187_v54 = vsub.f32 %v152_v36, %v183_v51  ;;  %v194_v55 = vsel %vm167_vm1, %v190_v52, 0.0 }
 0x181   :  { %v180_v56 = vpop.xlane.xlu1 %179  ;;  %195 = vadd.xlane.f32.xlu0 %v194_v55 }
 0x182   :  { %v185_v57 = vmul.f32 0.03125, %v180_v56  ;;  %v192_v58 = vmul.f32 %v188_v53, %v188_v53  ;;  %v191_v59 = vmul.f32 %v187_v54, %v187_v54 }
 0x184   :  { %v189_v60 = vsub.f32 %v162_v41, %v185_v57  ;;  %v200_v61 = vsel %vm167_vm1, %v192_v58, 0.0  ;;  %v197_v62 = vsel %vm167_vm1, %v191_v59, 0.0  ;;  %v371_v41 = vld [vmem:[%s634_s8] ss:$0 sm:$0xff] }
 0x185   :  { %201 = vadd.xlane.f32.xlu0 %v200_v61  ;;  %198 = vadd.xlane.f32.xlu1 %v197_v62 }
 0x186   :  { %v193_v63 = vmul.f32 %v189_v60, %v189_v60 }
 0x188   :  { %v203_v0 = vsel %vm177_vm2, %v193_v63, 0.0 }
 0x189   :  { %204 = vadd.xlane.f32.xlu1 %v203_v0 }
 0x20e   :  { %v196_v7 = vpop.xlane.xlu0 %195 }
 0x20f   :  { %v206_v8 = vmul.f32 0.03125, %v196_v7 }
 0x211   :  { %v210_v9 = vadd.f32 1e-05, %v206_v8 }
 0x212   :  { %v199_v10 = vpop.xlane.xlu1 %198  ;;  %v202_v11 = vpop.xlane.xlu0 %201 }
 0x213   :  { %456 = vrsqrt.f32 %v210_v9  ;;  %v207_v12 = vmul.f32 0.03125, %v199_v10  ;;  %v208_v13 = vmul.f32 0.03125, %v202_v11 }
 0x215   :  { %v211_v14 = vadd.f32 1e-05, %v207_v12  ;;  %v212_v15 = vadd.f32 1e-05, %v208_v13 }
 0x216   :  { %v205_v16 = vpop.xlane.xlu1 %204 }
 0x217   :  { %458 = vrsqrt.f32 %v211_v14  ;;  %v209_v17 = vmul.f32 0.03125, %v205_v16 }
 0x218   :  { %460 = vrsqrt.f32 %v212_v15 }
 0x219   :  { %v213_v18 = vadd.f32 1e-05, %v209_v17 }
 0x21b   :  { %462 = vrsqrt.f32 %v213_v18 }
 0x21d   :  { %v457_v19 = vpop.eup %456 }
 0x21e   :  { %v218_v21 = vmul.f32 %v457_v19, %v186_v47 }
 0x220   :  { %v228_v23 = vmul.f32 %v369_v20, %v218_v21 }
 0x221   :  { %v459_v24 = vpop.eup %458 }
 0x222   :  { %v461_v25 = vpop.eup %460  ;;  %v238_v26 = vadd.f32 %v370_v22, %v228_v23  ;;  %v219_v27 = vmul.f32 %v459_v24, %v187_v54 }
 0x223   :  { %v220_v28 = vmul.f32 %v461_v25, %v188_v53 }
 0x224   :  { %v242_v29 = vmax.f32 %v238_v26, 0.0  ;;  %v229_v30 = vmul.f32 %v369_v20, %v219_v27 }
 0x225   :  { %v463_v31 = vpop.eup %462  ;;  %v230_v32 = vmul.f32 %v369_v20, %v220_v28 }
 0x226   :  { %v221_v33 = vmul.f32 %v463_v31, %v189_v60  ;;  %426 = vmatprep.mubr.msk.f32.mxu1 %vm167_vm1, %v242_v29  ;;  %v239_v34 = vadd.f32 %v370_v22, %v229_v30 }
 0x227   :  { %v240_v35 = vadd.f32 %v370_v22, %v230_v32 }
 0x228   :  { %v243_v36 = vmax.f32 %v239_v34, 0.0  ;;  %v231_v37 = vmul.f32 %v369_v20, %v221_v33 }
 0x229   :  { %v244_v38 = vmax.f32 %v240_v35, 0.0 }
 0x22a   :  { %427 = vmatmul.mubr.msk.f32.vlgmr.msra.gmra.mrb[0].mxu1 %vm167_vm1, %v243_v36  ;;  %v241_v39 = vadd.f32 %v370_v22, %v231_v37 }
 0x22b   :  { %429 = vmatprep.mubr.msk.f32.mxu1 %vm167_vm1, %v244_v38 }
 0x22c   :  { %v245_v40 = vmax.f32 %v241_v39, 0.0 }
 0x22e   :  { %430 = vmatmul.mubr.msk.f32.gmra.mrb[2].mxu1 %vm167_vm1, %v245_v40 }
 0x2fd   :  { %v428_v42 = vpop.f32.mrb[0].mxu1 }
 0x2fe   :  { %v341_v43 = vadd.f32 %v428_v42, %v371_v41  ;;  %v335_v44 = vpop.f32.mrb[1].mxu1 }
 0x2ff   :  { %v336_v45 = vadd.f32 %v371_v41, %v335_v44 }
 0x300   :  { %356 = vst.msk [vmem:[%s635_s9 + $0x8] sm:$0xff] %vm354_vm3, %v341_v43 }
 0x301   :  { %355 = vst.msk [vmem:[%s635_s9] sm:$0xff] %vm354_vm3, %v336_v45  ;;  %v431_v46 = vpop.f32.mrb[2].mxu1 }
 0x302   :  { %v351_v47 = vadd.f32 %v431_v46, %v371_v41  ;;  %v345_v48 = vpop.f32.mrb[3].mxu1 }
 0x303   :  { %v346_v49 = vadd.f32 %v371_v41, %v345_v48 }
 0x304   :  { %359 = vst.msk [vmem:[%s635_s9 + $0x18] sm:$0x3] %vm358_vm4, %v351_v47 }
 0x305   :  { %357 = vst.msk [vmem:[%s635_s9 + $0x10] sm:$0xff] %vm354_vm3, %v346_v49 }

// kernel: dg_model_forward.6
= control target key start
LH: loop header
LB: loop body
LE: loop exit
PB: predicated region body
PF: predicated region fallthrough
CT: control target
= control target key end

     0   :  { %s3395_s13 = smov 0   ;;  %s3883_s0 = inlined_call_operand.vmem [shape: f32[8,8,64], index: 0, kind: input, shape index: {}]   ;;  %s3884_s1 = inlined_call_operand.vmem [shape: f32[64,128], index: 1, kind: input, shape index: {}]   ;;  %s3885_s2 = inlined_call_operand.vmem [shape: f32[1,128], index: 2, kind: input, shape index: {}]   ;;  %s3886_s3 = inlined_call_operand.vmem [shape: f32[64,13], index: 3, kind: input, shape index: {}]   ;;  %s3887_s4 = inlined_call_operand.vmem [shape: f32[64,128], index: 4, kind: input, shape index: {}]   ;;  %s3888_s5 = inlined_call_operand.vmem [shape: f32[1,128], index: 5, kind: input, shape index: {}]   ;;  %s3889_s6 = inlined_call_operand.vmem [shape: f32[1,128], index: 6, kind: input, shape index: {}]   ;;  %s3890_s7 = inlined_call_operand.vmem [shape: f32[1,128], index: 7, kind: input, shape index: {}]   ;;  %s3891_s8 = inlined_call_operand.vmem [shape: f32[128,64], index: 8, kind: input, shape index: {}]   ;;  %s3892_s9 = inlined_call_operand.vmem [shape: f32[1,64], index: 9, kind: input, shape index: {}]   ;;  %s3893_s10 = inlined_call_operand.vmem [shape: f32[8,13,64], index: 10, kind: output, shape index: {}]  }
   0x1 LB: > { %s2927_s14 = sadd.s32 4294967295, %s3333_s13   ;;  %p2931_p0 = scmp.ge.s32.totalorder %s3333_s13, 1  ;;  %s3333_s13 = sphi %s3395_s13, %s20_s13  }
   0x2   : > { %p313_p1 = scmp.lt.s32.totalorder %s3333_s13, 3 }
   0x4   : > { %p314_p2 = pnand %p2931_p0, %p313_p1 }
   0x5   : > { %v369_v0 = vld [vmem:[%s3884_s1] sm:$0xff] (!%p314_p2)  ;;  %v370_v1 = vld [vmem:[%s3884_s1 + $0x8] sm:$0xff] (!%p314_p2)  ;;  %v371_v2 = vld [vmem:[%s3884_s1 + $0x10] sm:$0xff] (!%p314_p2)  ;;  %s2932_s21 = sshll.u32 (!%p314_p2), %s2927_s14, 2  ;;  %vm384_vm0 = vcmask (!%p314_p2), 523264   ;;  %vm587_vm1 = vcmask (!%p314_p2), 105472  }
   0x6   : > { %317 = sbr.rel (%p314_p2) target bundleno = 1675 (0x68b), region = 60  ;;  %v3208_v3 = vpack.c.bf16 (!%p314_p2), %v370_v1, %v369_v0  ;;  %v372_v4 = vld [vmem:[%s3884_s1 + $0x18] sm:$0xff] (!%p314_p2)  ;;  %p353_p3 = scmp.lt.s32.totalorder (!%p314_p2), %s2932_s21, 7  ;;  %v373_v6 = vld [vmem:[%s3884_s1 + $0x20] sm:$0xff] (!%p314_p2)  ;;  %v374_v7 = vld [vmem:[%s3884_s1 + $0x28] sm:$0xff] (!%p314_p2)  ;;  %vm795_vm2 = vcmask (!%p314_p2), 64512  }
   0x7   : > { %v3212_v5 = vpack.c.bf16 (!%p314_p2), %v372_v4, %v371_v2  ;;  %v482_v8 = vld [vmem:[%s3886_s3] sm:$0xff] (!%p314_p2)  ;;  %v483_v9 = vld [vmem:[%s3886_s3 + $0x8] sm:$0xff] (!%p314_p2)  ;;  %v484_v11 = vld [vmem:[%s3886_s3 + $0x10] sm:$0xff] (!%p314_p2)  ;;  %v3216_v13 = vpack.c.bf16 (!%p314_p2), %v374_v7, %v373_v6  ;;  %vm3337_vm3 = vmmov (!%p314_p2), 0   ;;  %vm1950_vm4 = vcmask (!%p314_p2), 1043456  }
   0x8   : > { %3209 = vmatprep.subr.bf16.mxu0 (!%p314_p2), %v3208_v3  ;;  %v3224_v10 = vpack.c.bf16 (!%p314_p2), %v483_v9, %v482_v8  ;;  %v485_v12 = vld [vmem:[%s3886_s3 + $0x18] sm:$0xff] (!%p314_p2)  ;;  %v375_v14 = vld [vmem:[%s3884_s1 + $0x30] sm:$0xff] (!%p314_p2)  ;;  %v486_v18 = vld [vmem:[%s3886_s3 + $0x20] sm:$0xff] (!%p314_p2)  ;;  %vm2861_vm5 = vcmask (!%p314_p2), 520192  }
   0x9   : > { %3211 = vmatpush3.bf16.msra.mxu0 (!%p314_p2), %v3208_v3  ;;  %v376_v15 = vld [vmem:[%s3884_s1 + $0x38] sm:$0xff] (!%p314_p2)  ;;  %v3228_v17 = vpack.c.bf16 (!%p314_p2), %v485_v12, %v484_v11  ;;  %v487_v19 = vld [vmem:[%s3886_s3 + $0x28] sm:$0xff] (!%p314_p2)  ;;  %v488_v25 = vld [vmem:[%s3886_s3 + $0x30] sm:$0xff] (!%p314_p2) }
   0xa   : > { %3213 = vmatprep.subr.bf16.mxu0 (!%p314_p2), %v3212_v5  ;;  %3276 = vmatprep.subr.bf16.mxu1 (!%p314_p2), %v3224_v10  ;;  %v3220_v20 = vpack.c.bf16 (!%p314_p2), %v376_v15, %v375_v14  ;;  %v3232_v21 = vpack.c.bf16 (!%p314_p2), %v487_v19, %v486_v18  ;;  %v489_v26 = vld [vmem:[%s3886_s3 + $0x38] sm:$0xff] (!%p314_p2)  ;;  %v2937_v28 = vld [vmem:[%s3885_s2] ss:$0 sm:$0xff] (!%p314_p2) }
   0xb   : > { %3280 = vmatpush3.bf16.msra.mxu1 (!%p314_p2), %v3224_v10  ;;  %v3236_v27 = vpack.c.bf16 (!%p314_p2), %v489_v26, %v488_v25 }
   0xc   : > { %3277 = vmatprep.subr.bf16.mxu1 (!%p314_p2), %v3228_v17 }
   0xd   : > { %s3895_s21 = smov (!%p353_p3, %s2932_s21), 7  ;;  %3215 = vmatpush3.bf16.msra.mxu0 %v3212_v5 }
   0xe   : > { %s2933_s17 = sshll.u32 %s3895_s21, 3  ;;  %3217 = vmatprep.subr.bf16.mxu0 %v3216_v13  ;;  %s2979_s20 = sshll.u32 %s3895_s21, 4 }
   0xf   : > { %s356_s25 = scalar_lea.vmem %s3883_s0, %s2933_s17  ;;  %3281 = vmatpush3.bf16.msra.mxu1 %v3228_v17  ;;  %s3335_s17 = smov 64  }
  0x10   : > { %v365_v16 = vld [vmem:[%s356_s25] sm:$0xff]  ;;  %3278 = vmatprep.subr.bf16.mxu1 %v3232_v21  ;;  %v366_v22 = vld [vmem:[%s356_s25 + $0x8] sm:$0xff]  ;;  %v367_v23 = vld [vmem:[%s356_s25 + $0x10] sm:$0xff]  ;;  %s3798_s23 = scalar_lea.vmem %s3893_s10, %s2979_s20 }
  0x11   : > { %3070 = vmatprep.mubr.msk.f32.mxu0 %vm384_vm0, %v365_v16  ;;  %3219 = vmatpush3.bf16.msra.mxu0 %v3216_v13  ;;  %v368_v24 = vld [vmem:[%s356_s25 + $0x18] sm:$0xff] }
  0x12   : > { %3221 = vmatprep.subr.bf16.mxu0 %v3220_v20 }
  0x13   : > { %3282 = vmatpush3.bf16.msra.mxu1 %v3232_v21 }
  0x14   : > { %3279 = vmatprep.subr.bf16.mxu1 %v3236_v27 }
  0x15   : > { %3223 = vmatpush3.bf16.msra.mxu0 %v3220_v20 }
  0x16   : > { %3225 = vmatprep.subr.bf16.mxu0 %v3224_v10 }
  0x17   : > { %3283 = vmatpush3.bf16.msra.mxu1 %v3236_v27 }
  0x18   : > { %3071 = vmatmul.mubr.msk.f32.vlgmr.msra.gmra.mrb[0].mxu0 %vm384_vm0, %v366_v22 }
  0x19   : > { %3073 = vmatprep.mubr.msk.f32.mxu0 %vm384_vm0, %v367_v23  ;;  %3227 = vmatpush3.bf16.msra.mxu0 %v3224_v10 }
  0x1a   : > { %3229 = vmatprep.subr.bf16.mxu0 %v3228_v17 }
  0x1c   : > { %3074 = vmatmul.mubr.msk.f32.gmra.mrb[2].mxu0 %vm384_vm0, %v368_v24 }
  0x1d   : > { %3231 = vmatpush3.bf16.msra.mxu0 %v3228_v17 }
  0x1e   : > { %3233 = vmatprep.subr.bf16.mxu0 %v3232_v21 }
  0x21   : > { %3235 = vmatpush3.bf16.msra.mxu0 %v3232_v21 }
  0x22   : > { %3237 = vmatprep.subr.bf16.mxu0 %v3236_v27 }
  0x25   : > { %3239 = vmatpush3.bf16.msra.mxu0 %v3236_v27 }
  0xeb   : > { %v3072_v29 = vpop.f32.mrb[0].mxu0 }
  0xec   : > { %v469_v30 = vadd.f32 %v3072_v29, %v2937_v28  ;;  %v463_v31 = vpop.f32.mrb[1].mxu0 }
  0xed   : > { %v464_v32 = vadd.f32 %v2937_v28, %v463_v31 }
  0xee   : > { %877 = vrot.lane.b32.xlu0 %v469_v30, %s3335_s17 }
  0xef   : > { %v3075_v33 = vpop.f32.mrb[2].mxu0  ;;  %3092 = vmatprep.mubr.msk.f32.mxu0 %vm384_vm0, %v464_v32 }
  0xf0   : > { %v479_v34 = vadd.f32 %v3075_v33, %v2937_v28  ;;  %v473_v35 = vpop.f32.mrb[3].mxu0  ;;  %3093 = vmatmul.mubr.msk.f32.vlgmr.msra.gmra.mrb[4].mxu0 %vm384_vm0, %v469_v30 }
  0xf1   : > { %v474_v36 = vadd.f32 %v2937_v28, %v473_v35 }
  0xf2   : > { %792 = vrot.lane.b32.xlu0 %v464_v32, %s3335_s17  ;;  %1045 = vrot.lane.b32.xlu1 %v479_v34, %s3335_s17 }
  0xf3   : > { %3095 = vmatprep.mubr.msk.f32.mxu1 %vm384_vm0, %v474_v36 }
  0xf4   : > { %3096 = vmatmul.mubr.msk.f32.vlgmr.msra.gmra.mrb[0].mxu1 %vm384_vm0, %v479_v34 }
  0xf6   : > { %961 = vrot.lane.b32.xlu1 %v474_v36, %s3335_s17 }
 0x160   : > { %v878_v37 = vpop.permute.xlu0 %877 }
 0x161   : > { %3103 = vmatprep.subr.mxu1 %v878_v37 }
 0x162   : > { %3104 = vmatpush3.msra.mxu1 %v878_v37 }
 0x164   : > { %v793_v38 = vpop.permute.xlu0 %792  ;;  %v3468_v39 = vpop.permute.xlu1 %1045 }
 0x165   : > { %3098 = vmatprep.subr.mxu0 %v793_v38  ;;  %3113 = vmatprep.subr.mxu1 %v3468_v39 }
 0x166   : > { %3099 = vmatpush3.msra.mxu0 %v793_v38 }
 0x168   : > { %v3471_v40 = vpop.permute.xlu1 %961 }
 0x169   : > { %3108 = vmatprep.subr.mxu0 %v3471_v40 }
 0x1c3   : > { %v3094_v41 = vpop.f32.mrb[4].mxu0 }
 0x1c4   : > { %v595_v42 = vsel %vm587_vm1, %v3094_v41, -inf  ;;  %v568_v43 = vpop.f32.mrb[5].mxu0 }
 0x1c5   : > { %v596_v44 = vrot.slane %v595_v42, 4  ;;  %v588_v45 = vsel %vm587_vm1, %v568_v43, -inf }
 0x1c6   : > { %v589_v46 = vrot.slane %v588_v45, 4 }
 0x1c7   : > { %v597_v47 = vmax.f32 %v595_v42, %v596_v44  ;;  %v3097_v48 = vpop.f32.mrb[0].mxu1 }
 0x1c8   : > { %v590_v49 = vmax.f32 %v588_v45, %v589_v46  ;;  %v609_v50 = vsel %vm587_vm1, %v3097_v48, -inf  ;;  %v578_v51 = vpop.f32.mrb[1].mxu1 }
 0x1c9   : > { %v598_v52 = vrot.slane %v597_v47, 2  ;;  %v610_v53 = vrot.slane %v609_v50, 4  ;;  %v602_v54 = vsel %vm587_vm1, %v578_v51, -inf }
 0x1ca   : > { %v591_v55 = vrot.slane %v590_v49, 2  ;;  %v603_v56 = vrot.slane %v602_v54, 4 }
 0x1cb   : > { %v599_v57 = vmax.f32 %v597_v47, %v598_v52  ;;  %v611_v58 = vmax.f32 %v609_v50, %v610_v53 }
 0x1cc   : > { %v592_v59 = vmax.f32 %v590_v49, %v591_v55  ;;  %v604_v60 = vmax.f32 %v602_v54, %v603_v56 }
 0x1cd   : > { %v600_v61 = vrot.slane %v599_v57, 1  ;;  %v612_v62 = vrot.slane %v611_v58, 2 }
 0x1ce   : > { %v593_v63 = vrot.slane %v592_v59, 1  ;;  %v605_v0 = vrot.slane %v604_v60, 2 }
 0x1cf   : > { %v601_v1 = vmax.f32 %v599_v57, %v600_v61  ;;  %v613_v2 = vmax.f32 %v611_v58, %v612_v62 }
 0x1d0   : > { %v594_v3 = vmax.f32 %v592_v59, %v593_v63  ;;  %v606_v4 = vmax.f32 %v604_v60, %v605_v0 }
 0x1d1   : > { %v617_v5 = vsub.f32 %v3094_v41, %v601_v1  ;;  %v614_v6 = vrot.slane %v613_v2, 1 }
 0x1d2   : > { %v616_v7 = vsub.f32 %v568_v43, %v594_v3  ;;  %v607_v8 = vrot.slane %v606_v4, 1 }
 0x1d3   : > { %v622_v9 = vmul.f32 1.442695, %v617_v5  ;;  %v615_v10 = vmax.f32 %v613_v2, %v614_v6  ;;  %v1491_v5 = vld [vmem:[%s3887_s4 + $0x10] sm:$0xff]  ;;  %v1492_v6 = vld [vmem:[%s3887_s4 + $0x18] sm:$0xff] }
 0x1d4   : > { %v620_v11 = vmul.f32 1.442695, %v616_v7  ;;  %v608_v12 = vmax.f32 %v606_v4, %v607_v8  ;;  %v3336_v4 = vmov 0.0|0.0   ;;  %v3244_v7 = vpack.c.bf16 %v1492_v6, %v1491_v5  ;;  %v1493_v8 = vld [vmem:[%s3887_s4 + $0x20] sm:$0xff] }
 0x1d5   : > { %3297 = vpow2.f32 %v622_v9  ;;  %v619_v13 = vsub.f32 %v3097_v48, %v615_v10  ;;  %v1494_v9 = vld [vmem:[%s3887_s4 + $0x28] sm:$0xff] }
 0x1d6   : > { %3299 = vpow2.f32 %v620_v11  ;;  %v618_v14 = vsub.f32 %v578_v51, %v608_v12  ;;  %v3247_v10 = vpack.c.bf16 %v1494_v9, %v1493_v8  ;;  %v1495_v11 = vld [vmem:[%s3887_s4 + $0x30] sm:$0xff]  ;;  %v1496_v12 = vld [vmem:[%s3887_s4 + $0x38] sm:$0xff] }
 0x1d7   : > { %v626_v15 = vmul.f32 1.442695, %v619_v13  ;;  %v3250_v13 = vpack.c.bf16 %v1496_v12, %v1495_v11 }
 0x1d8   : > { %v624_v16 = vmul.f32 1.442695, %v618_v14  ;;  %v3338_v14 = vmov 0.0  }
 0x1d9   : > { %3301 = vpow2.f32 %v626_v15  ;;  %v3339_v15 = vmov 1966171168  }
 0x1da   : > { %3303 = vpow2.f32 %v624_v16  ;;  %v1139_v16 = vunpack.c.l.s4 %v3339_v15 }
 0x1df   : > { %v3298_v17 = vpop.eup %3297 }
 0x1e0   : > { %v3300_v18 = vpop.eup %3299  ;;  %v635_v19 = vsel %vm587_vm1, %v3298_v17, 0.0 }
 0x1e1   : > { %v636_v20 = vrot.slane %v635_v19, 4  ;;  %v628_v21 = vsel %vm587_vm1, %v3300_v18, 0.0 }
 0x1e2   : > { %v629_v22 = vrot.slane %v628_v21, 4 }
 0x1e3   : > { %v3302_v23 = vpop.eup %3301  ;;  %v637_v24 = vadd.f32 %v636_v20, %v635_v19 }
 0x1e4   : > { %v3304_v25 = vpop.eup %3303  ;;  %v630_v26 = vadd.f32 %v629_v22, %v628_v21  ;;  %v649_v27 = vsel %vm587_vm1, %v3302_v23, 0.0 }
 0x1e5   : > { %v638_v28 = vrot.slane %v637_v24, 2  ;;  %v650_v29 = vrot.slane %v649_v27, 4  ;;  %v642_v30 = vsel %vm587_vm1, %v3304_v25, 0.0 }
 0x1e6   : > { %v631_v31 = vrot.slane %v630_v26, 2  ;;  %v643_v32 = vrot.slane %v642_v30, 4 }
 0x1e7   : > { %v651_v33 = vadd.f32 %v650_v29, %v649_v27  ;;  %v639_v34 = vadd.f32 %v638_v28, %v637_v24 }
 0x1e8   : > { %v644_v35 = vadd.f32 %v643_v32, %v642_v30  ;;  %v632_v36 = vadd.f32 %v631_v31, %v630_v26 }
 0x1e9   : > { %v652_v37 = vrot.slane %v651_v33, 2  ;;  %v640_v38 = vrot.slane %v639_v34, 1 }
 0x1ea   : > { %v645_v41 = vrot.slane %v644_v35, 2  ;;  %v633_v42 = vrot.slane %v632_v36, 1 }
 0x1eb   : > { %v641_v43 = vadd.f32 %v640_v38, %v639_v34  ;;  %v653_v44 = vadd.f32 %v652_v37, %v651_v33 }
 0x1ec   : > { %v634_v45 = vadd.f32 %v633_v42, %v632_v36  ;;  %v646_v46 = vadd.f32 %v645_v41, %v644_v35 }
 0x1ed   : > { %3305 = vrcp.f32 %v641_v43  ;;  %v654_v48 = vrot.slane %v653_v44, 1 }
 0x1ee   : > { %3307 = vrcp.f32 %v634_v45  ;;  %v647_v47 = vrot.slane %v646_v46, 1 }
 0x1ef   : > { %v655_v50 = vadd.f32 %v654_v48, %v653_v44 }
 0x1f0   : > { %v648_v49 = vadd.f32 %v647_v47, %v646_v46 }
 0x1f2   : > { %3309 = vrcp.f32 %v648_v49 }
 0x1f3   : > { %3311 = vrcp.f32 %v655_v50 }
 0x1f7   : > { %v3306_v51 = vpop.eup %3305 }
 0x1f8   : > { %v3308_v52 = vpop.eup %3307  ;;  %v661_v53 = vmul.f32 %v3306_v51, %v3298_v17  ;;  %v1141_v17 = vlaneseq }
 0x1f9   : > { %v660_v54 = vmul.f32 %v3308_v52, %v3300_v18  ;;  %v1140_v18 = vunpack.c.0.s8 %v1139_v16 }
 0x1fa   : > { %696 = vxpose.xlu1.b32.start.end [1/1] (short) (narrow) %v661_v53, 16  ;;  %v1142_v19 = vshrl.u32 %v1141_v17, 7 }
 0x1fb   : > { %664 = vxpose.xlu0.b32.start.end [1/1] (short) (narrow) %v660_v54, 16 }
 0x1fc   : > { %v3310_v55 = vpop.eup %3309  ;;  %v3525_v20 = vsub.s32 %v1140_v18, %v1142_v19 }
 0x1fd   : > { %v662_v56 = vmul.f32 %v3310_v55, %v3304_v25  ;;  %v3312_v57 = vpop.eup %3311 }
 0x1fe   : > { %v663_v58 = vmul.f32 %v3312_v57, %v3302_v23 }
 0x200   : > { %728 = vxpose.xlu0.b32.start.end [1/1] (short) (narrow) %v662_v56, 16 }
 0x205   : > { %760 = vxpose.xlu0.b32.start.end [1/1] (short) (narrow) %v663_v58, 16 }
 0x27a   : > { %v712_v59 = vpop.trf.xlu1 }
 0x27b   : > { %v680_v60 = vpop.trf.xlu0  ;;  %3105 = vmatprep.mubr.msk.f32.mxu1 %vm795_vm2, %v712_v59 }
 0x27c   : > { %3100 = vmatprep.mubr.msk.f32.mxu0 %vm795_vm2, %v680_v60 }
 0x27e   : > { %v713_v61 = vpop.trf.xlu1 }
 0x27f   : > { %3106 = vmatmul.mubr.msk.f32.vlgmr.msra.gmra.mrb[2].mxu1 %vm795_vm2, %v713_v61  ;;  %v681_v62 = vpop.trf.xlu0 }
 0x280   : > { %3114 = vmatpush3.msra.mxu1 %v3468_v39  ;;  %3101 = vmatmul.mubr.msk.f32.vlgmr.msra.gmra.mrb[6].mxu0 %vm795_vm2, %v681_v62  ;;  %v1489_v39 = vld [vmem:[%s3887_s4] sm:$0xff] }
 0x281   : > { %3109 = vmatpush3.msra.mxu0 %v3471_v40  ;;  %v1490_v40 = vld [vmem:[%s3887_s4 + $0x8] sm:$0xff]  ;;  %3252 = vmatprep.subr.bf16.mxu1 %v3336_v4 }
 0x282   : > { %v3241_v3 = vpack.c.bf16 %v1490_v40, %v1489_v39  ;;  %3240 = vmatprep.subr.bf16.mxu0 %v3336_v4 }
 0x283   : > { %v744_v63 = vpop.trf.xlu0 }
 0x284   : > { %3110 = vmatprep.mubr.msk.f32.mxu0 %vm795_vm2, %v744_v63 }
 0x287   : > { %v745_v0 = vpop.trf.xlu0 }
 0x288   : > { %3111 = vmatmul.mubr.msk.f32.vlgmr.msra.gmra.mrb[8].mxu0 %vm795_vm2, %v745_v0 }
 0x289   : > { %3242 = vmatpush3.bf16.msra.mxu0 %v3241_v3  ;;  %3134 = vmatprep.mubr.msk.f32.mxu0 %vm3337_vm3, %v3338_v14 }
 0x28a   : > { %3243 = vmatprep.subr.bf16.mxu0 %v3336_v4 }
 0x28b   : > { %v776_v1 = vpop.trf.xlu0 }
 0x28c   : > { %3115 = vmatprep.mubr.msk.f32.mxu1 %vm795_vm2, %v776_v1 }
 0x28d   : > { %3245 = vmatpush3.bf16.msra.mxu0 %v3244_v7 }
 0x28e   : > { %3246 = vmatprep.subr.bf16.mxu0 %v3336_v4 }
 0x28f   : > { %v777_v2 = vpop.trf.xlu0 }
 0x290   : > { %3116 = vmatmul.mubr.msk.f32.vlgmr.msra.gmra.mrb[4].mxu1 %vm795_vm2, %v777_v2 }
 0x291   : > { %3248 = vmatpush3.bf16.msra.mxu0 %v3247_v10  ;;  %3187 = vmatprep.mubr.msk.f32.mxu1 %vm3337_vm3, %v3338_v14 }
 0x292   : > { %3249 = vmatprep.subr.bf16.mxu0 %v3336_v4 }
 0x295   : > { %3251 = vmatpush3.bf16.msra.mxu0 %v3250_v13 }
 0x352   : > { %v3107_v21 = vpop.f32.mrb[2].mxu1 }
 0x353   : > { %v1274_v22 = vcombine.high %v3107_v21, %v3107_v21  ;;  %v1281_v23 = vrot.slane %v3107_v21, %v3525_v20  ;;  %v3102_v24 = vpop.f32.mrb[6].mxu0  ;;  %v952_v25 = vpop.f32.mrb[3].mxu1 }
 0x354   : > { %v1186_v26 = vcombine.high %v3102_v24, %v3102_v24  ;;  %v1193_v27 = vrot.slane %v3102_v24, %v3525_v20  ;;  %v1225_v28 = vcombine.high %v952_v25, %v952_v25  ;;  %v1232_v29 = vrot.slane %v952_v25, %v3525_v20  ;;  %v868_v30 = vpop.f32.mrb[7].mxu0 }
 0x355   : > { %v1288_v31 = vrot.slane %v1274_v22, %v3525_v20  ;;  %v1289_v32 = vcombine.high %v1281_v23, %v1281_v23  ;;  %v1296_v33 = vrot.slane %v1281_v23, %v3525_v20  ;;  %v1137_v55 = vcombine.high %v868_v30, %v868_v30 }
 0x356   : > { %v1200_v34 = vrot.slane %v1186_v26, %v3525_v20  ;;  %v1201_v35 = vcombine.high %v1193_v27, %v1193_v27  ;;  %v1239_v36 = vrot.slane %v1225_v28, %v3525_v20  ;;  %v1240_v42 = vcombine.high %v1232_v29, %v1232_v29 }
 0x357   : > { %v1303_v37 = vrot.slane %v1288_v31, %v3525_v20  ;;  %v1310_v38 = vrot.slane %v1289_v32, %v3525_v20  ;;  %v1311_v41 = vcombine.high %v1296_v33, %v1296_v33  ;;  %v1248_v46 = vrot.slane %v1232_v29, %v3525_v20 }
 0x358   : > { %v1215_v43 = vrot.slane %v1200_v34, %v3525_v20  ;;  %v1222_v44 = vrot.slane %v1201_v35, %v3525_v20  ;;  %v1241_v45 = vcombine.high %v1239_v36, %v1239_v36  ;;  %v1208_v48 = vrot.slane %v1193_v27, %v3525_v20 }
 0x359   : > { %v1312_v47 = vcombine.high %v1310_v38, %v1310_v38  ;;  %v1262_v49 = vrot.slane %v1240_v42, %v3525_v20  ;;  %v3541_v50 = vcombine.low %v1310_v38, %v1311_v41  ;;  %v1270_v52 = vcombine.high %v1248_v46, %v1248_v46 }
 0x35a   : > { %v1269_v51 = vrot.slane %v1241_v45, %v3525_v20  ;;  %v1553_v53 = vcombine.low %v1208_v48, %v1222_v44  ;;  %v1255_v54 = vrot.slane %v1239_v36, %v3525_v20  ;;  %v2957_v58 = vcombine.high %v1208_v48, %v1222_v44 }
 0x35b   : > { %v3112_v56 = vpop.f32.mrb[8].mxu0  ;;  %v3545_v57 = vcombine.low %v1312_v47, %v1303_v37  ;;  %v1555_v60 = vcombine.low %v1215_v43, %v1248_v46  ;;  %v1272_v62 = vcombine.high %v1262_v49, %v1262_v49  ;;  %v1556_v63 = vcombine.low %v1262_v49, %v1270_v52 }
 0x35c   : > { %v1273_v59 = vcombine.high %v1269_v51, %v1269_v51  ;;  %v1036_v61 = vpop.f32.mrb[9].mxu0  ;;  %v1633_v0 = vrot.slane %v3541_v50, %v3525_v20  ;;  %v1144_v39 = vrot.slane %v868_v30, %v3525_v20  ;;  %v1563_v40 = vrot.slane %v1553_v53, %v3525_v20 }
 0x35d   : > { %v1577_v1 = vrot.slane %v1555_v60, %v3525_v20  ;;  %v1271_v3 = vcombine.high %v1255_v54, %v1255_v54  ;;  %v1584_v5 = vrot.slane %v1556_v63, %v3525_v20  ;;  %v1151_v6 = vrot.slane %v1137_v55, %v3525_v20 }
 0x35e   : > { %v3550_v2 = vcombine.low %v1273_v59, %v1296_v33  ;;  %v1661_v7 = vrot.slane %v3545_v57, %v3525_v20  ;;  %v1570_v8 = vrot.slane %v2957_v58, %v3525_v20  ;;  %v1152_v9 = vcombine.high %v1144_v39, %v1144_v39 }
 0x35f   : > { %v1369_v10 = vrot.slane %v3112_v56, %v3525_v20  ;;  %v3560_v11 = vcombine.low %v1577_v1, %v1584_v5  ;;  %v3562_v12 = vcombine.low %v1272_v62, %v1255_v54  ;;  %v1153_v13 = vcombine.high %v1151_v6, %v1151_v6 }
 0x360   : > { %v1313_v15 = vcombine.high %v1036_v61, %v1036_v61  ;;  %v1160_v16 = vrot.slane %v1144_v39, %v3525_v20  ;;  %v1174_v17 = vrot.slane %v1152_v9, %v3525_v20  ;;  %v1362_v18 = vcombine.high %v3112_v56, %v3112_v56 }
 0x361   : > { %v1377_v19 = vcombine.high %v1369_v10, %v1369_v10  ;;  %v1167_v21 = vrot.slane %v1151_v6, %v3525_v20  ;;  %v1181_v22 = vrot.slane %v1153_v13, %v3525_v20  ;;  %v1320_v23 = vrot.slane %v1036_v61, %v3525_v20 }
 0x362   : > { %v1327_v24 = vrot.slane %v1313_v15, %v3525_v20  ;;  %v1504_v26 = vcombine.low %v1160_v16, %v1174_v17  ;;  %v2955_v27 = vcombine.high %v1160_v16, %v1174_v17  ;;  %v1384_v28 = vrot.slane %v1369_v10, %v3525_v20 }
 0x363   : > { %v3117_v25 = vpop.f32.mrb[4].mxu1  ;;  %v1398_v29 = vrot.slane %v1377_v19, %v3525_v20  ;;  %v1506_v31 = vcombine.low %v1167_v21, %v1181_v22  ;;  %v2956_v32 = vcombine.high %v1167_v21, %v1181_v22  ;;  %v1328_v33 = vcombine.high %v1320_v23, %v1320_v23 }
 0x364   : > { %v1120_v30 = vpop.f32.mrb[5].mxu1  ;;  %v1329_v34 = vcombine.high %v1327_v24, %v1327_v24  ;;  %v1585_v35 = vcombine.low %v1563_v40, %v1570_v8  ;;  %v3572_v36 = vcombine.low %v1269_v51, %v1271_v3  ;;  %v1514_v37 = vrot.slane %v1504_v26, %v3525_v20 }
 0x365   : > { %v1521_v38 = vrot.slane %v2955_v27, %v3525_v20  ;;  %v1528_v41 = vrot.slane %v1506_v31, %v3525_v20  ;;  %v1535_v42 = vrot.slane %v2956_v32, %v3525_v20  ;;  %v1336_v43 = vrot.slane %v1320_v23, %v3525_v20 }
 0x366   : > { %v1343_v44 = vrot.slane %v1327_v24, %v3525_v20  ;;  %v1612_v45 = vrot.slane %v3562_v12, %v3525_v20  ;;  %v1376_v46 = vrot.slane %v1362_v18, %v3525_v20  ;;  %v1701_v47 = vcombine.low %v1384_v28, %v1398_v29 }
 0x367   : > { %v1350_v48 = vrot.slane %v1328_v33, %v3525_v20  ;;  %v1536_v49 = vcombine.low %v1514_v37, %v1521_v38  ;;  %v1537_v51 = vcombine.low %v1528_v41, %v1535_v42  ;;  %v2960_v52 = vcombine.high %v1384_v28, %v1398_v29 }
 0x368   : > { %v1357_v53 = vrot.slane %v1329_v34, %v3525_v20  ;;  %v1619_v54 = vrot.slane %v3572_v36, %v3525_v20  ;;  %v1450_v56 = vcombine.high %v3117_v25, %v3117_v25  ;;  %v1401_v57 = vcombine.high %v1120_v30, %v1120_v30 }
 0x369   : > { %v1652_v55 = vcombine.low %v1336_v43, %v1350_v48  ;;  %v1551_v58 = vrot.slane %v1537_v51, %v3525_v20  ;;  %v2958_v59 = vcombine.high %v1336_v43, %v1350_v48  ;;  %v1593_v61 = vrot.slane %v1585_v35, %v3525_v20 }
 0x36a   : > { %v1654_v60 = vcombine.low %v1343_v44, %v1357_v53  ;;  %v1391_v62 = vrot.slane %v1376_v46, %v3525_v20  ;;  %v1717_v63 = vrot.slane %v1701_v47, %v3525_v20  ;;  %v1457_v39 = vrot.slane %v3117_v25, %v3525_v20 }
 0x36b   : > { %v1668_v1 = vrot.slane %v1652_v55, %v3525_v20  ;;  %v1544_v40 = vrot.slane %v1536_v49, %v3525_v20  ;;  %v1724_v3 = vrot.slane %v2960_v52, %v3525_v20  ;;  %v2959_v5 = vcombine.high %v1343_v44, %v1357_v53 }
 0x36c   : > { %v1408_v6 = vrot.slane %v1120_v30, %v3525_v20  ;;  %v1682_v8 = vrot.slane %v1654_v60, %v3525_v20  ;;  %v1464_v10 = vrot.slane %v1450_v56, %v3525_v20  ;;  %v1415_v12 = vrot.slane %v1401_v57, %v3525_v20 }
 0x36d   : > { %v1683_v9 = vcombine.low %v1661_v7, %v1668_v1  ;;  %v1675_v13 = vrot.slane %v2958_v59, %v3525_v20  ;;  %v1552_v17 = vcombine.low %v1544_v40, %v1551_v58  ;;  %v1465_v18 = vcombine.high %v1457_v39, %v1457_v39 }
 0x36e   : > { %v1416_v15 = vcombine.high %v1408_v6, %v1408_v6  ;;  %v1424_v16 = vrot.slane %v1408_v6, %v3525_v20  ;;  %v1472_v19 = vrot.slane %v1457_v39, %v3525_v20  ;;  %v1417_v21 = vcombine.high %v1415_v12, %v1415_v12 }
 0x36f   : > { %v1431_v22 = vrot.slane %v1415_v12, %v3525_v20  ;;  %3135 = vmatmul.mubr.msk.f32.vlgmr.msra.gmra.mrb[10].mxu0 %vm384_vm0, %v1552_v17  ;;  %v1600_v25 = vrot.slane %v3560_v11, %v3525_v20  ;;  %v1684_v26 = vcombine.low %v1675_v13, %v1682_v8  ;;  %v1710_v27 = vrot.slane %v2959_v5, %v3525_v20  ;;  %v2954_v8 = vld [vmem:[%s3888_s5] ss:$0 sm:$0xff] }
 0x370   : > { %v1438_v23 = vrot.slane %v1416_v15, %v3525_v20  ;;  %v1446_v24 = vcombine.high %v1424_v16, %v1424_v16  ;;  %v1703_v7 = vcombine.low %v1391_v62, %v1424_v16  ;;  %v1445_v28 = vrot.slane %v1417_v21, %v3525_v20  ;;  %3137 = vmatprep.mubr.msk.f32.mxu0 %vm3337_vm3, %v3338_v14 }
 0x371   : > { %v1447_v29 = vcombine.high %v1431_v22, %v1431_v22  ;;  %v1601_v33 = vcombine.low %v1593_v61, %v1600_v25  ;;  %v1486_v34 = vrot.slane %v1465_v18, %v3525_v20  ;;  %v1626_v11 = vrot.slane %v3550_v2, %v3525_v20 }
 0x372   : > { %v1448_v30 = vcombine.high %v1438_v23, %v1438_v23  ;;  %v1731_v31 = vrot.slane %v1703_v7, %v3525_v20  ;;  %v1749_v32 = vcombine.low %v1438_v23, %v1446_v24  ;;  %v1449_v35 = vcombine.high %v1445_v28, %v1445_v28 }
 0x373   : > { %v1751_v36 = vcombine.low %v1445_v28, %v1447_v29  ;;  %3138 = vmatmul.mubr.msk.f32.gmra.mrb[12].mxu0 %vm384_vm0, %v1601_v33  ;;  %v1634_v42 = vcombine.low %v1612_v45, %v1619_v54  ;;  %v1635_v46 = vcombine.low %v1626_v11, %v1633_v0  ;;  %v1691_v47 = vrot.slane %v1683_v9, %v3525_v20  ;;  %v2052_v33 = vld [vmem:[%s3891_s8] sm:$0xff]  ;;  %v2055_v11 = vld [vmem:[%s3891_s8 + $0x18] sm:$0xff] }
 0x374   : > { %v1733_v37 = vcombine.low %v1724_v3, %v1731_v31  ;;  %v1750_v38 = vcombine.low %v1448_v30, %v1431_v22  ;;  %v1759_v41 = vrot.slane %v1749_v32, %v3525_v20  ;;  %v1752_v43 = vcombine.low %v1449_v35, %v1472_v19  ;;  %3140 = vmatprep.mubr.msk.f32.mxu0 %vm3337_vm3, %v3338_v14  ;;  %v2054_v35 = vld [vmem:[%s3891_s8 + $0x10] sm:$0xff] }
 0x375   : > { %v1773_v44 = vrot.slane %v1751_v36, %v3525_v20  ;;  %v1642_v48 = vrot.slane %v1634_v42, %v3525_v20  ;;  %v1698_v49 = vrot.slane %v1684_v26, %v3525_v20  ;;  %v1732_v51 = vcombine.low %v1710_v27, %v1717_v63 }
 0x376   : > { %v1766_v2 = vrot.slane %v1750_v38, %v3525_v20  ;;  %v1649_v45 = vrot.slane %v1635_v46, %v3525_v20  ;;  %v1747_v52 = vrot.slane %v1733_v37, %v3525_v20  ;;  %v1780_v53 = vrot.slane %v1752_v43, %v3525_v20 }
 0x377   : > { %v1479_v54 = vrot.slane %v1464_v10, %v3525_v20  ;;  %v1699_v55 = vcombine.low %v1691_v47, %v1698_v49  ;;  %v1740_v50 = vrot.slane %v1732_v51, %v3525_v20  ;;  %v1487_v56 = vcombine.high %v1472_v19, %v1472_v19 }
 0x378   : > { %v1781_v0 = vcombine.low %v1759_v41, %v1766_v2  ;;  %v1488_v57 = vcombine.high %v1486_v34, %v1486_v34  ;;  %v1650_v58 = vcombine.low %v1642_v48, %v1649_v45  ;;  %v1782_v59 = vcombine.low %v1773_v44, %v1780_v53 }
 0x379   : > { %v1748_v60 = vcombine.low %v1740_v50, %v1747_v52  ;;  %v1798_v63 = vcombine.low %v1486_v34, %v1487_v56  ;;  %v2053_v34 = vld [vmem:[%s3891_s8 + $0x8] sm:$0xff]  ;;  %v3256_v37 = vpack.c.bf16 %v2055_v11, %v2054_v35  ;;  %v2968_v35 = vld [vmem:[%s3889_s6] ss:$0 sm:$0xff] }
 0x37a   : > { %3141 = vmatmul.mubr.msk.f32.gmra.mrb[14].mxu0 %vm384_vm0, %v1650_v58  ;;  %v1789_v61 = vrot.slane %v1781_v0, %v3525_v20  ;;  %v1796_v62 = vrot.slane %v1782_v59, %v3525_v20  ;;  %v1799_v1 = vcombine.low %v1488_v57, %v1479_v54  ;;  %v3253_v36 = vpack.c.bf16 %v2053_v34, %v2052_v33 }
 0x37b   : > { %3143 = vmatprep.mubr.msk.f32.mxu0 %vm3337_vm3, %v3338_v14  ;;  %v1806_v40 = vrot.slane %v1798_v63, %v3525_v20 }
 0x37c   : > { %v1797_v39 = vcombine.low %v1789_v61, %v1796_v62  ;;  %v1813_v3 = vrot.slane %v1799_v1, %v3525_v20  ;;  %3254 = vmatpush3.bf16.msra.mxu1 %v3253_v36  ;;  %v2057_v61 = vld [vmem:[%s3891_s8 + $0x28] sm:$0xff] }
 0x37d   : > { %3255 = vmatprep.subr.bf16.mxu1 %v3336_v4 }
 0x37e   : > { %3144 = vmatmul.mubr.msk.f32.gmra.mrb[16].mxu0 %vm384_vm0, %v1699_v55  ;;  %v1814_v5 = vcombine.low %v1806_v40, %v1813_v3  ;;  %v2058_v3 = vld [vmem:[%s3891_s8 + $0x30] sm:$0xff] }
 0x37f   : > { %3146 = vmatprep.mubr.msk.f32.mxu0 %vm3337_vm3, %v3338_v14 }
 0x380   : > { %v1821_v6 = vrot.slane %v1814_v5, %v3525_v20  ;;  %3257 = vmatpush3.bf16.msra.mxu1 %v3256_v37  ;;  %v2059_v5 = vld [vmem:[%s3891_s8 + $0x38] sm:$0xff]  ;;  %v2969_v37 = vld [vmem:[%s3890_s7] ss:$0 sm:$0xff] }
 0x381   : > { %3258 = vmatprep.subr.bf16.mxu1 %v3336_v4 }
 0x382   : > { %3147 = vmatmul.mubr.msk.f32.gmra.mrb[18].mxu0 %vm384_vm0, %v1748_v60  ;;  %v2056_v60 = vld [vmem:[%s3891_s8 + $0x20] sm:$0xff] }
 0x383   : > { %3149 = vmatprep.mubr.msk.f32.mxu0 %vm3337_vm3, %v3338_v14  ;;  %v3259_v63 = vpack.c.bf16 %v2057_v61, %v2056_v60 }
 0x385   : > { %3260 = vmatpush3.bf16.msra.mxu1 %v3259_v63 }
 0x386   : > { %3150 = vmatmul.mubr.msk.f32.gmra.mrb[20].mxu0 %vm384_vm0, %v1797_v39  ;;  %3261 = vmatprep.subr.bf16.mxu1 %v3336_v4 }
 0x387   : > { %3152 = vmatprep.mubr.msk.f32.mxu0 %vm3337_vm3, %v3338_v14 }
 0x38a   : > { %3153 = vmatmul.mubr.msk.f32.gmra.mrb[22].mxu0 %vm384_vm0, %v1821_v6  ;;  %v3262_v6 = vpack.c.bf16 %v2059_v5, %v2058_v3 }
 0x38c   : > { %3263 = vmatpush3.bf16.msra.mxu1 %v3262_v6 }
 0x38d   : > { %3264 = vmatprep.subr.bf16.mxu1 %v3336_v4 }
 0x442   : > { %v1902_v9 = vpop.f32.mrb[10].mxu0 }
 0x443   : > { %v1903_v10 = vadd.f32 %v2954_v8, %v1902_v9  ;;  %v3136_v12 = vpop.f32.mrb[11].mxu0 }
 0x444   : > { %v2060_v12 = vld [vmem:[%s3891_s8 + $0x40] sm:$0xff] }
 0x445   : > { %1938 = vadd.xlane.f32.xlu0 %v1903_v10 }
 0x446   : > { %v1907_v13 = vpop.f32.mrb[12].mxu0 }
 0x447   : > { %v1908_v15 = vadd.f32 %v2954_v8, %v1907_v13  ;;  %v3139_v16 = vpop.f32.mrb[13].mxu0  ;;  %v2061_v13 = vld [vmem:[%s3891_s8 + $0x48] sm:$0xff] }
 0x448   : > { %v2062_v16 = vld [vmem:[%s3891_s8 + $0x50] sm:$0xff] }
 0x449   : > { %1940 = vadd.xlane.f32.xlu1 %v1908_v15 }
 0x44d   : > { %v1912_v17 = vpop.f32.mrb[14].mxu0 }
 0x44e   : > { %v1913_v18 = vadd.f32 %v2954_v8, %v1912_v17  ;;  %v3142_v19 = vpop.f32.mrb[15].mxu0  ;;  %v2063_v17 = vld [vmem:[%s3891_s8 + $0x58] sm:$0xff] }
 0x44f   : > { %v2064_v19 = vld [vmem:[%s3891_s8 + $0x60] sm:$0xff] }
 0x450   : > { %1942 = vadd.xlane.f32.xlu1 %v1913_v18 }
 0x451   : > { %v1917_v21 = vpop.f32.mrb[16].mxu0 }
 0x452   : > { %v1918_v22 = vadd.f32 %v2954_v8, %v1917_v21  ;;  %v3145_v23 = vpop.f32.mrb[17].mxu0  ;;  %v2065_v21 = vld [vmem:[%s3891_s8 + $0x68] sm:$0xff] }
 0x453   : > { %v2066_v23 = vld [vmem:[%s3891_s8 + $0x70] sm:$0xff] }
 0x454   : > { %1944 = vadd.xlane.f32.xlu1 %v1918_v22 }
 0x455   : > { %v1922_v24 = vpop.f32.mrb[18].mxu0 }
 0x456   : > { %v1923_v7 = vadd.f32 %v2954_v8, %v1922_v24  ;;  %v3148_v25 = vpop.f32.mrb[19].mxu0  ;;  %v2067_v24 = vld [vmem:[%s3891_s8 + $0x78] sm:$0xff] }
 0x458   : > { %1946 = vadd.xlane.f32.xlu0 %v1923_v7 }
 0x459   : > { %v1927_v26 = vpop.f32.mrb[20].mxu0 }
 0x45a   : > { %v1928_v27 = vadd.f32 %v2954_v8, %v1927_v26  ;;  %v3151_v28 = vpop.f32.mrb[21].mxu0 }
 0x45c   : > { %1948 = vadd.xlane.f32.xlu1 %v1928_v27 }
 0x45d   : > { %v1932_v29 = vpop.f32.mrb[22].mxu0 }
 0x45e   : > { %v1933_v30 = vadd.f32 %v2954_v8, %v1932_v29  ;;  %v3154_v31 = vpop.f32.mrb[23].mxu0 }
 0x460   : > { %v1951_v32 = vsel %vm1950_vm4, %v1933_v30, 0.0 }
 0x461   : > { %1952 = vadd.xlane.f32.xlu0 %v1951_v32 }
 0x4d2   : > { %v1939_v38 = vpop.xlane.xlu0 %1938 }
 0x4d3   : > { %v1955_v41 = vmul.f32 0.0078125, %v1939_v38 }
 0x4d5   : > { %v3668_v42 = vsub.f32 %v1903_v10, %v1955_v41 }
 0x4d6   : > { %v1941_v43 = vpop.xlane.xlu1 %1940 }
 0x4d7   : > { %v1956_v44 = vmul.f32 0.0078125, %v1941_v43  ;;  %v1969_v46 = vmul.f32 %v3668_v42, %v3668_v42 }
 0x4d9   : > { %v3672_v47 = vsub.f32 %v1908_v15, %v1956_v44  ;;  %1976 = vadd.xlane.f32.xlu1 %v1969_v46  ;;  %v3265_v15 = vpack.c.bf16 %v2061_v13, %v2060_v12 }
 0x4db   : > { %v1970_v2 = vmul.f32 %v3672_v47, %v3672_v47  ;;  %3266 = vmatpush3.bf16.msra.mxu1 %v3265_v15 }
 0x4dc   : > { %3267 = vmatprep.subr.bf16.mxu1 %v3336_v4 }
 0x4dd   : > { %v1943_v48 = vpop.xlane.xlu1 %1942  ;;  %1978 = vadd.xlane.f32.xlu0 %v1970_v2 }
 0x4de   : > { %v1957_v49 = vmul.f32 0.0078125, %v1943_v48 }
 0x4e0   : > { %v3676_v51 = vsub.f32 %v1913_v18, %v1957_v49  ;;  %v3268_v18 = vpack.c.bf16 %v2063_v17, %v2062_v16 }
 0x4e1   : > { %v1945_v45 = vpop.xlane.xlu1 %1944 }
 0x4e2   : > { %v1958_v52 = vmul.f32 0.0078125, %v1945_v45  ;;  %v1971_v53 = vmul.f32 %v3676_v51, %v3676_v51  ;;  %3269 = vmatpush3.bf16.msra.mxu1 %v3268_v18 }
 0x4e3   : > { %3270 = vmatprep.subr.bf16.mxu1 %v3336_v4 }
 0x4e4   : > { %v3680_v54 = vsub.f32 %v1918_v22, %v1958_v52  ;;  %1980 = vadd.xlane.f32.xlu1 %v1971_v53  ;;  %v3271_v22 = vpack.c.bf16 %v2065_v21, %v2064_v19 }
 0x4e5   : > { %v1947_v55 = vpop.xlane.xlu0 %1946 }
 0x4e6   : > { %v1959_v50 = vmul.f32 0.0078125, %v1947_v55  ;;  %v1972_v0 = vmul.f32 %v3680_v54, %v3680_v54  ;;  %3272 = vmatpush3.bf16.msra.mxu1 %v3271_v22 }
 0x4e7   : > { %3273 = vmatprep.subr.bf16.mxu1 %v3336_v4 }
 0x4e8   : > { %v3684_v56 = vsub.f32 %v1923_v7, %v1959_v50  ;;  %1982 = vadd.xlane.f32.xlu0 %v1972_v0  ;;  %v3274_v7 = vpack.c.bf16 %v2067_v24, %v2066_v23  ;;  %v3766_v23 = vld [vmem:[%s3892_s9] ss:$0 sm:$0xff] }
 0x4e9   : > { %v1949_v57 = vpop.xlane.xlu1 %1948 }
 0x4ea   : > { %v1960_v58 = vmul.f32 0.0078125, %v1949_v57  ;;  %v1973_v59 = vmul.f32 %v3684_v56, %v3684_v56  ;;  %3275 = vmatpush3.bf16.msra.mxu1 %v3274_v7 }
 0x4ec   : > { %v3694_v62 = vsub.f32 %v1928_v27, %v1960_v58  ;;  %1984 = vadd.xlane.f32.xlu1 %v1973_v59 }
 0x4ee   : > { %v1953_v1 = vpop.xlane.xlu0 %1952  ;;  %v1974_v39 = vmul.f32 %v3694_v62, %v3694_v62 }
 0x4ef   : > { %v1961_v40 = vmul.f32 0.0078125, %v1953_v1 }
 0x4f0   : > { %1986 = vadd.xlane.f32.xlu0 %v1974_v39 }
 0x4f1   : > { %v3705_v8 = vsub.f32 %v1933_v30, %v1961_v40 }
 0x4f3   : > { %v1975_v9 = vmul.f32 %v3705_v8, %v3705_v8 }
 0x4f5   : > { %v1988_v10 = vsel %vm1950_vm4, %v1975_v9, 0.0 }
 0x4f6   : > { %1989 = vadd.xlane.f32.xlu1 %v1988_v10 }
 0x566   : > { %v1977_v25 = vpop.xlane.xlu1 %1976 }
 0x567   : > { %v1991_v26 = vmul.f32 0.0078125, %v1977_v25 }
 0x569   : > { %v1998_v27 = vadd.f32 1e-05, %v1991_v26 }
 0x56a   : > { %v1979_v28 = vpop.xlane.xlu0 %1978 }
 0x56b   : > { %3313 = vrsqrt.f32 %v1998_v27  ;;  %v1992_v29 = vmul.f32 0.0078125, %v1979_v28 }
 0x56d   : > { %v1999_v30 = vadd.f32 1e-05, %v1992_v29 }
 0x56f   : > { %3315 = vrsqrt.f32 %v1999_v30 }
 0x571   : > { %v1981_v31 = vpop.xlane.xlu1 %1980 }
 0x572   : > { %v1993_v4 = vmul.f32 0.0078125, %v1981_v31 }
 0x574   : > { %v2000_v32 = vadd.f32 1e-05, %v1993_v4 }
 0x575   : > { %v3314_v33 = vpop.eup %3313  ;;  %v1983_v34 = vpop.xlane.xlu0 %1982 }
 0x576   : > { %3317 = vrsqrt.f32 %v2000_v32  ;;  %v1994_v36 = vmul.f32 0.0078125, %v1983_v34  ;;  %v2012_v11 = vmul.f32 %v3314_v33, %v3668_v42 }
 0x578   : > { %v2001_v38 = vadd.f32 1e-05, %v1994_v36  ;;  %v2025_v41 = vmul.f32 %v2968_v35, %v2012_v11 }
 0x579   : > { %v3316_v43 = vpop.eup %3315  ;;  %v1985_v44 = vpop.xlane.xlu1 %1984 }
 0x57a   : > { %3319 = vrsqrt.f32 %v2001_v38  ;;  %v1995_v46 = vmul.f32 0.0078125, %v1985_v44  ;;  %v2038_v2 = vadd.f32 %v2969_v37, %v2025_v41  ;;  %v2013_v48 = vmul.f32 %v3316_v43, %v3672_v47 }
 0x57c   : > { %v2002_v49 = vadd.f32 1e-05, %v1995_v46  ;;  %v2045_v45 = vmax.f32 %v2038_v2, 0.0  ;;  %v2026_v52 = vmul.f32 %v2968_v35, %v2013_v48 }
 0x57d   : > { %v1987_v53 = vpop.xlane.xlu0 %1986 }
 0x57e   : > { %3321 = vrsqrt.f32 %v2002_v49  ;;  %v1996_v55 = vmul.f32 0.0078125, %v1987_v53  ;;  %3188 = vmatmul.mubr.f32.vlgmr.msra.gmra.mrb[6].mxu1 %v2045_v45  ;;  %v2039_v42 = vadd.f32 %v2969_v37, %v2026_v52 }
 0x57f   : > { %3190 = vmatprep.mubr.msk.f32.mxu1 %vm3337_vm3, %v3338_v14 }
 0x580   : > { %v3318_v50 = vpop.eup %3317  ;;  %v2003_v0 = vadd.f32 1e-05, %v1996_v55  ;;  %v2046_v57 = vmax.f32 %v2039_v42, 0.0 }
 0x581   : > { %v2014_v58 = vmul.f32 %v3318_v50, %v3676_v51 }
 0x582   : > { %3323 = vrsqrt.f32 %v2003_v0  ;;  %3191 = vmatmul.mubr.f32.gmra.mrb[8].mxu1 %v2046_v57 }
 0x583   : > { %v1990_v59 = vpop.xlane.xlu1 %1989  ;;  %3193 = vmatprep.mubr.msk.f32.mxu1 %vm3337_vm3, %v3338_v14  ;;  %v2027_v47 = vmul.f32 %v2968_v35, %v2014_v58 }
 0x584   : > { %v3320_v60 = vpop.eup %3319  ;;  %v1997_v61 = vmul.f32 0.0078125, %v1990_v59 }
 0x585   : > { %v2040_v63 = vadd.f32 %v2969_v37, %v2027_v47  ;;  %v2015_v1 = vmul.f32 %v3320_v60, %v3680_v54 }
 0x586   : > { %v2004_v39 = vadd.f32 1e-05, %v1997_v61 }
 0x587   : > { %v2047_v40 = vmax.f32 %v2040_v63, 0.0  ;;  %v2028_v3 = vmul.f32 %v2968_v35, %v2015_v1 }
 0x588   : > { %v3322_v5 = vpop.eup %3321  ;;  %3325 = vrsqrt.f32 %v2004_v39 }
 0x589   : > { %3194 = vmatmul.mubr.f32.gmra.mrb[10].mxu1 %v2047_v40  ;;  %v2041_v6 = vadd.f32 %v2969_v37, %v2028_v3  ;;  %v2016_v51 = vmul.f32 %v3322_v5, %v3684_v56 }
 0x58a   : > { %3196 = vmatprep.mubr.msk.f32.mxu1 %vm3337_vm3, %v3338_v14 }
 0x58b   : > { %v2048_v9 = vmax.f32 %v2041_v6, 0.0  ;;  %v2029_v10 = vmul.f32 %v2968_v35, %v2016_v51 }
 0x58c   : > { %v3324_v12 = vpop.eup %3323 }
 0x58d   : > { %3197 = vmatmul.mubr.f32.gmra.mrb[12].mxu1 %v2048_v9  ;;  %v2042_v13 = vadd.f32 %v2969_v37, %v2029_v10  ;;  %v2017_v15 = vmul.f32 %v3324_v12, %v3694_v62 }
 0x58e   : > { %3199 = vmatprep.mubr.msk.f32.mxu1 %vm3337_vm3, %v3338_v14 }
 0x58f   : > { %v2049_v54 = vmax.f32 %v2042_v13, 0.0  ;;  %v2030_v16 = vmul.f32 %v2968_v35, %v2017_v15 }
 0x591   : > { %3200 = vmatmul.mubr.f32.gmra.mrb[14].mxu1 %v2049_v54  ;;  %v2043_v17 = vadd.f32 %v2969_v37, %v2030_v16 }
 0x592   : > { %v3326_v18 = vpop.eup %3325  ;;  %3202 = vmatprep.mubr.msk.f32.mxu1 %vm3337_vm3, %v3338_v14 }
 0x593   : > { %v2050_v56 = vmax.f32 %v2043_v17, 0.0  ;;  %v2018_v19 = vmul.f32 %v3326_v18, %v3705_v8 }
 0x595   : > { %3203 = vmatmul.mubr.f32.gmra.mrb[16].mxu1 %v2050_v56  ;;  %v2031_v21 = vmul.f32 %v2968_v35, %v2018_v19 }
 0x596   : > { %3205 = vmatprep.mubr.msk.f32.mxu1 %vm3337_vm3, %v3338_v14 }
 0x597   : > { %v2044_v62 = vadd.f32 %v2969_v37, %v2031_v21 }
 0x599   : > { %v2051_v22 = vmax.f32 %v2044_v62, 0.0 }
 0x59b   : > { %3206 = vmatmul.mubr.f32.gmra.mrb[18].mxu1 %v2051_v22 }
 0x651   : > { %v2141_v24 = vpop.f32.mrb[6].mxu1 }
 0x652   : > { %v2142_v7 = vadd.f32 %v3766_v23, %v2141_v24  ;;  %v3189_v25 = vpop.f32.mrb[7].mxu1 }
 0x654   : > { %v2182_v26 = vcombine.high %v2142_v7, %v2142_v7  ;;  %v2189_v8 = vrot.slane %v2142_v7, %v3525_v20 }
 0x655   : > { %v2146_v27 = vpop.f32.mrb[8].mxu1 }
 0x656   : > { %v2196_v28 = vrot.slane %v2182_v26, %v3525_v20  ;;  %v2197_v29 = vcombine.high %v2189_v8, %v2189_v8  ;;  %v2147_v14 = vadd.f32 %v3766_v23, %v2146_v27  ;;  %v3192_v30 = vpop.f32.mrb[9].mxu1  ;;  %v2205_v4 = vrot.slane %v2189_v8, %v3525_v20 }
 0x658   : > { %v2198_v31 = vcombine.high %v2196_v28, %v2196_v28  ;;  %v2219_v32 = vrot.slane %v2197_v29, %v3525_v20  ;;  %v2231_v33 = vcombine.high %v2147_v14, %v2147_v14  ;;  %v2212_v34 = vrot.slane %v2196_v28, %v3525_v20 }
 0x659   : > { %v2238_v35 = vrot.slane %v2147_v14, %v3525_v20 }
 0x65a   : > { %v2226_v36 = vrot.slane %v2198_v31, %v3525_v20  ;;  %v2500_v11 = vcombine.low %v2205_v4, %v2219_v32  ;;  %v2971_v37 = vcombine.high %v2205_v4, %v2219_v32  ;;  %v2245_v38 = vrot.slane %v2231_v33, %v3525_v20 }
 0x65b   : > { %v2246_v41 = vcombine.high %v2238_v35, %v2238_v35  ;;  %v2254_v43 = vrot.slane %v2238_v35, %v3525_v20 }
 0x65c   : > { %v2502_v44 = vcombine.low %v2212_v34, %v2226_v36  ;;  %v2972_v46 = vcombine.high %v2212_v34, %v2226_v36  ;;  %v2510_v2 = vrot.slane %v2500_v11, %v3525_v20  ;;  %v2517_v48 = vrot.slane %v2971_v37, %v3525_v20  ;;  %v2151_v49 = vpop.f32.mrb[10].mxu1 }
 0x65d   : > { %v2247_v45 = vcombine.high %v2245_v38, %v2245_v38  ;;  %v2261_v52 = vrot.slane %v2245_v38, %v3525_v20  ;;  %v2268_v53 = vrot.slane %v2246_v41, %v3525_v20  ;;  %v2152_v55 = vadd.f32 %v3766_v23, %v2151_v49  ;;  %v3195_v42 = vpop.f32.mrb[11].mxu1 }
 0x65e   : > { %v2524_v50 = vrot.slane %v2502_v44, %v3525_v20  ;;  %v2531_v0 = vrot.slane %v2972_v46, %v3525_v20  ;;  %v2532_v57 = vcombine.low %v2510_v2, %v2517_v48 }
 0x65f   : > { %v2275_v58 = vrot.slane %v2247_v45, %v3525_v20  ;;  %v2277_v59 = vcombine.high %v2261_v52, %v2261_v52  ;;  %v2549_v47 = vcombine.low %v2254_v43, %v2268_v53  ;;  %v2973_v60 = vcombine.high %v2254_v43, %v2268_v53 }
 0x660   : > { %v2533_v61 = vcombine.low %v2524_v50, %v2531_v0  ;;  %v2571_v63 = vrot.slane %v2261_v52, %v3525_v20  ;;  %v2280_v1 = vcombine.high %v2152_v55, %v2152_v55  ;;  %v2156_v39 = vpop.f32.mrb[12].mxu1  ;;  %v2540_v40 = vrot.slane %v2532_v57, %v3525_v20 }
 0x661   : > { %v2557_v3 = vrot.slane %v2549_v47, %v3525_v20  ;;  %v2564_v5 = vrot.slane %v2973_v60, %v3525_v20  ;;  %v2588_v6 = vcombine.low %v2275_v58, %v2277_v59  ;;  %v3198_v51 = vpop.f32.mrb[13].mxu1  ;;  %v2279_v10 = vcombine.high %v2275_v58, %v2275_v58 }
 0x662   : > { %v2547_v9 = vrot.slane %v2533_v61, %v3525_v20  ;;  %v2287_v12 = vrot.slane %v2152_v55, %v3525_v20  ;;  %v2294_v13 = vrot.slane %v2280_v1, %v3525_v20  ;;  %v2586_v54 = vrot.slane %v2571_v63, %v3525_v20 }
 0x663   : > { %v2572_v15 = vcombine.low %v2557_v3, %v2564_v5  ;;  %v2598_v16 = vrot.slane %v2588_v6, %v3525_v20  ;;  %v2157_v17 = vadd.f32 %v3766_v23, %v2156_v39 }
 0x664   : > { %v2548_v18 = vcombine.low %v2540_v40, %v2547_v9  ;;  %v2295_v56 = vcombine.high %v2287_v12, %v2287_v12  ;;  %v2296_v19 = vcombine.high %v2294_v13, %v2294_v13  ;;  %v2303_v21 = vrot.slane %v2287_v12, %v3525_v20  ;;  %v2161_v62 = vpop.f32.mrb[14].mxu1 }
 0x665   : > { %v2579_v22 = vrot.slane %v2572_v15, %v3525_v20  ;;  %v2310_v24 = vrot.slane %v2294_v13, %v3525_v20  ;;  %v2329_v7 = vcombine.high %v2157_v17, %v2157_v17  ;;  %v2336_v25 = vrot.slane %v2157_v17, %v3525_v20  ;;  %v3201_v26 = vpop.f32.mrb[15].mxu1 }
 0x666   : > { %2860 = vst.msk [vmem:[%s3798_s23] sm:$0xff] %vm384_vm0, %v2548_v18  ;;  %v2317_v8 = vrot.slane %v2295_v56, %v3525_v20  ;;  %v2324_v27 = vrot.slane %v2296_v19, %v3525_v20  ;;  %v2325_v28 = vcombine.high %v2303_v21, %v2303_v21  ;;  %v2589_v29 = vcombine.low %v2279_v10, %v2303_v21 }
 0x667   : > { %v2587_v14 = vcombine.low %v2579_v22, %v2586_v54  ;;  %v2326_v30 = vcombine.high %v2310_v24, %v2310_v24  ;;  %v2343_v31 = vrot.slane %v2329_v7, %v3525_v20  ;;  %v2344_v4 = vcombine.high %v2336_v25, %v2336_v25 }
 0x668   : > { %v2327_v32 = vcombine.high %v2317_v8, %v2317_v8  ;;  %v2590_v33 = vcombine.low %v2317_v8, %v2325_v28  ;;  %v2605_v34 = vrot.slane %v2589_v29, %v3525_v20  ;;  %v2328_v35 = vcombine.high %v2324_v27, %v2324_v27  ;;  %v2166_v36 = vpop.f32.mrb[16].mxu1 }
 0x669   : > { %2862 = vst.msk [vmem:[%s3798_s23 + $0x8] sm:$0x1f] %vm2861_vm5, %v2587_v14  ;;  %v2637_v11 = vcombine.low %v2324_v27, %v2326_v30  ;;  %v2345_v37 = vcombine.high %v2343_v31, %v2343_v31  ;;  %v2352_v38 = vrot.slane %v2336_v25, %v3525_v20  ;;  %v3204_v41 = vpop.f32.mrb[17].mxu1  ;;  %v2359_v46 = vrot.slane %v2343_v31, %v3525_v20 }
 0x66a   : > { %v2591_v43 = vcombine.low %v2327_v32, %v2310_v24  ;;  %v2620_v44 = vcombine.low %v2598_v16, %v2605_v34  ;;  %v2366_v2 = vrot.slane %v2344_v4, %v3525_v20  ;;  %v2612_v48 = vrot.slane %v2590_v33, %v3525_v20 }
 0x66b   : > { %v2373_v49 = vrot.slane %v2345_v37, %v3525_v20  ;;  %v2638_v45 = vcombine.low %v2328_v35, %v2352_v38  ;;  %v2162_v52 = vadd.f32 %v3766_v23, %v2161_v62  ;;  %v2645_v55 = vrot.slane %v2637_v11, %v3525_v20 }
 0x66c   : > { %v2619_v53 = vrot.slane %v2591_v43, %v3525_v20  ;;  %v2659_v42 = vrot.slane %v2366_v2, %v3525_v20  ;;  %v2974_v50 = vcombine.high %v2352_v38, %v2366_v2  ;;  %v2628_v0 = vrot.slane %v2620_v44, %v3525_v20 }
 0x66d   : > { %v2652_v57 = vrot.slane %v2638_v45, %v3525_v20  ;;  %v2677_v58 = vcombine.low %v2359_v46, %v2373_v49  ;;  %v2378_v59 = vcombine.high %v2162_v52, %v2162_v52  ;;  %v2975_v61 = vcombine.high %v2359_v46, %v2373_v49 }
 0x66e   : > { %v2621_v47 = vcombine.low %v2612_v48, %v2619_v53  ;;  %v2674_v60 = vrot.slane %v2659_v42, %v3525_v20  ;;  %v2385_v63 = vrot.slane %v2162_v52, %v3525_v20  ;;  %v2171_v1 = vpop.f32.mrb[18].mxu1  ;;  %v2686_v40 = vrot.slane %v2974_v50, %v3525_v20 }
 0x66f   : > { %v2660_v39 = vcombine.low %v2645_v55, %v2652_v57  ;;  %v2693_v3 = vrot.slane %v2677_v58, %v3525_v20  ;;  %v2392_v5 = vrot.slane %v2378_v59, %v3525_v20  ;;  %v3207_v6 = vpop.f32.mrb[19].mxu1  ;;  %v2167_v12 = vadd.f32 %v3766_v23, %v2166_v36 }
 0x670   : > { %v2635_v51 = vrot.slane %v2621_v47, %v3525_v20  ;;  %v2393_v9 = vcombine.high %v2385_v63, %v2385_v63  ;;  %v2401_v10 = vrot.slane %v2385_v63, %v3525_v20  ;;  %v2700_v62 = vrot.slane %v2975_v61, %v3525_v20 }
 0x671   : > { %v2667_v13 = vrot.slane %v2660_v39, %v3525_v20  ;;  %v2708_v15 = vcombine.low %v2686_v40, %v2693_v3  ;;  %v2394_v54 = vcombine.high %v2392_v5, %v2392_v5  ;;  %v2408_v16 = vrot.slane %v2392_v5, %v3525_v20 }
 0x672   : > { %v2636_v17 = vcombine.low %v2628_v0, %v2635_v51  ;;  %v2415_v18 = vrot.slane %v2393_v9, %v3525_v20  ;;  %v2427_v56 = vcombine.high %v2167_v12, %v2167_v12  ;;  %v2434_v19 = vrot.slane %v2167_v12, %v3525_v20 }
 0x673   : > { %v2675_v21 = vcombine.low %v2667_v13, %v2674_v60  ;;  %v2422_v22 = vrot.slane %v2394_v54, %v3525_v20  ;;  %v2424_v24 = vcombine.high %v2408_v16, %v2408_v16  ;;  %v2716_v27 = vrot.slane %v2708_v15, %v3525_v20 }
 0x674   : > { %2863 = vst.msk [vmem:[%s3798_s23 + $0x10] sm:$0xff] %vm384_vm0, %v2636_v17  ;;  %v2679_v7 = vcombine.low %v2401_v10, %v2415_v18  ;;  %v2976_v25 = vcombine.high %v2401_v10, %v2415_v18  ;;  %v2441_v26 = vrot.slane %v2427_v56, %v3525_v20  ;;  %v2442_v8 = vcombine.high %v2434_v19, %v2434_v19 }
 0x675   : > { %2864 = vst.msk [vmem:[%s3798_s23 + $0x18] sm:$0x1f] %vm2861_vm5, %v2675_v21  ;;  %v2726_v28 = vcombine.low %v2408_v16, %v2422_v22  ;;  %v2426_v29 = vcombine.high %v2422_v22, %v2422_v22  ;;  %v2450_v14 = vrot.slane %v2434_v19, %v3525_v20  ;;  %v2747_v31 = vrot.slane %v2424_v24, %v3525_v20 }
 0x676   : > { %v2707_v30 = vrot.slane %v2679_v7, %v3525_v20  ;;  %v2443_v4 = vcombine.high %v2441_v26, %v2441_v26  ;;  %v2457_v32 = vrot.slane %v2441_v26, %v3525_v20  ;;  %v2733_v33 = vrot.slane %v2976_v25, %v3525_v20 }
 0x677   : > { %v2740_v34 = vrot.slane %v2726_v28, %v3525_v20  ;;  %v2464_v35 = vrot.slane %v2442_v8, %v3525_v20  ;;  %v2472_v36 = vcombine.high %v2450_v14, %v2450_v14  ;;  %v2764_v41 = vcombine.low %v2426_v29, %v2450_v14 }
 0x678   : > { %v2709_v11 = vcombine.low %v2700_v62, %v2707_v30  ;;  %v2471_v37 = vrot.slane %v2443_v4, %v3525_v20  ;;  %v2473_v38 = vcombine.high %v2457_v32, %v2457_v32  ;;  %v2172_v2 = vadd.f32 %v3766_v23, %v2171_v1 }
 0x679   : > { %v2748_v43 = vcombine.low %v2733_v33, %v2740_v34  ;;  %v2474_v44 = vcombine.high %v2464_v35, %v2464_v35  ;;  %v2765_v46 = vcombine.low %v2464_v35, %v2472_v36  ;;  %v2762_v49 = vrot.slane %v2747_v31, %v3525_v20 }
 0x67a   : > { %v2723_v48 = vrot.slane %v2709_v11, %v3525_v20  ;;  %v2767_v45 = vcombine.low %v2471_v37, %v2473_v38  ;;  %v2774_v52 = vrot.slane %v2764_v41, %v3525_v20  ;;  %v2482_v50 = vrot.slane %v2172_v2, %v3525_v20 }
 0x67b   : > { %v2755_v53 = vrot.slane %v2748_v43, %v3525_v20  ;;  %v2766_v55 = vcombine.low %v2474_v44, %v2457_v32  ;;  %v2781_v42 = vrot.slane %v2765_v46, %v3525_v20  ;;  %v2475_v23 = vcombine.high %v2471_v37, %v2471_v37 }
 0x67c   : > { %v2724_v0 = vcombine.low %v2716_v27, %v2723_v48  ;;  %v2795_v57 = vrot.slane %v2767_v45, %v3525_v20  ;;  %v2483_v60 = vcombine.high %v2482_v50, %v2482_v50  ;;  %v2490_v61 = vrot.slane %v2482_v50, %v3525_v20 }
 0x67d   : > { %v2763_v58 = vcombine.low %v2755_v53, %v2762_v49  ;;  %v2788_v59 = vrot.slane %v2766_v55, %v3525_v20  ;;  %v2796_v47 = vcombine.low %v2774_v52, %v2781_v42 }
 0x67e   : > { %2865 = vst.msk [vmem:[%s3798_s23 + $0x20] sm:$0xff] %vm384_vm0, %v2724_v0  ;;  %v2497_v1 = vrot.slane %v2483_v60, %v3525_v20  ;;  %v2498_v39 = vcombine.high %v2490_v61, %v2490_v61  ;;  %v2813_v40 = vcombine.low %v2475_v23, %v2490_v61 }
 0x67f   : > { %2866 = vst.msk [vmem:[%s3798_s23 + $0x28] sm:$0x1f] %vm2861_vm5, %v2763_v58  ;;  %v2797_v63 = vcombine.low %v2788_v59, %v2795_v57  ;;  %v2804_v3 = vrot.slane %v2796_v47, %v3525_v20 }
 0x680   : > { %v2499_v6 = vcombine.high %v2497_v1, %v2497_v1  ;;  %v2814_v51 = vcombine.low %v2497_v1, %v2498_v39  ;;  %v2821_v10 = vrot.slane %v2813_v40, %v3525_v20 }
 0x681   : > { %v2811_v5 = vrot.slane %v2797_v63, %v3525_v20 }
 0x682   : > { %v2828_v12 = vrot.slane %v2814_v51, %v3525_v20  ;;  %v2835_v13 = vrot.slane %v2499_v6, %v3525_v20 }
 0x683   : > { %v2812_v9 = vcombine.low %v2804_v3, %v2811_v5 }
 0x684   : > { %v2836_v15 = vcombine.low %v2821_v10, %v2828_v12  ;;  %v2850_v16 = vrot.slane %v2835_v13, %v3525_v20 }
 0x685   : > { %2867 = vst.msk [vmem:[%s3798_s23 + $0x30] sm:$0xff] %vm384_vm0, %v2812_v9 }
 0x686   : > { %v2843_v54 = vrot.slane %v2836_v15, %v3525_v20 }
 0x688   : > { %v2851_v17 = vcombine.low %v2843_v54, %v2850_v16 }
 0x68a   : > { %2868 = vst.msk [vmem:[%s3798_s23 + $0x38] sm:$0x1f] %vm2861_vm5, %v2851_v17 }
 0x68b PF: > { %s20_s13 = sadd.s32 1, %s3333_s13  }
 0x68c   : > { %p17_p4 = scmp.ge.s32.totalorder %s20_s13, 4  }
 0x68e   :  { %19 = sbr.rel (!%p17_p4) target bundleno = 1 (0x1), region = 90 }

// kernel: dg_model_forward.5
= control target key start
LH: loop header
LB: loop body
LE: loop exit
PB: predicated region body
PF: predicated region fallthrough
CT: control target
= control target key end

     0   :  { %s8440_s25 = smov 0   ;;  %s8442_s26 = smov 0   ;;  %s9285_s0 = inlined_call_operand.vmem [shape: f32[8,8,64], index: 0, kind: input, shape index: {}]   ;;  %s9286_s1 = inlined_call_operand.vmem [shape: f32[6,64,192], index: 1, kind: input, shape index: {}]   ;;  %s9287_s2 = inlined_call_operand.vmem [shape: f32[6,1,192], index: 2, kind: input, shape index: {}]   ;;  %s9288_s3 = inlined_call_operand.vmem [shape: f32[6,64,64], index: 3, kind: input, shape index: {}]   ;;  %s9289_s4 = inlined_call_operand.vmem [shape: f32[6,1,64], index: 4, kind: input, shape index: {}]   ;;  %s9290_s5 = inlined_call_operand.vmem [shape: f32[6,1,64], index: 5, kind: input, shape index: {}]   ;;  %s9291_s6 = inlined_call_operand.vmem [shape: f32[6,1,64], index: 6, kind: input, shape index: {}]   ;;  %s9292_s7 = inlined_call_operand.vmem [shape: f32[6,64,256], index: 7, kind: input, shape index: {}]   ;;  %s9293_s8 = inlined_call_operand.vmem [shape: f32[6,1,256], index: 8, kind: input, shape index: {}]   ;;  %s9294_s9 = inlined_call_operand.vmem [shape: f32[6,256,64], index: 9, kind: input, shape index: {}]   ;;  %s9295_s10 = inlined_call_operand.vmem [shape: f32[6,1,64], index: 10, kind: input, shape index: {}]   ;;  %s9296_s11 = inlined_call_operand.vmem [shape: f32[6,1,64], index: 11, kind: input, shape index: {}]   ;;  %s9297_s12 = inlined_call_operand.vmem [shape: f32[6,1,64], index: 12, kind: input, shape index: {}]   ;;  %s9298_s13 = inlined_call_operand.vmem [shape: f32[8,8,64], index: 13, kind: output, shape index: {}]  }
   0x1   :  { %s8444_s27 = smov 0   ;;  %s8446_s28 = smov 0  }
   0x2   :  { %s8448_s29 = smov 0  }
   0x3 LB: > { %s32_s30 = sadd.s32 1, %s8343_s27  ;;  %s35_s14 = sadd.s32 1, %s8347_s28  ;;  %s8351_s29 = sphi %s8448_s29, %s23_s29   ;;  %s8347_s28 = sphi %s8446_s28, %s9302_s28   ;;  %s8343_s27 = sphi %s8444_s27, %s9301_s27   ;;  %s8339_s26 = sphi %s8442_s26, %s9300_s26   ;;  %s8335_s25 = sphi %s8440_s25, %s9299_s25  }
   0x4   : > { %p33_p0 = scmp.ge.s32.totalorder %s32_s30, 6  ;;  %p7261_p1 = scmp.ge.s32.totalorder %s8351_s29, 1 }
   0x5   : > { %p400_p2 = scmp.lt.s32.totalorder %s8351_s29, 13 }
   0x6   : > { %s9304_s30 = smov (%p33_p0, %s32_s30), 0  ;;  %s9306_s14 = smov (!%p33_p0, %s35_s14), %s8347_s28 }
   0x7   : > { %p401_p3 = pnand %p7261_p1, %p400_p2  ;;  %p37_p4 = scmp.ge.s32.totalorder %s9306_s14, 2 }
   0x8   : > { %s7262_s15 = sshll.u32 (!%p401_p3), %s8339_s26, 2  ;;  %p7266_p6 = scmp.ne.s32.totalorder (!%p401_p3), %s8335_s25, 0 }
   0x9   : > { %s9308_s14 = smov (%p37_p4, %s9306_s14), 0  ;;  %404 = sbr.rel (%p401_p3) target bundleno = 7496 (0x1d48), region = 72 }
   0xa   : > { %p445_p5 = scmp.lt.s32.totalorder (!%p401_p3), %s7262_s15, 7 }
  0x10   : > { %s9310_s15 = smov (!%p445_p5, %s7262_s15), 7  ;;  %459 = sbr.rel (%p7266_p6) target bundleno = 23 (0x17), region = 76 }
  0x11   : > { %s7263_s16 = sshll.u32 %s9310_s15, 3  ;;  %vm464_vm0 = vcmask (!%p7266_p6), 523264  }
  0x12   : > { %s448_s19 = scalar_lea.vmem %s9285_s0, %s7263_s16  ;;  %s8478_s22 = scalar_lea.vmem %s9298_s13, %s7263_s16 }
  0x13   : > { %v460_v0 = vld [vmem:[%s448_s19] sm:$0xff] (!%p7266_p6)  ;;  %v461_v1 = vld [vmem:[%s448_s19 + $0x8] sm:$0xff] (!%p7266_p6)  ;;  %v462_v2 = vld [vmem:[%s448_s19 + $0x10] sm:$0xff] (!%p7266_p6) }
  0x14   : > { %465 = vst.msk [vmem:[#allocation2] sm:$0xff] (!%p7266_p6), %vm464_vm0, %v460_v0  ;;  %466 = vst.msk [vmem:[#allocation2 + $0x8] sm:$0xff] (!%p7266_p6), %vm464_vm0, %v461_v1  ;;  %v463_v3 = vld [vmem:[%s448_s19 + $0x18] sm:$0xff] (!%p7266_p6) }
  0x15   : > { %467 = vst.msk [vmem:[#allocation2 + $0x10] sm:$0xff] (!%p7266_p6), %vm464_vm0, %v462_v2  ;;  %468 = vst.msk [vmem:[#allocation2 + $0x18] sm:$0xff] (!%p7266_p6), %vm464_vm0, %v463_v3 }
  0x17 PF: > { %s7418_s23 = sshll.u32 %s8335_s25, 7  ;;  %v8353_v4 = vmov 0.0   ;;  %vm506_vm1 = vcmask 523264   ;;  %v496_v33 = vlaneseq  ;;  %s7269_s16 = sshll.u32 %s8335_s25, 1  ;;  %vm8354_vm2 = vmmov 0  }
  0x18   : > { %s8487_s15 = scalar_lea.vmem %s9286_s1, %s7418_s23  ;;  %583 = vmatprep.mubr.f32.mxu0 %v8353_v4  ;;  %7632 = vmatprep.subr.mxu1 %v8353_v4  ;;  %s493_s19 = scalar_lea.vmem %s9287_s2, %s7269_s16  ;;  %vm621_vm3 = vcmask 64512  }
  0x19   : > { %v477_v5 = vld [vmem:[%s8487_s15 + $0x8] sm:$0xff]  ;;  %v479_v6 = vld [vmem:[%s8487_s15 + $0x18] sm:$0xff]  ;;  %v476_v7 = vld [vmem:[%s8487_s15] sm:$0xff]  ;;  %v8516_v34 = vshrl.u32 %v496_v33, 7  ;;  %7634 = vmatprep.mubr.msk.f32.mxu1 %vm8354_vm2, %v8353_v4  ;;  %s8355_s20 = smov 64   ;;  %s8356_s21 = smov 56  }
  0x1a   : > { %v8016_v8 = vpack.c.bf16 %v479_v6, %v477_v5  ;;  %v478_v9 = vld [vmem:[%s8487_s15 + $0x10] sm:$0xff]  ;;  %v481_v10 = vld [vmem:[%s8487_s15 + $0x28] sm:$0xff]  ;;  %v483_v11 = vld [vmem:[%s8487_s15 + $0x38] sm:$0xff]  ;;  %s8357_s24 = smov 120   ;;  %s8358_s26 = smov 112  }
  0x1b   : > { %v8018_v12 = vpack.c.bf16 %v478_v9, %v476_v7  ;;  %v8020_v13 = vpack.c.bf16 %v483_v11, %v481_v10  ;;  %v480_v14 = vld [vmem:[%s8487_s15 + $0x20] sm:$0xff]  ;;  %v482_v15 = vld [vmem:[%s8487_s15 + $0x30] sm:$0xff]  ;;  %v485_v16 = vld [vmem:[%s8487_s15 + $0x48] sm:$0xff]  ;;  %v498_v35 = vsub.s32 0, %v8516_v34  ;;  %v502_v37 = vsub.s32 1, %v8516_v34  ;;  %s7274_s17 = sshll.u32 %s8335_s25, 6 }
  0x1c   : > { %8017 = vmatprep.subr.bf16.mxu0 %v8016_v8  ;;  %v487_v17 = vld [vmem:[%s8487_s15 + $0x58] sm:$0xff]  ;;  %v8022_v18 = vpack.c.bf16 %v482_v15, %v480_v14  ;;  %v484_v20 = vld [vmem:[%s8487_s15 + $0x40] sm:$0xff]  ;;  %v486_v21 = vld [vmem:[%s8487_s15 + $0x50] sm:$0xff]  ;;  %s8365_s18 = smov 24   ;;  %p7415_p7 = scmp.ne.s32.totalorder %s8335_s25, 5 }
  0x1d   : > { %8019 = vmatpush1.bf16.msra.mxu0 %v8018_v12  ;;  %v8024_v19 = vpack.c.bf16 %v487_v17, %v485_v16  ;;  %v489_v22 = vld [vmem:[%s8487_s15 + $0x68] sm:$0xff]  ;;  %v491_v23 = vld [vmem:[%s8487_s15 + $0x78] sm:$0xff]  ;;  %v8026_v24 = vpack.c.bf16 %v486_v21, %v484_v20  ;;  %v488_v26 = vld [vmem:[%s8487_s15 + $0x60] sm:$0xff] }
  0x1e   : > { %8021 = vmatprep.subr.bf16.mxu0 %v8020_v13  ;;  %v8028_v25 = vpack.c.bf16 %v491_v23, %v489_v22  ;;  %v490_v27 = vld [vmem:[%s8487_s15 + $0x70] sm:$0xff]  ;;  %v469_v29 = vld [vmem:[#allocation2] sm:$0xff]  ;;  %v470_v30 = vld [vmem:[#allocation2 + $0x8] sm:$0xff]  ;;  %s8359_s15 = smov 48  }
  0x1f   : > { %v8030_v28 = vpack.c.bf16 %v490_v27, %v488_v26  ;;  %v471_v31 = vld [vmem:[#allocation2 + $0x10] sm:$0xff]  ;;  %v472_v32 = vld [vmem:[#allocation2 + $0x18] sm:$0xff]  ;;  %v494_v36 = vld [vmem:[%s493_s19] sm:$0x3]  ;;  %s8366_s19 = smov 80  }
  0x20   : > { %v499_v38 = vrot.slane %v494_v36, %v498_v35  ;;  %v503_v39 = vrot.slane %v494_v36, %v502_v37 }
  0x21   : > { %8023 = vmatpush1.bf16.msra.mxu0 %v8022_v18 }
  0x22   : > { %8025 = vmatprep.subr.bf16.mxu0 %v8024_v19 }
  0x25   : > { %8027 = vmatpush1.bf16.msra.mxu0 %v8026_v24 }
  0x26   : > { %8029 = vmatprep.subr.bf16.mxu0 %v8028_v25 }
  0x29   : > { %8031 = vmatpush1.bf16.msra.mxu0 %v8030_v28 }
  0x2a   : > { %7667 = vmatprep.subr.mxu0 %v8353_v4 }
  0x2c   : > { %7270 = vmatmul.mubr.msk.f32.vlgmr.msra.gmra.mrb[0].mxu0 %vm506_vm1, %v469_v29 }
  0x2d   : > { %589 = vmatprep.mubr.f32.mxu0 %v8353_v4 }
  0x30   : > { %7271 = vmatmul.mubr.msk.f32.gmra.mrb[2].mxu0 %vm506_vm1, %v470_v30 }
  0x31   : > { %595 = vmatprep.mubr.f32.mxu0 %v8353_v4 }
  0x34   : > { %7272 = vmatmul.mubr.msk.f32.gmra.mrb[4].mxu0 %vm506_vm1, %v471_v31 }
  0x35   : > { %601 = vmatprep.mubr.f32.mxu0 %v8353_v4 }
  0x38   : > { %7273 = vmatmul.mubr.msk.f32.gmra.mrb[6].mxu0 %vm506_vm1, %v472_v32 }
  0x39   : > { %7669 = vmatprep.mubr.msk.f32.mxu0 %vm8354_vm2, %v8353_v4 }
  0xff   : > { %v585_v40 = vpop.f32.mrb[0].mxu0 }
 0x100   : > { %v8533_v41 = vadd.f32 %v585_v40, %v499_v38  ;;  %v587_v42 = vpop.f32.mrb[1].mxu0 }
 0x101   : > { %v8535_v43 = vadd.f32 %v587_v42, %v503_v39 }
 0x102   : > { %619 = vrot.lane.b32.xlu0 %v8533_v41, %s8355_s20 }
 0x103   : > { %v591_v44 = vpop.f32.mrb[2].mxu0 }
 0x104   : > { %v8538_v45 = vadd.f32 %v591_v44, %v499_v38  ;;  %v593_v46 = vpop.f32.mrb[3].mxu0 }
 0x105   : > { %v8540_v47 = vadd.f32 %v593_v46, %v503_v39 }
 0x106   : > { %697 = vrot.lane.b32.xlu0 %v8538_v45, %s8355_s20 }
 0x107   : > { %v597_v48 = vpop.f32.mrb[4].mxu0 }
 0x108   : > { %v8543_v49 = vadd.f32 %v597_v48, %v499_v38  ;;  %v599_v50 = vpop.f32.mrb[5].mxu0 }
 0x109   : > { %v8545_v51 = vadd.f32 %v599_v50, %v503_v39 }
 0x10a   : > { %774 = vrot.lane.b32.xlu1 %v8543_v49, %s8355_s20 }
 0x10b   : > { %v603_v52 = vpop.f32.mrb[6].mxu0 }
 0x10c   : > { %v8548_v53 = vadd.f32 %v603_v52, %v499_v38  ;;  %v605_v54 = vpop.f32.mrb[7].mxu0 }
 0x10d   : > { %v8550_v55 = vadd.f32 %v605_v54, %v503_v39 }
 0x10e   : > { %851 = vrot.lane.b32.xlu1 %v8548_v53, %s8355_s20  ;;  %s8682_s20 = scalar_lea.vmem %s9288_s3, %s7274_s17  ;;  %s8364_s17 = smov 88  }
 0x10f   : > { %7668 = vmatpush3.msra.mxu0 %v8550_v55 }
 0x110   : > { %7677 = vmatprep.subr.mxu0 %v8353_v4 }
 0x174   : > { %v620_v56 = vpop.permute.xlu0 %619 }
 0x175   : > { %7633 = vmatpush3.xpose.msk.msra.mxu1 %vm621_vm3, %v620_v56 }
 0x176   : > { %7637 = vmatprep.subr.mxu1 %v8353_v4 }
 0x178   : > { %7635 = vmatmul.mubr.msk.f32.vlgmr.msra.gmra.mrb[0].mxu1 %vm621_vm3, %v8533_v41  ;;  %v698_v57 = vpop.permute.xlu0 %697 }
 0x179   : > { %7638 = vmatpush3.xpose.msk.msra.mxu1 %vm621_vm3, %v698_v57  ;;  %7639 = vmatprep.mubr.msk.f32.mxu1 %vm8354_vm2, %v8353_v4 }
 0x17a   : > { %7642 = vmatprep.subr.mxu1 %v8353_v4 }
 0x17c   : > { %v775_v58 = vpop.permute.xlu1 %774  ;;  %7640 = vmatmul.mubr.msk.f32.vlgmr.msra.gmra.mrb[2].mxu1 %vm621_vm3, %v8538_v45 }
 0x17d   : > { %7643 = vmatpush3.xpose.msk.msra.mxu1 %vm621_vm3, %v775_v58  ;;  %7644 = vmatprep.mubr.msk.f32.mxu1 %vm8354_vm2, %v8353_v4 }
 0x17e   : > { %7647 = vmatprep.subr.mxu1 %v8353_v4 }
 0x180   : > { %v852_v59 = vpop.permute.xlu1 %851  ;;  %7645 = vmatmul.mubr.msk.f32.vlgmr.msra.gmra.mrb[4].mxu1 %vm621_vm3, %v8543_v49 }
 0x181   : > { %7648 = vmatpush3.xpose.msk.msra.mxu1 %vm621_vm3, %v852_v59  ;;  %7649 = vmatprep.mubr.msk.f32.mxu1 %vm8354_vm2, %v8353_v4 }
 0x182   : > { %7652 = vmatprep.subr.mxu1 %v8353_v4 }
 0x184   : > { %7650 = vmatmul.mubr.msk.f32.vlgmr.msra.gmra.mrb[6].mxu1 %vm621_vm3, %v8548_v53 }
 0x185   : > { %7653 = vmatpush3.msra.mxu1 %v8535_v43  ;;  %7654 = vmatprep.mubr.msk.f32.mxu1 %vm8354_vm2, %v8353_v4 }
 0x186   : > { %7657 = vmatprep.subr.mxu1 %v8353_v4 }
 0x24b   : > { %v692_v60 = vpop.f32.mrb[0].mxu1 }
 0x24c   : > { %v927_v61 = vmul.f32 0.35355338, %v692_v60  ;;  %v7636_v62 = vpop.f32.mrb[1].mxu1 }
 0x24e   : > { %v931_v63 = vsel %vm621_vm3, %v927_v61, -inf }
 0x24f   : > { %932 = vmax.xlane.f32.xlu0 %v931_v63  ;;  %v769_v0 = vpop.f32.mrb[2].mxu1 }
 0x250   : > { %v928_v1 = vmul.f32 0.35355338, %v769_v0  ;;  %v7641_v2 = vpop.f32.mrb[3].mxu1 }
 0x252   : > { %v934_v3 = vsel %vm621_vm3, %v928_v1, -inf }
 0x253   : > { %935 = vmax.xlane.f32.xlu1 %v934_v3  ;;  %v846_v5 = vpop.f32.mrb[4].mxu1 }
 0x254   : > { %v929_v6 = vmul.f32 0.35355338, %v846_v5  ;;  %v7646_v7 = vpop.f32.mrb[5].mxu1 }
 0x256   : > { %v937_v8 = vsel %vm621_vm3, %v929_v6, -inf }
 0x257   : > { %938 = vmax.xlane.f32.xlu0 %v937_v8  ;;  %v923_v9 = vpop.f32.mrb[6].mxu1 }
 0x258   : > { %v930_v10 = vmul.f32 0.35355338, %v923_v9  ;;  %v7651_v11 = vpop.f32.mrb[7].mxu1 }
 0x25a   : > { %v940_v12 = vsel %vm621_vm3, %v930_v10, -inf }
 0x25b   : > { %941 = vmax.xlane.f32.xlu0 %v940_v12 }
 0x264   : > { %1269 = vrot.lane.b32.xlu1 %v8533_v41, %s8356_s21 }
 0x2dc   : > { %v933_v13 = vpop.xlane.xlu0 %932 }
 0x2dd   : > { %v943_v14 = vsub.f32 %v927_v61, %v933_v13 }
 0x2df   : > { %v947_v15 = vmul.f32 1.442695, %v943_v14 }
 0x2e0   : > { %v936_v16 = vpop.xlane.xlu1 %935 }
 0x2e1   : > { %8165 = vpow2.f32 %v947_v15  ;;  %v944_v17 = vsub.f32 %v928_v1, %v936_v16 }
 0x2e3   : > { %v949_v18 = vmul.f32 1.442695, %v944_v17 }
 0x2e4   : > { %v939_v23 = vpop.xlane.xlu0 %938  ;;  %v1270_v33 = vpop.permute.xlu1 %1269 }
 0x2e5   : > { %8167 = vpow2.f32 %v949_v18  ;;  %v945_v25 = vsub.f32 %v929_v6, %v939_v23 }
 0x2e7   : > { %v951_v27 = vmul.f32 1.442695, %v945_v25 }
 0x2e8   : > { %v942_v24 = vpop.xlane.xlu0 %941 }
 0x2e9   : > { %v946_v26 = vsub.f32 %v930_v10, %v942_v24  ;;  %8169 = vpow2.f32 %v951_v27 }
 0x2eb   : > { %v8166_v19 = vpop.eup %8165  ;;  %v953_v28 = vmul.f32 1.442695, %v946_v26 }
 0x2ec   : > { %v955_v20 = vsel %vm621_vm3, %v8166_v19, 0.0 }
 0x2ed   : > { %956 = vadd.xlane.f32.xlu1 %v955_v20  ;;  %8171 = vpow2.f32 %v953_v28 }
 0x2ef   : > { %v8168_v21 = vpop.eup %8167 }
 0x2f0   : > { %v958_v22 = vsel %vm621_vm3, %v8168_v21, 0.0 }
 0x2f1   : > { %959 = vadd.xlane.f32.xlu0 %v958_v22 }
 0x2f3   : > { %v8170_v29 = vpop.eup %8169 }
 0x2f4   : > { %v961_v31 = vsel %vm621_vm3, %v8170_v29, 0.0 }
 0x2f7   : > { %v8172_v30 = vpop.eup %8171 }
 0x2f8   : > { %v964_v32 = vsel %vm621_vm3, %v8172_v30, 0.0 }
 0x2fe   : > { %1267 = vrot.lane.b32.xlu1 %v8533_v41, %s8357_s24 }
 0x302   : > { %1345 = vrot.lane.b32.xlu1 %v8538_v45, %s8357_s24 }
 0x307   : > { %1347 = vrot.lane.b32.xlu0 %v8538_v45, %s8356_s21 }
 0x326   : > { %962 = vadd.xlane.f32.xlu1 %v961_v31  ;;  %965 = vadd.xlane.f32.xlu0 %v964_v32 }
 0x337   : > { %1503 = vrot.lane.b32.xlu1 %v8548_v53, %s8356_s21 }
 0x33b   : > { %1501 = vrot.lane.b32.xlu1 %v8548_v53, %s8357_s24 }
 0x33c   : > { %1425 = vrot.lane.b32.xlu0 %v8543_v49, %s8356_s21  ;;  %s8360_s21 = smov 104  }
 0x340   : > { %1423 = vrot.lane.b32.xlu0 %v8543_v49, %s8357_s24 }
 0x37a   : > { %v957_v36 = vpop.xlane.xlu1 %956 }
 0x37b   : > { %8173 = vrcp.f32 %v957_v36 }
 0x37e   : > { %v960_v38 = vpop.xlane.xlu0 %959  ;;  %v1268_v46 = vpop.permute.xlu1 %1267 }
 0x37f   : > { %8175 = vrcp.f32 %v960_v38 }
 0x382   : > { %v1346_v48 = vpop.permute.xlu1 %1345  ;;  %v1348_v50 = vpop.permute.xlu0 %1347 }
 0x385   : > { %v8174_v39 = vpop.eup %8173 }
 0x386   : > { %v971_v40 = vmul.f32 %v8174_v39, %v8166_v19 }
 0x388   : > { %7655 = vmatmul.mubr.msk.f32.vlgmr.msra.gmra.mrb[8].mxu1 %vm621_vm3, %v971_v40 }
 0x389   : > { %v8176_v42 = vpop.eup %8175  ;;  %7658 = vmatpush3.msra.mxu1 %v8540_v47  ;;  %7659 = vmatprep.mubr.msk.f32.mxu1 %vm8354_vm2, %v8353_v4 }
 0x38a   : > { %7662 = vmatprep.subr.mxu1 %v8353_v4  ;;  %v972_v44 = vmul.f32 %v8176_v42, %v8168_v21 }
 0x38c   : > { %7660 = vmatmul.mubr.msk.f32.vlgmr.msra.gmra.mrb[10].mxu1 %vm621_vm3, %v972_v44 }
 0x38d   : > { %7663 = vmatpush3.msra.mxu1 %v8545_v51  ;;  %7664 = vmatprep.mubr.msk.f32.mxu1 %vm8354_vm2, %v8353_v4 }
 0x38e   : > { %7672 = vmatprep.subr.mxu1 %v8353_v4 }
 0x3b3   : > { %v963_v52 = vpop.xlane.xlu1 %962  ;;  %v966_v54 = vpop.xlane.xlu0 %965 }
 0x3b4   : > { %8177 = vrcp.f32 %v963_v52 }
 0x3b5   : > { %8179 = vrcp.f32 %v966_v54 }
 0x3b7   : > { %v1426_v60 = vpop.permute.xlu0 %1425  ;;  %v1504_v61 = vpop.permute.xlu1 %1503 }
 0x3bb   : > { %v1424_v62 = vpop.permute.xlu0 %1423  ;;  %v1502_v63 = vpop.permute.xlu1 %1501 }
 0x3be   : > { %v8178_v56 = vpop.eup %8177 }
 0x3bf   : > { %v8180_v57 = vpop.eup %8179  ;;  %v973_v58 = vmul.f32 %v8178_v56, %v8170_v29 }
 0x3c0   : > { %v974_v59 = vmul.f32 %v8180_v57, %v8172_v30 }
 0x3c1   : > { %7665 = vmatmul.mubr.msk.f32.vlgmr.msra.gmra.mrb[12].mxu1 %vm621_vm3, %v973_v58 }
 0x3c2   : > { %7670 = vmatmul.mubr.msk.f32.vlgmr.msra.gmra.mrb[8].mxu0 %vm621_vm3, %v974_v59  ;;  %7673 = vmatpush3.xpose.msk.msra.mxu1 %vm621_vm3, %v1270_v33 }
 0x3c3   : > { %7678 = vmatpush3.xpose.msk.msra.mxu0 %vm621_vm3, %v1348_v50  ;;  %7674 = vmatprep.mubr.msk.f32.mxu1 %vm8354_vm2, %v8353_v4 }
 0x3c4   : > { %7679 = vmatprep.mubr.msk.f32.mxu0 %vm8354_vm2, %v8353_v4  ;;  %7682 = vmatprep.subr.mxu1 %v8353_v4 }
 0x3c5   : > { %7687 = vmatprep.subr.mxu0 %v8353_v4  ;;  %7675 = vmatmul.mubr.msk.f32.vlgmr.msra.gmra.mrb[14].mxu1 %vm621_vm3, %v1268_v46 }
 0x3c6   : > { %7680 = vmatmul.mubr.msk.f32.vlgmr.msra.gmra.mrb[10].mxu0 %vm621_vm3, %v1346_v48  ;;  %7683 = vmatpush3.xpose.msk.msra.mxu1 %vm621_vm3, %v1426_v60 }
 0x3c7   : > { %7688 = vmatpush3.xpose.msk.msra.mxu0 %vm621_vm3, %v1504_v61  ;;  %7684 = vmatprep.mubr.msk.f32.mxu1 %vm8354_vm2, %v8353_v4 }
 0x3c8   : > { %7689 = vmatprep.mubr.msk.f32.mxu0 %vm8354_vm2, %v8353_v4  ;;  %7692 = vmatprep.subr.mxu1 %v8353_v4 }
 0x3c9   : > { %7685 = vmatmul.mubr.msk.f32.vlgmr.msra.gmra.mrb[16].mxu1 %vm621_vm3, %v1424_v62  ;;  %7697 = vmatprep.subr.mxu0 %v8353_v4 }
 0x3ca   : > { %7690 = vmatmul.mubr.msk.f32.vlgmr.msra.gmra.mrb[12].mxu0 %vm621_vm3, %v1502_v63  ;;  %7694 = vmatprep.mubr.msk.f32.mxu1 %vm8354_vm2, %v8353_v4 }
 0x3cb   : > { %7699 = vmatprep.mubr.msk.f32.mxu0 %vm8354_vm2, %v8353_v4 }
 0x45b   : > { %v8641_v0 = vpop.f32.mrb[8].mxu1 }
 0x45c   : > { %v7656_v1 = vpop.f32.mrb[9].mxu1 }
 0x45f   : > { %v8643_v2 = vpop.f32.mrb[10].mxu1 }
 0x460   : > { %v7661_v3 = vpop.f32.mrb[11].mxu1 }
 0x494   : > { %v8645_v5 = vpop.f32.mrb[12].mxu1 }
 0x495   : > { %v8647_v6 = vpop.f32.mrb[8].mxu0  ;;  %v7666_v7 = vpop.f32.mrb[13].mxu1 }
 0x496   : > { %v7671_v8 = vpop.f32.mrb[9].mxu0 }
 0x497   : > { %v610_v8 = vld [vmem:[%s8682_s20] sm:$0xff] }
 0x498   : > { %v1341_v9 = vpop.f32.mrb[14].mxu1 }
 0x499   : > { %v1579_v10 = vmul.f32 0.35355338, %v1341_v9  ;;  %v1419_v11 = vpop.f32.mrb[10].mxu0  ;;  %v7676_v12 = vpop.f32.mrb[15].mxu1 }
 0x49a   : > { %v1580_v13 = vmul.f32 0.35355338, %v1419_v11  ;;  %v7681_v14 = vpop.f32.mrb[11].mxu0  ;;  %v611_v11 = vld [vmem:[%s8682_s20 + $0x8] sm:$0xff] }
 0x49b   : > { %v1583_v15 = vsel %vm621_vm3, %v1579_v10, -inf }
 0x49c   : > { %1584 = vmax.xlane.f32.xlu0 %v1583_v15  ;;  %v1586_v16 = vsel %vm621_vm3, %v1580_v13, -inf  ;;  %v1497_v17 = vpop.f32.mrb[16].mxu1 }
 0x49d   : > { %1587 = vmax.xlane.f32.xlu1 %v1586_v16  ;;  %v1581_v18 = vmul.f32 0.35355338, %v1497_v17  ;;  %v1575_v19 = vpop.f32.mrb[12].mxu0  ;;  %v7686_v20 = vpop.f32.mrb[17].mxu1 }
 0x49e   : > { %v7691_v21 = vpop.f32.mrb[13].mxu0  ;;  %v1582_v22 = vmul.f32 0.35355338, %v1575_v19 }
 0x49f   : > { %v1589_v23 = vsel %vm621_vm3, %v1581_v18, -inf }
 0x4a0   : > { %1590 = vmax.xlane.f32.xlu0 %v1589_v23  ;;  %v1592_v24 = vsel %vm621_vm3, %v1582_v22, -inf }
 0x4a4   : > { %1593 = vmax.xlane.f32.xlu0 %v1592_v24 }
 0x4ae   : > { %1628 = vrot.lane.b32.xlu1 %v8535_v43, %s8357_s24 }
 0x529   : > { %v1585_v25 = vpop.xlane.xlu0 %1584 }
 0x52a   : > { %v1588_v26 = vpop.xlane.xlu1 %1587  ;;  %v1595_v27 = vsub.f32 %v1579_v10, %v1585_v25 }
 0x52b   : > { %v1596_v28 = vsub.f32 %v1580_v13, %v1588_v26 }
 0x52c   : > { %v1599_v29 = vmul.f32 1.442695, %v1595_v27 }
 0x52d   : > { %v1601_v30 = vmul.f32 1.442695, %v1596_v28  ;;  %v1591_v31 = vpop.xlane.xlu0 %1590 }
 0x52e   : > { %8181 = vpow2.f32 %v1599_v29  ;;  %v1629_v32 = vpop.permute.xlu1 %1628  ;;  %v1597_v33 = vsub.f32 %v1581_v18, %v1591_v31 }
 0x52f   : > { %8183 = vpow2.f32 %v1601_v30  ;;  %7693 = vmatpush3.msra.mxu1 %v1629_v32 }
 0x530   : > { %v1603_v36 = vmul.f32 1.442695, %v1597_v33  ;;  %7702 = vmatprep.subr.mxu1 %v8353_v4 }
 0x531   : > { %v1594_v38 = vpop.xlane.xlu0 %1593 }
 0x532   : > { %8185 = vpow2.f32 %v1603_v36  ;;  %v1598_v39 = vsub.f32 %v1582_v22, %v1594_v38 }
 0x534   : > { %v1605_v40 = vmul.f32 1.442695, %v1598_v39 }
 0x536   : > { %8187 = vpow2.f32 %v1605_v40 }
 0x538   : > { %v8182_v42 = vpop.eup %8181 }
 0x539   : > { %v8184_v44 = vpop.eup %8183  ;;  %v1607_v46 = vsel %vm621_vm3, %v8182_v42, 0.0 }
 0x53a   : > { %v1610_v48 = vsel %vm621_vm3, %v8184_v44, 0.0  ;;  %1608 = vadd.xlane.f32.xlu1 %v1607_v46 }
 0x53b   : > { %1611 = vadd.xlane.f32.xlu0 %v1610_v48 }
 0x53c   : > { %v8186_v50 = vpop.eup %8185 }
 0x53d   : > { %v1613_v52 = vsel %vm621_vm3, %v8186_v50, 0.0 }
 0x53e   : > { %1614 = vadd.xlane.f32.xlu1 %v1613_v52 }
 0x540   : > { %v8188_v54 = vpop.eup %8187 }
 0x541   : > { %v1616_v56 = vsel %vm621_vm3, %v8188_v54, 0.0 }
 0x542   : > { %1617 = vadd.xlane.f32.xlu0 %v1616_v56 }
 0x54f   : > { %1782 = vrot.lane.b32.xlu1 %v8545_v51, %s8357_s24 }
 0x553   : > { %1859 = vrot.lane.b32.xlu1 %v8550_v55, %s8357_s24 }
 0x557   : > { %2129 = vrot.lane.b32.xlu1 %v8533_v41, %s8358_s26 }
 0x558   : > { %1705 = vrot.lane.b32.xlu0 %v8540_v47, %s8357_s24  ;;  %s8361_s24 = smov 40  }
 0x55b   : > { %2207 = vrot.lane.b32.xlu1 %v8538_v45, %s8358_s26 }
 0x55c   : > { %2131 = vrot.lane.b32.xlu0 %v8533_v41, %s8359_s15 }
 0x55f   : > { %2285 = vrot.lane.b32.xlu1 %v8543_v49, %s8358_s26 }
 0x560   : > { %2209 = vrot.lane.b32.xlu0 %v8538_v45, %s8359_s15 }
 0x563   : > { %2363 = vrot.lane.b32.xlu1 %v8548_v53, %s8358_s26 }
 0x564   : > { %2287 = vrot.lane.b32.xlu0 %v8543_v49, %s8359_s15 }
 0x568   : > { %2365 = vrot.lane.b32.xlu0 %v8548_v53, %s8359_s15  ;;  %s8363_s15 = smov 32  }
 0x5c7   : > { %v1609_v57 = vpop.xlane.xlu1 %1608 }
 0x5c8   : > { %8189 = vrcp.f32 %v1609_v57  ;;  %v1612_v58 = vpop.xlane.xlu0 %1611 }
 0x5c9   : > { %8191 = vrcp.f32 %v1612_v58 }
 0x5cb   : > { %v1615_v59 = vpop.xlane.xlu1 %1614 }
 0x5cc   : > { %8193 = vrcp.f32 %v1615_v59 }
 0x5cf   : > { %v1618_v60 = vpop.xlane.xlu0 %1617  ;;  %v1783_v61 = vpop.permute.xlu1 %1782 }
 0x5d0   : > { %8195 = vrcp.f32 %v1618_v60 }
 0x5d2   : > { %v8190_v62 = vpop.eup %8189 }
 0x5d3   : > { %v8192_v63 = vpop.eup %8191  ;;  %v1706_v1 = vpop.permute.xlu0 %1705  ;;  %v1623_v3 = vmul.f32 %v8190_v62, %v8182_v42 }
 0x5d4   : > { %7698 = vmatpush3.msra.mxu0 %v1706_v1  ;;  %v1624_v7 = vmul.f32 %v8192_v63, %v8184_v44  ;;  %v1860_v10 = vpop.permute.xlu1 %1859 }
 0x5d5   : > { %7695 = vmatmul.mubr.msk.f32.vlgmr.msra.gmra.mrb[18].mxu1 %vm621_vm3, %v1623_v3  ;;  %7707 = vmatprep.subr.mxu0 %v8353_v4 }
 0x5d6   : > { %v8194_v9 = vpop.eup %8193  ;;  %7700 = vmatmul.mubr.msk.f32.vlgmr.msra.gmra.mrb[14].mxu0 %vm621_vm3, %v1624_v7  ;;  %7703 = vmatpush3.msra.mxu1 %v1783_v61 }
 0x5d7   : > { %7708 = vmatpush3.msra.mxu0 %v1860_v10  ;;  %7704 = vmatprep.mubr.msk.f32.mxu1 %vm8354_vm2, %v8353_v4  ;;  %v1625_v12 = vmul.f32 %v8194_v9, %v8186_v50  ;;  %v2132_v17 = vpop.permute.xlu0 %2131 }
 0x5d8   : > { %7720 = vmatprep.subr.mxu1 %v610_v8  ;;  %7709 = vmatprep.mubr.msk.f32.mxu0 %vm8354_vm2, %v8353_v4 }
 0x5d9   : > { %7705 = vmatmul.mubr.msk.f32.vlgmr.msra.gmra.mrb[20].mxu1 %vm621_vm3, %v1625_v12  ;;  %7712 = vmatprep.subr.mxu0 %v611_v11 }
 0x5da   : > { %v8196_v13 = vpop.eup %8195  ;;  %7722 = vmatprep.mubr.msk.f32.mxu1 %vm621_vm3, %v8641_v0  ;;  %7721 = vmatpush3.msra.mxu1 %v610_v8 }
 0x5db   : > { %v1626_v14 = vmul.f32 %v8196_v13, %v8188_v54  ;;  %7748 = vmatprep.subr.mxu1 %v8353_v4  ;;  %v2210_v20 = vpop.permute.xlu0 %2209 }
 0x5dd   : > { %7710 = vmatmul.mubr.msk.f32.vlgmr.msra.gmra.mrb[16].mxu0 %vm621_vm3, %v1626_v14  ;;  %7723 = vmatmul.mubr.msk.f32.vlgmr.msra.gmra.mrb[22].mxu1 %vm621_vm3, %v8643_v2 }
 0x5de   : > { %7725 = vmatprep.mubr.msk.f32.mxu1 %vm621_vm3, %v8645_v5  ;;  %7713 = vmatpush3.msra.mxu0 %v611_v11 }
 0x5df   : > { %7728 = vmatprep.subr.mxu0 %v8353_v4  ;;  %v2288_v23 = vpop.permute.xlu0 %2287 }
 0x5e1   : > { %7726 = vmatmul.mubr.msk.f32.gmra.mrb[24].mxu1 %vm621_vm3, %v8647_v6  ;;  %v2130_v6 = vpop.permute.xlu1 %2129 }
 0x5e2   : > { %7750 = vmatprep.mubr.msk.f32.mxu1 %vm8354_vm2, %v8353_v4 }
 0x5e3   : > { %v2366_v25 = vpop.permute.xlu0 %2365 }
 0x5e5   : > { %v2208_v22 = vpop.permute.xlu1 %2207 }
 0x5e9   : > { %v2286_v24 = vpop.permute.xlu1 %2285 }
 0x5ed   : > { %v2364_v26 = vpop.permute.xlu1 %2363 }
 0x6a8   : > { %v1700_v0 = vpop.f32.mrb[18].mxu1 }
 0x6a9   : > { %v1777_v15 = vpop.f32.mrb[14].mxu0  ;;  %v7696_v16 = vpop.f32.mrb[19].mxu1  ;;  %7714 = vmatprep.mubr.msk.f32.mxu0 %vm621_vm3, %v1700_v0 }
 0x6aa   : > { %v7701_v18 = vpop.f32.mrb[15].mxu0  ;;  %7715 = vmatmul.mubr.msk.f32.vlgmr.msra.gmra.mrb[18].mxu0 %vm621_vm3, %v1777_v15 }
 0x6ab   : > { %7729 = vmatpush3.xpose.msk.msra.mxu0 %vm621_vm3, %v2132_v17 }
 0x6ac   : > { %v1854_v2 = vpop.f32.mrb[20].mxu1  ;;  %7733 = vmatprep.subr.mxu0 %v8353_v4 }
 0x6ad   : > { %v7706_v5 = vpop.f32.mrb[21].mxu1  ;;  %7717 = vmatprep.mubr.msk.f32.mxu0 %vm621_vm3, %v1854_v2 }
 0x6b0   : > { %v1931_v19 = vpop.f32.mrb[16].mxu0 }
 0x6b1   : > { %v7711_v21 = vpop.f32.mrb[17].mxu0  ;;  %7718 = vmatmul.mubr.msk.f32.gmra.mrb[20].mxu0 %vm621_vm3, %v1931_v19 }
 0x6b2   : > { %7730 = vmatprep.mubr.msk.f32.mxu0 %vm8354_vm2, %v8353_v4 }
 0x6b5   : > { %7731 = vmatmul.mubr.msk.f32.vlgmr.msra.gmra.mrb[22].mxu0 %vm621_vm3, %v2130_v6 }
 0x6b6   : > { %7734 = vmatpush3.xpose.msk.msra.mxu0 %vm621_vm3, %v2210_v20  ;;  %7735 = vmatprep.mubr.msk.f32.mxu0 %vm8354_vm2, %v8353_v4 }
 0x6b7   : > { %7738 = vmatprep.subr.mxu0 %v8353_v4 }
 0x6b9   : > { %7736 = vmatmul.mubr.msk.f32.vlgmr.msra.gmra.mrb[24].mxu0 %vm621_vm3, %v2208_v22 }
 0x6ba   : > { %7739 = vmatpush3.xpose.msk.msra.mxu0 %vm621_vm3, %v2288_v23  ;;  %7740 = vmatprep.mubr.msk.f32.mxu0 %vm8354_vm2, %v8353_v4  ;;  %v612_v23 = vld [vmem:[%s8682_s20 + $0x10] sm:$0xff] }
 0x6bb   : > { %7743 = vmatprep.subr.mxu0 %v8353_v4 }
 0x6bd   : > { %7741 = vmatmul.mubr.msk.f32.vlgmr.msra.gmra.mrb[26].mxu0 %vm621_vm3, %v2286_v24 }
 0x6be   : > { %7744 = vmatpush3.xpose.msk.msra.mxu0 %vm621_vm3, %v2366_v25  ;;  %7745 = vmatprep.mubr.msk.f32.mxu0 %vm8354_vm2, %v8353_v4 }
 0x6bf   : > { %7753 = vmatprep.subr.mxu0 %v8353_v4 }
 0x6c1   : > { %7746 = vmatmul.mubr.msk.f32.vlgmr.msra.gmra.mrb[28].mxu0 %vm621_vm3, %v2364_v26 }
 0x6c2   : > { %7755 = vmatprep.mubr.msk.f32.mxu0 %vm8354_vm2, %v8353_v4 }
 0x77d   : > { %v8733_v27 = vpop.f32.mrb[18].mxu0 }
 0x77e   : > { %v8735_v28 = vpop.f32.mrb[19].mxu0 }
 0x784   : > { %v8737_v29 = vpop.f32.mrb[20].mxu0 }
 0x785   : > { %v8739_v30 = vpop.f32.mrb[21].mxu0 }
 0x788   : > { %v2203_v31 = vpop.f32.mrb[22].mxu0 }
 0x789   : > { %v2441_v32 = vmul.f32 0.35355338, %v2203_v31  ;;  %v7732_v33 = vpop.f32.mrb[23].mxu0 }
 0x78b   : > { %v2445_v36 = vsel %vm621_vm3, %v2441_v32, -inf }
 0x78c   : > { %2446 = vmax.xlane.f32.xlu0 %v2445_v36  ;;  %v2281_v38 = vpop.f32.mrb[24].mxu0 }
 0x78d   : > { %v2442_v39 = vmul.f32 0.35355338, %v2281_v38  ;;  %v7737_v40 = vpop.f32.mrb[25].mxu0 }
 0x78f   : > { %v2448_v42 = vsel %vm621_vm3, %v2442_v39, -inf }
 0x790   : > { %2449 = vmax.xlane.f32.xlu1 %v2448_v42  ;;  %v2359_v44 = vpop.f32.mrb[26].mxu0 }
 0x791   : > { %v2443_v46 = vmul.f32 0.35355338, %v2359_v44  ;;  %v7742_v48 = vpop.f32.mrb[27].mxu0 }
 0x793   : > { %v2451_v50 = vsel %vm621_vm3, %v2443_v46, -inf }
 0x794   : > { %2452 = vmax.xlane.f32.xlu0 %v2451_v50  ;;  %v2437_v52 = vpop.f32.mrb[28].mxu0 }
 0x795   : > { %v2444_v54 = vmul.f32 0.35355338, %v2437_v52  ;;  %v7747_v56 = vpop.f32.mrb[29].mxu0 }
 0x797   : > { %v2454_v57 = vsel %vm621_vm3, %v2444_v54, -inf }
 0x798   : > { %2455 = vmax.xlane.f32.xlu0 %v2454_v57 }
 0x7a1   : > { %2489 = vrot.lane.b32.xlu1 %v8535_v43, %s8358_s26 }
 0x819   : > { %v2447_v58 = vpop.xlane.xlu0 %2446 }
 0x81a   : > { %v2457_v59 = vsub.f32 %v2441_v32, %v2447_v58 }
 0x81c   : > { %v2461_v60 = vmul.f32 1.442695, %v2457_v59 }
 0x81d   : > { %v2450_v61 = vpop.xlane.xlu1 %2449 }
 0x81e   : > { %8197 = vpow2.f32 %v2461_v60  ;;  %v2458_v62 = vsub.f32 %v2442_v39, %v2450_v61 }
 0x820   : > { %v2463_v63 = vmul.f32 1.442695, %v2458_v62 }
 0x821   : > { %v2490_v1 = vpop.permute.xlu1 %2489  ;;  %v2453_v3 = vpop.xlane.xlu0 %2452 }
 0x822   : > { %8199 = vpow2.f32 %v2463_v63  ;;  %v2459_v7 = vsub.f32 %v2443_v46, %v2453_v3  ;;  %7749 = vmatpush3.msra.mxu1 %v2490_v1 }
 0x823   : > { %7758 = vmatprep.subr.mxu1 %v8353_v4 }
 0x824   : > { %v2465_v8 = vmul.f32 1.442695, %v2459_v7 }
 0x825   : > { %v2456_v9 = vpop.xlane.xlu0 %2455 }
 0x826   : > { %8201 = vpow2.f32 %v2465_v8  ;;  %v2460_v10 = vsub.f32 %v2444_v54, %v2456_v9 }
 0x828   : > { %v8198_v11 = vpop.eup %8197  ;;  %v2467_v12 = vmul.f32 1.442695, %v2460_v10 }
 0x829   : > { %v2469_v13 = vsel %vm621_vm3, %v8198_v11, 0.0 }
 0x82a   : > { %8203 = vpow2.f32 %v2467_v12  ;;  %2470 = vadd.xlane.f32.xlu1 %v2469_v13 }
 0x82c   : > { %v8200_v14 = vpop.eup %8199 }
 0x82d   : > { %v2472_v0 = vsel %vm621_vm3, %v8200_v14, 0.0 }
 0x82e   : > { %2473 = vadd.xlane.f32.xlu0 %v2472_v0 }
 0x830   : > { %v8202_v15 = vpop.eup %8201 }
 0x831   : > { %v2475_v16 = vsel %vm621_vm3, %v8202_v15, 0.0 }
 0x832   : > { %2476 = vadd.xlane.f32.xlu1 %v2475_v16 }
 0x834   : > { %v8204_v17 = vpop.eup %8203 }
 0x835   : > { %v2478_v18 = vsel %vm621_vm3, %v8204_v17, 0.0 }
 0x836   : > { %2479 = vadd.xlane.f32.xlu0 %v2478_v18 }
 0x843   : > { %2641 = vrot.lane.b32.xlu1 %v8545_v51, %s8358_s26 }
 0x847   : > { %2717 = vrot.lane.b32.xlu1 %v8550_v55, %s8358_s26 }
 0x84b   : > { %2894 = vrot.lane.b32.xlu1 %v8533_v41, %s8360_s21 }
 0x84c   : > { %2565 = vrot.lane.b32.xlu0 %v8540_v47, %s8358_s26  ;;  %s8362_s26 = smov 96  }
 0x84f   : > { %2972 = vrot.lane.b32.xlu1 %v8538_v45, %s8360_s21 }
 0x850   : > { %2896 = vrot.lane.b32.xlu0 %v8533_v41, %s8361_s24 }
 0x853   : > { %3130 = vrot.lane.b32.xlu1 %v8548_v53, %s8361_s24 }
 0x854   : > { %2974 = vrot.lane.b32.xlu0 %v8538_v45, %s8361_s24 }
 0x857   : > { %3128 = vrot.lane.b32.xlu1 %v8548_v53, %s8360_s21 }
 0x858   : > { %3052 = vrot.lane.b32.xlu0 %v8543_v49, %s8361_s24  ;;  %s8368_s24 = smov 72  }
 0x85c   : > { %3050 = vrot.lane.b32.xlu0 %v8543_v49, %s8360_s21 }
 0x8b7   : > { %v2471_v2 = vpop.xlane.xlu1 %2470 }
 0x8b8   : > { %8205 = vrcp.f32 %v2471_v2 }
 0x8bb   : > { %v2474_v5 = vpop.xlane.xlu0 %2473 }
 0x8bc   : > { %8207 = vrcp.f32 %v2474_v5 }
 0x8bf   : > { %v2477_v6 = vpop.xlane.xlu1 %2476 }
 0x8c0   : > { %8209 = vrcp.f32 %v2477_v6 }
 0x8c2   : > { %v8206_v19 = vpop.eup %8205 }
 0x8c3   : > { %v2485_v20 = vmul.f32 %v8206_v19, %v8198_v11  ;;  %v2642_v21 = vpop.permute.xlu1 %2641  ;;  %v2480_v22 = vpop.xlane.xlu0 %2479 }
 0x8c4   : > { %8211 = vrcp.f32 %v2480_v22 }
 0x8c5   : > { %7751 = vmatmul.mubr.msk.f32.vlgmr.msra.gmra.mrb[26].mxu1 %vm621_vm3, %v2485_v20 }
 0x8c6   : > { %v8208_v24 = vpop.eup %8207  ;;  %7759 = vmatpush3.msra.mxu1 %v2642_v21  ;;  %7760 = vmatprep.mubr.msk.f32.mxu1 %vm8354_vm2, %v8353_v4 }
 0x8c7   : > { %v2718_v25 = vpop.permute.xlu1 %2717  ;;  %v2566_v26 = vpop.permute.xlu0 %2565  ;;  %v2486_v31 = vmul.f32 %v8208_v24, %v8200_v14  ;;  %7768 = vmatprep.subr.mxu1 %v612_v23 }
 0x8c8   : > { %7754 = vmatpush3.msra.mxu0 %v2566_v26 }
 0x8c9   : > { %7756 = vmatmul.mubr.msk.f32.vlgmr.msra.gmra.mrb[30].mxu0 %vm621_vm3, %v2486_v31  ;;  %7763 = vmatprep.subr.mxu0 %v8353_v4 }
 0x8ca   : > { %v8210_v32 = vpop.eup %8209  ;;  %7764 = vmatpush3.msra.mxu0 %v2718_v25  ;;  %7765 = vmatprep.mubr.msk.f32.mxu0 %vm8354_vm2, %v8353_v4 }
 0x8cb   : > { %v2895_v33 = vpop.permute.xlu1 %2894  ;;  %v2487_v36 = vmul.f32 %v8210_v32, %v8202_v15  ;;  %7776 = vmatprep.subr.mxu0 %v8353_v4  ;;  %v2897_v39 = vpop.permute.xlu0 %2896 }
 0x8cd   : > { %7761 = vmatmul.mubr.msk.f32.vlgmr.msra.gmra.mrb[28].mxu1 %vm621_vm3, %v2487_v36 }
 0x8ce   : > { %v8212_v38 = vpop.eup %8211  ;;  %7769 = vmatpush3.msra.mxu1 %v612_v23 }
 0x8cf   : > { %v2488_v40 = vmul.f32 %v8212_v38, %v8204_v17  ;;  %7786 = vmatprep.subr.mxu1 %v8353_v4  ;;  %v2973_v42 = vpop.permute.xlu1 %2972  ;;  %v2975_v44 = vpop.permute.xlu0 %2974 }
 0x8d1   : > { %7766 = vmatmul.mubr.msk.f32.vlgmr.msra.gmra.mrb[32].mxu0 %vm621_vm3, %v2488_v40 }
 0x8d2   : > { %7777 = vmatpush3.xpose.msk.msra.mxu0 %vm621_vm3, %v2897_v39  ;;  %7778 = vmatprep.mubr.msk.f32.mxu0 %vm8354_vm2, %v8353_v4 }
 0x8d3   : > { %7781 = vmatprep.subr.mxu0 %v8353_v4  ;;  %v3131_v46 = vpop.permute.xlu1 %3130  ;;  %v3053_v56 = vpop.permute.xlu0 %3052 }
 0x8d5   : > { %7779 = vmatmul.mubr.msk.f32.vlgmr.msra.gmra.mrb[34].mxu0 %vm621_vm3, %v2895_v33 }
 0x8d6   : > { %7782 = vmatpush3.xpose.msk.msra.mxu0 %vm621_vm3, %v2975_v44  ;;  %7783 = vmatprep.mubr.msk.f32.mxu0 %vm8354_vm2, %v8353_v4 }
 0x8d7   : > { %7791 = vmatprep.subr.mxu0 %v8353_v4  ;;  %v3129_v48 = vpop.permute.xlu1 %3128  ;;  %v3051_v62 = vpop.permute.xlu0 %3050 }
 0x8d9   : > { %7784 = vmatmul.mubr.msk.f32.vlgmr.msra.gmra.mrb[36].mxu0 %vm621_vm3, %v2973_v42 }
 0x8da   : > { %7792 = vmatpush3.xpose.msk.msra.mxu0 %vm621_vm3, %v3131_v46  ;;  %7793 = vmatprep.mubr.msk.f32.mxu0 %vm8354_vm2, %v8353_v4 }
 0x8db   : > { %7801 = vmatprep.subr.mxu0 %v8353_v4 }
 0x8dd   : > { %7794 = vmatmul.mubr.msk.f32.vlgmr.msra.gmra.mrb[38].mxu0 %vm621_vm3, %v3129_v48 }
 0x8de   : > { %7803 = vmatprep.mubr.msk.f32.mxu0 %vm8354_vm2, %v8353_v4 }
 0x998   : > { %v2561_v50 = vpop.f32.mrb[26].mxu1 }
 0x999   : > { %v7752_v52 = vpop.f32.mrb[27].mxu1  ;;  %7770 = vmatprep.mubr.msk.f32.mxu1 %vm621_vm3, %v2561_v50 }
 0x99c   : > { %v2637_v54 = vpop.f32.mrb[30].mxu0 }
 0x99d   : > { %v7757_v57 = vpop.f32.mrb[31].mxu0  ;;  %7771 = vmatmul.mubr.msk.f32.vlgmr.msra.gmra.mrb[22].mxu1 %vm621_vm3, %v2637_v54 }
 0x99e   : > { %7787 = vmatpush3.xpose.msk.msra.mxu1 %vm621_vm3, %v3053_v56  ;;  %v613_v56 = vld [vmem:[%s8682_s20 + $0x18] sm:$0xff] }
 0x99f   : > { %7796 = vmatprep.subr.mxu1 %v8353_v4 }
 0x9a0   : > { %v2713_v58 = vpop.f32.mrb[28].mxu1 }
 0x9a1   : > { %v7762_v59 = vpop.f32.mrb[29].mxu1  ;;  %7773 = vmatprep.mubr.msk.f32.mxu1 %vm621_vm3, %v2713_v58 }
 0x9a4   : > { %v2789_v60 = vpop.f32.mrb[32].mxu0 }
 0x9a5   : > { %v7767_v61 = vpop.f32.mrb[33].mxu0  ;;  %7774 = vmatmul.mubr.msk.f32.gmra.mrb[24].mxu1 %vm621_vm3, %v2789_v60 }
 0x9a6   : > { %7788 = vmatprep.mubr.msk.f32.mxu1 %vm8354_vm2, %v8353_v4 }
 0x9a8   : > { %v2968_v63 = vpop.f32.mrb[34].mxu0 }
 0x9a9   : > { %v3206_v1 = vmul.f32 0.35355338, %v2968_v63  ;;  %v7780_v3 = vpop.f32.mrb[35].mxu0  ;;  %7789 = vmatmul.mubr.msk.f32.vlgmr.msra.gmra.mrb[30].mxu1 %vm621_vm3, %v3051_v62 }
 0x9aa   : > { %7798 = vmatprep.mubr.msk.f32.mxu1 %vm8354_vm2, %v8353_v4 }
 0x9ab   : > { %v3210_v7 = vsel %vm621_vm3, %v3206_v1, -inf }
 0x9ac   : > { %3211 = vmax.xlane.f32.xlu0 %v3210_v7  ;;  %v3046_v8 = vpop.f32.mrb[36].mxu0 }
 0x9ad   : > { %v3207_v9 = vmul.f32 0.35355338, %v3046_v8  ;;  %v7785_v10 = vpop.f32.mrb[37].mxu0 }
 0x9af   : > { %v3213_v11 = vsel %vm621_vm3, %v3207_v9, -inf }
 0x9b0   : > { %3214 = vmax.xlane.f32.xlu1 %v3213_v11  ;;  %v3202_v12 = vpop.f32.mrb[38].mxu0 }
 0x9b1   : > { %v7795_v13 = vpop.f32.mrb[39].mxu0  ;;  %v3209_v21 = vmul.f32 0.35355338, %v3202_v12 }
 0x9b3   : > { %v3219_v23 = vsel %vm621_vm3, %v3209_v21, -inf }
 0xa39   : > { %v3212_v14 = vpop.xlane.xlu0 %3211 }
 0xa3a   : > { %v3222_v0 = vsub.f32 %v3206_v1, %v3212_v14 }
 0xa3c   : > { %v3226_v15 = vmul.f32 1.442695, %v3222_v0 }
 0xa3d   : > { %v3215_v18 = vpop.xlane.xlu1 %3214 }
 0xa3e   : > { %8213 = vpow2.f32 %v3226_v15  ;;  %v3223_v2 = vsub.f32 %v3207_v9, %v3215_v18 }
 0xa40   : > { %v3228_v5 = vmul.f32 1.442695, %v3223_v2 }
 0xa42   : > { %8215 = vpow2.f32 %v3228_v5 }
 0xa48   : > { %v8214_v16 = vpop.eup %8213 }
 0xa49   : > { %v3234_v17 = vsel %vm621_vm3, %v8214_v16, 0.0 }
 0xa4a   : > { %3235 = vadd.xlane.f32.xlu1 %v3234_v17 }
 0xa4c   : > { %v8216_v24 = vpop.eup %8215 }
 0xa4d   : > { %v3237_v25 = vsel %vm621_vm3, %v8216_v24, 0.0 }
 0xa5b   : > { %3254 = vrot.lane.b32.xlu1 %v8535_v43, %s8360_s21 }
 0xa5f   : > { %3406 = vrot.lane.b32.xlu1 %v8545_v51, %s8360_s21 }
 0xa7c   : > { %v3124_v6 = vpop.f32.mrb[30].mxu1 }
 0xa7d   : > { %v3208_v19 = vmul.f32 0.35355338, %v3124_v6  ;;  %v7790_v20 = vpop.f32.mrb[31].mxu1 }
 0xa7f   : > { %v3216_v22 = vsel %vm621_vm3, %v3208_v19, -inf }
 0xa80   : > { %3217 = vmax.xlane.f32.xlu0 %v3216_v22 }
 0xa84   : > { %3220 = vmax.xlane.f32.xlu0 %v3219_v23 }
 0xa88   : > { %3238 = vadd.xlane.f32.xlu0 %v3237_v25 }
 0xad7   : > { %v3236_v26 = vpop.xlane.xlu1 %3235 }
 0xad8   : > { %8217 = vrcp.f32 %v3236_v26 }
 0xadb   : > { %v3255_v31 = vpop.permute.xlu1 %3254 }
 0xadc   : > { %7797 = vmatpush3.msra.mxu1 %v3255_v31 }
 0xadd   : > { %7806 = vmatprep.subr.mxu1 %v8353_v4 }
 0xadf   : > { %v3407_v36 = vpop.permute.xlu1 %3406 }
 0xae2   : > { %v8218_v32 = vpop.eup %8217 }
 0xae3   : > { %v3250_v33 = vmul.f32 %v8218_v32, %v8214_v16 }
 0xae5   : > { %7799 = vmatmul.mubr.msk.f32.vlgmr.msra.gmra.mrb[32].mxu1 %vm621_vm3, %v3250_v33 }
 0xae6   : > { %7807 = vmatpush3.msra.mxu1 %v3407_v36  ;;  %7808 = vmatprep.mubr.msk.f32.mxu1 %vm8354_vm2, %v8353_v4 }
 0xae7   : > { %7816 = vmatprep.subr.mxu1 %v613_v56 }
 0xb0d   : > { %v3218_v38 = vpop.xlane.xlu0 %3217 }
 0xb0e   : > { %v3224_v39 = vsub.f32 %v3208_v19, %v3218_v38 }
 0xb10   : > { %v3230_v40 = vmul.f32 1.442695, %v3224_v39 }
 0xb11   : > { %v3221_v42 = vpop.xlane.xlu0 %3220 }
 0xb12   : > { %8219 = vpow2.f32 %v3230_v40  ;;  %v3225_v44 = vsub.f32 %v3209_v21, %v3221_v42 }
 0xb14   : > { %v3232_v46 = vmul.f32 1.442695, %v3225_v44 }
 0xb15   : > { %v3239_v57 = vpop.xlane.xlu0 %3238 }
 0xb16   : > { %8221 = vpow2.f32 %v3232_v46 }
 0xb17   : > { %8223 = vrcp.f32 %v3239_v57 }
 0xb1c   : > { %v8220_v48 = vpop.eup %8219 }
 0xb1d   : > { %v3240_v50 = vsel %vm621_vm3, %v8220_v48, 0.0 }
 0xb1e   : > { %3241 = vadd.xlane.f32.xlu1 %v3240_v50 }
 0xb20   : > { %v8222_v52 = vpop.eup %8221 }
 0xb21   : > { %v3243_v54 = vsel %vm621_vm3, %v8222_v52, 0.0  ;;  %v8224_v60 = vpop.eup %8223 }
 0xb22   : > { %3244 = vadd.xlane.f32.xlu0 %v3243_v54  ;;  %v3251_v63 = vmul.f32 %v8224_v60, %v8216_v24 }
 0xb2f   : > { %3482 = vrot.lane.b32.xlu1 %v8550_v55, %s8360_s21 }
 0xb33   : > { %3659 = vrot.lane.b32.xlu1 %v8533_v41, %s8362_s26 }
 0xb37   : > { %3737 = vrot.lane.b32.xlu1 %v8538_v45, %s8362_s26 }
 0xb38   : > { %3330 = vrot.lane.b32.xlu0 %v8540_v47, %s8360_s21  ;;  %s8367_s21 = smov 16  }
 0xb3b   : > { %3895 = vrot.lane.b32.xlu1 %v8548_v53, %s8363_s15 }
 0xb3c   : > { %3661 = vrot.lane.b32.xlu0 %v8533_v41, %s8363_s15 }
 0xb3f   : > { %3893 = vrot.lane.b32.xlu1 %v8548_v53, %s8362_s26 }
 0xb40   : > { %3739 = vrot.lane.b32.xlu0 %v8538_v45, %s8363_s15 }
 0xb44   : > { %3817 = vrot.lane.b32.xlu0 %v8543_v49, %s8363_s15  ;;  %s6830_s15 = scalar_lea.vmem %s9293_s8, %s7269_s16 }
 0xb48   : > { %3815 = vrot.lane.b32.xlu0 %v8543_v49, %s8362_s26 }
 0xbab   : > { %v3242_v58 = vpop.xlane.xlu1 %3241 }
 0xbac   : > { %8225 = vrcp.f32 %v3242_v58 }
 0xbaf   : > { %v3245_v59 = vpop.xlane.xlu0 %3244  ;;  %v3483_v61 = vpop.permute.xlu1 %3482 }
 0xbb0   : > { %8227 = vrcp.f32 %v3245_v59 }
 0xbb3   : > { %v3331_v62 = vpop.permute.xlu0 %3330  ;;  %v3660_v3 = vpop.permute.xlu1 %3659 }
 0xbb4   : > { %7802 = vmatpush3.msra.mxu0 %v3331_v62 }
 0xbb5   : > { %7804 = vmatmul.mubr.msk.f32.vlgmr.msra.gmra.mrb[40].mxu0 %vm621_vm3, %v3251_v63  ;;  %7811 = vmatprep.subr.mxu0 %v8353_v4 }
 0xbb6   : > { %v8226_v1 = vpop.eup %8225  ;;  %7812 = vmatpush3.msra.mxu0 %v3483_v61  ;;  %7813 = vmatprep.mubr.msk.f32.mxu0 %vm8354_vm2, %v8353_v4 }
 0xbb7   : > { %v3252_v7 = vmul.f32 %v8226_v1, %v8220_v48  ;;  %7824 = vmatprep.subr.mxu0 %v8353_v4  ;;  %v3662_v11 = vpop.permute.xlu0 %3661  ;;  %v3738_v13 = vpop.permute.xlu1 %3737 }
 0xbb8   : > { %v3326_v8 = vpop.f32.mrb[32].mxu1 }
 0xbb9   : > { %v7800_v9 = vpop.f32.mrb[33].mxu1  ;;  %7809 = vmatmul.mubr.msk.f32.vlgmr.msra.gmra.mrb[34].mxu1 %vm621_vm3, %v3252_v7 }
 0xbba   : > { %v8228_v10 = vpop.eup %8227  ;;  %7818 = vmatprep.mubr.msk.f32.mxu1 %vm621_vm3, %v3326_v8  ;;  %7817 = vmatpush3.msra.mxu1 %v613_v56 }
 0xbbb   : > { %v3253_v12 = vmul.f32 %v8228_v10, %v8222_v52  ;;  %7834 = vmatprep.subr.mxu1 %v8353_v4  ;;  %v3740_v14 = vpop.permute.xlu0 %3739  ;;  %v3896_v0 = vpop.permute.xlu1 %3895 }
 0xbbd   : > { %7814 = vmatmul.mubr.msk.f32.vlgmr.msra.gmra.mrb[42].mxu0 %vm621_vm3, %v3253_v12 }
 0xbbe   : > { %7825 = vmatpush3.xpose.msk.msra.mxu0 %vm621_vm3, %v3662_v11  ;;  %7826 = vmatprep.mubr.msk.f32.mxu0 %vm8354_vm2, %v8353_v4 }
 0xbbf   : > { %7829 = vmatprep.subr.mxu0 %v8353_v4  ;;  %v3894_v15 = vpop.permute.xlu1 %3893  ;;  %v3818_v17 = vpop.permute.xlu0 %3817 }
 0xbc1   : > { %7827 = vmatmul.mubr.msk.f32.vlgmr.msra.gmra.mrb[44].mxu0 %vm621_vm3, %v3660_v3 }
 0xbc2   : > { %7830 = vmatpush3.xpose.msk.msra.mxu0 %vm621_vm3, %v3740_v14  ;;  %7831 = vmatprep.mubr.msk.f32.mxu0 %vm8354_vm2, %v8353_v4 }
 0xbc3   : > { %7839 = vmatprep.subr.mxu0 %v8353_v4  ;;  %v3816_v20 = vpop.permute.xlu0 %3815 }
 0xbc5   : > { %7832 = vmatmul.mubr.msk.f32.vlgmr.msra.gmra.mrb[46].mxu0 %vm621_vm3, %v3738_v13 }
 0xbc6   : > { %7840 = vmatpush3.xpose.msk.msra.mxu0 %vm621_vm3, %v3896_v0  ;;  %7841 = vmatprep.mubr.msk.f32.mxu0 %vm8354_vm2, %v8353_v4 }
 0xbc7   : > { %7849 = vmatprep.subr.mxu0 %v8353_v4 }
 0xbc9   : > { %7842 = vmatmul.mubr.msk.f32.vlgmr.msra.gmra.mrb[48].mxu0 %vm621_vm3, %v3894_v15 }
 0xbca   : > { %7851 = vmatprep.mubr.msk.f32.mxu0 %vm8354_vm2, %v8353_v4 }
 0xc88   : > { %v3402_v16 = vpop.f32.mrb[40].mxu0 }
 0xc89   : > { %v7805_v18 = vpop.f32.mrb[41].mxu0  ;;  %7819 = vmatmul.mubr.msk.f32.vlgmr.msra.gmra.mrb[22].mxu1 %vm621_vm3, %v3402_v16 }
 0xc8a   : > { %7835 = vmatpush3.xpose.msk.msra.mxu1 %vm621_vm3, %v3818_v17  ;;  %v614_v17 = vld [vmem:[%s8682_s20 + $0x20] sm:$0xff] }
 0xc8b   : > { %7844 = vmatprep.subr.mxu1 %v8353_v4 }
 0xc8c   : > { %v3478_v2 = vpop.f32.mrb[34].mxu1 }
 0xc8d   : > { %v7810_v5 = vpop.f32.mrb[35].mxu1  ;;  %7821 = vmatprep.mubr.msk.f32.mxu1 %vm621_vm3, %v3478_v2 }
 0xc90   : > { %v3554_v6 = vpop.f32.mrb[42].mxu0 }
 0xc91   : > { %v7815_v19 = vpop.f32.mrb[43].mxu0  ;;  %7822 = vmatmul.mubr.msk.f32.gmra.mrb[24].mxu1 %vm621_vm3, %v3554_v6 }
 0xc92   : > { %7836 = vmatprep.mubr.msk.f32.mxu1 %vm8354_vm2, %v8353_v4 }
 0xc94   : > { %v3733_v21 = vpop.f32.mrb[44].mxu0 }
 0xc95   : > { %v3971_v22 = vmul.f32 0.35355338, %v3733_v21  ;;  %v7828_v23 = vpop.f32.mrb[45].mxu0  ;;  %7837 = vmatmul.mubr.msk.f32.vlgmr.msra.gmra.mrb[36].mxu1 %vm621_vm3, %v3816_v20 }
 0xc96   : > { %7846 = vmatprep.mubr.msk.f32.mxu1 %vm8354_vm2, %v8353_v4 }
 0xc97   : > { %v3975_v24 = vsel %vm621_vm3, %v3971_v22, -inf }
 0xc98   : > { %3976 = vmax.xlane.f32.xlu0 %v3975_v24  ;;  %v3811_v25 = vpop.f32.mrb[46].mxu0 }
 0xc99   : > { %v3972_v26 = vmul.f32 0.35355338, %v3811_v25  ;;  %v7833_v31 = vpop.f32.mrb[47].mxu0 }
 0xc9b   : > { %v3978_v32 = vsel %vm621_vm3, %v3972_v26, -inf }
 0xc9c   : > { %3979 = vmax.xlane.f32.xlu1 %v3978_v32  ;;  %v3967_v33 = vpop.f32.mrb[48].mxu0 }
 0xc9d   : > { %v7843_v36 = vpop.f32.mrb[49].mxu0  ;;  %v3974_v57 = vmul.f32 0.35355338, %v3967_v33 }
 0xc9f   : > { %v3984_v59 = vsel %vm621_vm3, %v3974_v57, -inf }
 0xd25   : > { %v3977_v38 = vpop.xlane.xlu0 %3976 }
 0xd26   : > { %v3987_v39 = vsub.f32 %v3971_v22, %v3977_v38 }
 0xd28   : > { %v3991_v40 = vmul.f32 1.442695, %v3987_v39 }
 0xd29   : > { %v3980_v46 = vpop.xlane.xlu1 %3979 }
 0xd2a   : > { %8229 = vpow2.f32 %v3991_v40  ;;  %v3988_v48 = vsub.f32 %v3972_v26, %v3980_v46 }
 0xd2c   : > { %v3993_v50 = vmul.f32 1.442695, %v3988_v48 }
 0xd2e   : > { %8231 = vpow2.f32 %v3993_v50 }
 0xd34   : > { %v8230_v42 = vpop.eup %8229 }
 0xd35   : > { %v3999_v44 = vsel %vm621_vm3, %v8230_v42, 0.0 }
 0xd36   : > { %4000 = vadd.xlane.f32.xlu1 %v3999_v44 }
 0xd38   : > { %v8232_v60 = vpop.eup %8231 }
 0xd39   : > { %v4002_v61 = vsel %vm621_vm3, %v8232_v60, 0.0 }
 0xd47   : > { %4019 = vrot.lane.b32.xlu1 %v8535_v43, %s8362_s26 }
 0xd4b   : > { %4171 = vrot.lane.b32.xlu1 %v8545_v51, %s8362_s26 }
 0xd68   : > { %v3889_v52 = vpop.f32.mrb[36].mxu1 }
 0xd69   : > { %v3973_v54 = vmul.f32 0.35355338, %v3889_v52  ;;  %v7838_v56 = vpop.f32.mrb[37].mxu1 }
 0xd6b   : > { %v3981_v58 = vsel %vm621_vm3, %v3973_v54, -inf }
 0xd6c   : > { %3982 = vmax.xlane.f32.xlu0 %v3981_v58 }
 0xd70   : > { %3985 = vmax.xlane.f32.xlu0 %v3984_v59 }
 0xd74   : > { %4003 = vadd.xlane.f32.xlu0 %v4002_v61 }
 0xdc3   : > { %v4001_v62 = vpop.xlane.xlu1 %4000 }
 0xdc4   : > { %8233 = vrcp.f32 %v4001_v62 }
 0xdc7   : > { %v4020_v63 = vpop.permute.xlu1 %4019 }
 0xdc8   : > { %7845 = vmatpush3.msra.mxu1 %v4020_v63 }
 0xdc9   : > { %7854 = vmatprep.subr.mxu1 %v8353_v4 }
 0xdcb   : > { %v4172_v7 = vpop.permute.xlu1 %4171 }
 0xdce   : > { %v8234_v1 = vpop.eup %8233 }
 0xdcf   : > { %v4015_v3 = vmul.f32 %v8234_v1, %v8230_v42 }
 0xdd1   : > { %7847 = vmatmul.mubr.msk.f32.vlgmr.msra.gmra.mrb[38].mxu1 %vm621_vm3, %v4015_v3 }
 0xdd2   : > { %7855 = vmatpush3.msra.mxu1 %v4172_v7  ;;  %7856 = vmatprep.mubr.msk.f32.mxu1 %vm8354_vm2, %v8353_v4 }
 0xdd3   : > { %7864 = vmatprep.subr.mxu1 %v614_v17 }
 0xdf9   : > { %v3983_v8 = vpop.xlane.xlu0 %3982 }
 0xdfa   : > { %v3989_v9 = vsub.f32 %v3973_v54, %v3983_v8 }
 0xdfc   : > { %v3995_v10 = vmul.f32 1.442695, %v3989_v9 }
 0xdfd   : > { %v3986_v11 = vpop.xlane.xlu0 %3985 }
 0xdfe   : > { %8235 = vpow2.f32 %v3995_v10  ;;  %v3990_v12 = vsub.f32 %v3974_v57, %v3986_v11 }
 0xe00   : > { %v3997_v13 = vmul.f32 1.442695, %v3990_v12 }
 0xe01   : > { %v4004_v18 = vpop.xlane.xlu0 %4003 }
 0xe02   : > { %8237 = vpow2.f32 %v3997_v13 }
 0xe03   : > { %8239 = vrcp.f32 %v4004_v18 }
 0xe08   : > { %v8236_v14 = vpop.eup %8235 }
 0xe09   : > { %v4005_v0 = vsel %vm621_vm3, %v8236_v14, 0.0 }
 0xe0a   : > { %4006 = vadd.xlane.f32.xlu1 %v4005_v0 }
 0xe0c   : > { %v8238_v15 = vpop.eup %8237 }
 0xe0d   : > { %v4008_v16 = vsel %vm621_vm3, %v8238_v15, 0.0  ;;  %v8240_v6 = vpop.eup %8239 }
 0xe0e   : > { %4009 = vadd.xlane.f32.xlu0 %v4008_v16  ;;  %v4016_v20 = vmul.f32 %v8240_v6, %v8232_v60 }
 0xe1b   : > { %4247 = vrot.lane.b32.xlu1 %v8550_v55, %s8362_s26 }
 0xe1f   : > { %4424 = vrot.lane.b32.xlu1 %v8533_v41, %s8364_s17 }
 0xe23   : > { %4502 = vrot.lane.b32.xlu1 %v8538_v45, %s8364_s17 }
 0xe24   : > { %4095 = vrot.lane.b32.xlu0 %v8540_v47, %s8362_s26  ;;  %s8369_s26 = smov 8  }
 0xe27   : > { %4660 = vrot.lane.b32.xlu1 %v8548_v53, %s8365_s18 }
 0xe28   : > { %4426 = vrot.lane.b32.xlu0 %v8533_v41, %s8365_s18 }
 0xe2b   : > { %4658 = vrot.lane.b32.xlu1 %v8548_v53, %s8364_s17 }
 0xe2c   : > { %4504 = vrot.lane.b32.xlu0 %v8538_v45, %s8365_s18 }
 0xe30   : > { %4582 = vrot.lane.b32.xlu0 %v8543_v49, %s8365_s18  ;;  %s6735_s18 = scalar_lea.vmem %s9290_s5, %s8335_s25 }
 0xe34   : > { %4580 = vrot.lane.b32.xlu0 %v8543_v49, %s8364_s17 }
 0xe97   : > { %v4007_v2 = vpop.xlane.xlu1 %4006 }
 0xe98   : > { %8241 = vrcp.f32 %v4007_v2 }
 0xe9b   : > { %v4010_v5 = vpop.xlane.xlu0 %4009  ;;  %v4248_v19 = vpop.permute.xlu1 %4247 }
 0xe9c   : > { %8243 = vrcp.f32 %v4010_v5 }
 0xe9f   : > { %v4096_v21 = vpop.permute.xlu0 %4095  ;;  %v4425_v23 = vpop.permute.xlu1 %4424 }
 0xea0   : > { %7850 = vmatpush3.msra.mxu0 %v4096_v21 }
 0xea1   : > { %7852 = vmatmul.mubr.msk.f32.vlgmr.msra.gmra.mrb[50].mxu0 %vm621_vm3, %v4016_v20  ;;  %7859 = vmatprep.subr.mxu0 %v8353_v4 }
 0xea2   : > { %v8242_v22 = vpop.eup %8241  ;;  %7860 = vmatpush3.msra.mxu0 %v4248_v19  ;;  %7861 = vmatprep.mubr.msk.f32.mxu0 %vm8354_vm2, %v8353_v4 }
 0xea3   : > { %v4017_v24 = vmul.f32 %v8242_v22, %v8236_v14  ;;  %7872 = vmatprep.subr.mxu0 %v8353_v4  ;;  %v4427_v33 = vpop.permute.xlu0 %4426  ;;  %v4503_v36 = vpop.permute.xlu1 %4502 }
 0xea4   : > { %v4091_v25 = vpop.f32.mrb[38].mxu1 }
 0xea5   : > { %v7848_v26 = vpop.f32.mrb[39].mxu1  ;;  %7857 = vmatmul.mubr.msk.f32.vlgmr.msra.gmra.mrb[40].mxu1 %vm621_vm3, %v4017_v24 }
 0xea6   : > { %v8244_v31 = vpop.eup %8243  ;;  %7866 = vmatprep.mubr.msk.f32.mxu1 %vm621_vm3, %v4091_v25  ;;  %7865 = vmatpush3.msra.mxu1 %v614_v17 }
 0xea7   : > { %v4018_v32 = vmul.f32 %v8244_v31, %v8238_v15  ;;  %7882 = vmatprep.subr.mxu1 %v8353_v4  ;;  %v4505_v38 = vpop.permute.xlu0 %4504  ;;  %v4661_v39 = vpop.permute.xlu1 %4660 }
 0xea9   : > { %7862 = vmatmul.mubr.msk.f32.vlgmr.msra.gmra.mrb[52].mxu0 %vm621_vm3, %v4018_v32 }
 0xeaa   : > { %7873 = vmatpush3.xpose.msk.msra.mxu0 %vm621_vm3, %v4427_v33  ;;  %7874 = vmatprep.mubr.msk.f32.mxu0 %vm8354_vm2, %v8353_v4 }
 0xeab   : > { %7877 = vmatprep.subr.mxu0 %v8353_v4  ;;  %v4659_v40 = vpop.permute.xlu1 %4658  ;;  %v4583_v44 = vpop.permute.xlu0 %4582 }
 0xead   : > { %7875 = vmatmul.mubr.msk.f32.vlgmr.msra.gmra.mrb[54].mxu0 %vm621_vm3, %v4425_v23 }
 0xeae   : > { %7878 = vmatpush3.xpose.msk.msra.mxu0 %vm621_vm3, %v4505_v38  ;;  %7879 = vmatprep.mubr.msk.f32.mxu0 %vm8354_vm2, %v8353_v4 }
 0xeaf   : > { %7887 = vmatprep.subr.mxu0 %v8353_v4  ;;  %v4581_v56 = vpop.permute.xlu0 %4580 }
 0xeb1   : > { %7880 = vmatmul.mubr.msk.f32.vlgmr.msra.gmra.mrb[56].mxu0 %vm621_vm3, %v4503_v36 }
 0xeb2   : > { %7888 = vmatpush3.xpose.msk.msra.mxu0 %vm621_vm3, %v4661_v39  ;;  %7889 = vmatprep.mubr.msk.f32.mxu0 %vm8354_vm2, %v8353_v4 }
 0xeb3   : > { %7897 = vmatprep.subr.mxu0 %v8353_v4 }
 0xeb5   : > { %7890 = vmatmul.mubr.msk.f32.vlgmr.msra.gmra.mrb[58].mxu0 %vm621_vm3, %v4659_v40 }
 0xeb6   : > { %7899 = vmatprep.mubr.msk.f32.mxu0 %vm8354_vm2, %v8353_v4 }
 0xf74   : > { %v4167_v42 = vpop.f32.mrb[50].mxu0 }
 0xf75   : > { %v7853_v46 = vpop.f32.mrb[51].mxu0  ;;  %7867 = vmatmul.mubr.msk.f32.vlgmr.msra.gmra.mrb[22].mxu1 %vm621_vm3, %v4167_v42 }
 0xf76   : > { %7883 = vmatpush3.xpose.msk.msra.mxu1 %vm621_vm3, %v4583_v44  ;;  %v615_v44 = vld [vmem:[%s8682_s20 + $0x28] sm:$0xff] }
 0xf77   : > { %7892 = vmatprep.subr.mxu1 %v8353_v4 }
 0xf78   : > { %v4243_v48 = vpop.f32.mrb[40].mxu1 }
 0xf79   : > { %v7858_v50 = vpop.f32.mrb[41].mxu1  ;;  %7869 = vmatprep.mubr.msk.f32.mxu1 %vm621_vm3, %v4243_v48 }
 0xf7c   : > { %v4319_v52 = vpop.f32.mrb[52].mxu0 }
 0xf7d   : > { %v7863_v54 = vpop.f32.mrb[53].mxu0  ;;  %7870 = vmatmul.mubr.msk.f32.gmra.mrb[24].mxu1 %vm621_vm3, %v4319_v52 }
 0xf7e   : > { %7884 = vmatprep.mubr.msk.f32.mxu1 %vm8354_vm2, %v8353_v4 }
 0xf80   : > { %v4498_v57 = vpop.f32.mrb[54].mxu0 }
 0xf81   : > { %v4736_v58 = vmul.f32 0.35355338, %v4498_v57  ;;  %v7876_v59 = vpop.f32.mrb[55].mxu0  ;;  %7885 = vmatmul.mubr.msk.f32.vlgmr.msra.gmra.mrb[42].mxu1 %vm621_vm3, %v4581_v56 }
 0xf82   : > { %7894 = vmatprep.mubr.msk.f32.mxu1 %vm8354_vm2, %v8353_v4 }
 0xf83   : > { %v4740_v60 = vsel %vm621_vm3, %v4736_v58, -inf }
 0xf84   : > { %4741 = vmax.xlane.f32.xlu0 %v4740_v60  ;;  %v4576_v61 = vpop.f32.mrb[56].mxu0 }
 0xf85   : > { %v4737_v62 = vmul.f32 0.35355338, %v4576_v61  ;;  %v7881_v63 = vpop.f32.mrb[57].mxu0 }
 0xf87   : > { %v4743_v1 = vsel %vm621_vm3, %v4737_v62, -inf }
 0xf88   : > { %4744 = vmax.xlane.f32.xlu1 %v4743_v1  ;;  %v4732_v3 = vpop.f32.mrb[58].mxu0 }
 0xf89   : > { %v7891_v7 = vpop.f32.mrb[59].mxu0  ;;  %v4739_v18 = vmul.f32 0.35355338, %v4732_v3 }
 0xf8b   : > { %v4749_v5 = vsel %vm621_vm3, %v4739_v18, -inf }
0x1011   : > { %v4742_v8 = vpop.xlane.xlu0 %4741 }
0x1012   : > { %v4752_v9 = vsub.f32 %v4736_v58, %v4742_v8 }
0x1014   : > { %v4756_v10 = vmul.f32 1.442695, %v4752_v9 }
0x1015   : > { %v4745_v13 = vpop.xlane.xlu1 %4744 }
0x1016   : > { %8245 = vpow2.f32 %v4756_v10  ;;  %v4753_v14 = vsub.f32 %v4737_v62, %v4745_v13 }
0x1018   : > { %v4758_v0 = vmul.f32 1.442695, %v4753_v14 }
0x101a   : > { %8247 = vpow2.f32 %v4758_v0 }
0x1020   : > { %v8246_v11 = vpop.eup %8245 }
0x1021   : > { %v4764_v12 = vsel %vm621_vm3, %v8246_v11, 0.0 }
0x1022   : > { %4765 = vadd.xlane.f32.xlu1 %v4764_v12 }
0x1024   : > { %v8248_v6 = vpop.eup %8247 }
0x1025   : > { %v4767_v19 = vsel %vm621_vm3, %v8248_v6, 0.0 }
0x1033   : > { %4784 = vrot.lane.b32.xlu1 %v8535_v43, %s8364_s17 }
0x1037   : > { %4936 = vrot.lane.b32.xlu1 %v8545_v51, %s8364_s17 }
0x1054   : > { %v4654_v15 = vpop.f32.mrb[42].mxu1 }
0x1055   : > { %v4738_v16 = vmul.f32 0.35355338, %v4654_v15  ;;  %v7886_v17 = vpop.f32.mrb[43].mxu1 }
0x1057   : > { %v4746_v2 = vsel %vm621_vm3, %v4738_v16, -inf }
0x1058   : > { %4747 = vmax.xlane.f32.xlu0 %v4746_v2 }
0x105c   : > { %4750 = vmax.xlane.f32.xlu0 %v4749_v5 }
0x1060   : > { %4768 = vadd.xlane.f32.xlu0 %v4767_v19 }
0x10af   : > { %v4766_v20 = vpop.xlane.xlu1 %4765 }
0x10b0   : > { %8249 = vrcp.f32 %v4766_v20 }
0x10b3   : > { %v4785_v21 = vpop.permute.xlu1 %4784 }
0x10b4   : > { %7893 = vmatpush3.msra.mxu1 %v4785_v21 }
0x10b5   : > { %7902 = vmatprep.subr.mxu1 %v8353_v4 }
0x10b7   : > { %v4937_v24 = vpop.permute.xlu1 %4936 }
0x10ba   : > { %v8250_v22 = vpop.eup %8249 }
0x10bb   : > { %v4780_v23 = vmul.f32 %v8250_v22, %v8246_v11 }
0x10bd   : > { %7895 = vmatmul.mubr.msk.f32.vlgmr.msra.gmra.mrb[44].mxu1 %vm621_vm3, %v4780_v23 }
0x10be   : > { %7903 = vmatpush3.msra.mxu1 %v4937_v24  ;;  %7904 = vmatprep.mubr.msk.f32.mxu1 %vm8354_vm2, %v8353_v4 }
0x10bf   : > { %7912 = vmatprep.subr.mxu1 %v615_v44 }
0x10e5   : > { %v4748_v25 = vpop.xlane.xlu0 %4747 }
0x10e6   : > { %v4754_v26 = vsub.f32 %v4738_v16, %v4748_v25 }
0x10e8   : > { %v4760_v31 = vmul.f32 1.442695, %v4754_v26 }
0x10e9   : > { %v4751_v32 = vpop.xlane.xlu0 %4750 }
0x10ea   : > { %8251 = vpow2.f32 %v4760_v31  ;;  %v4755_v33 = vsub.f32 %v4739_v18, %v4751_v32 }
0x10ec   : > { %v4762_v36 = vmul.f32 1.442695, %v4755_v33 }
0x10ed   : > { %v4769_v46 = vpop.xlane.xlu0 %4768 }
0x10ee   : > { %8253 = vpow2.f32 %v4762_v36 }
0x10ef   : > { %8255 = vrcp.f32 %v4769_v46 }
0x10f4   : > { %v8252_v38 = vpop.eup %8251 }
0x10f5   : > { %v4770_v39 = vsel %vm621_vm3, %v8252_v38, 0.0 }
0x10f6   : > { %4771 = vadd.xlane.f32.xlu1 %v4770_v39 }
0x10f8   : > { %v8254_v40 = vpop.eup %8253 }
0x10f9   : > { %v4773_v42 = vsel %vm621_vm3, %v8254_v40, 0.0  ;;  %v8256_v52 = vpop.eup %8255 }
0x10fa   : > { %4774 = vadd.xlane.f32.xlu0 %v4773_v42  ;;  %v4781_v56 = vmul.f32 %v8256_v52, %v8248_v6 }
0x1107   : > { %5012 = vrot.lane.b32.xlu1 %v8550_v55, %s8364_s17 }
0x110b   : > { %5189 = vrot.lane.b32.xlu1 %v8533_v41, %s8366_s19 }
0x110f   : > { %5267 = vrot.lane.b32.xlu1 %v8538_v45, %s8366_s19 }
0x1110   : > { %4860 = vrot.lane.b32.xlu0 %v8540_v47, %s8364_s17  ;;  %s6719_s17 = scalar_lea.vmem %s9289_s4, %s8335_s25 }
0x1113   : > { %5425 = vrot.lane.b32.xlu1 %v8548_v53, %s8367_s21 }
0x1114   : > { %5191 = vrot.lane.b32.xlu0 %v8533_v41, %s8367_s21 }
0x1117   : > { %5423 = vrot.lane.b32.xlu1 %v8548_v53, %s8366_s19 }
0x1118   : > { %5269 = vrot.lane.b32.xlu0 %v8538_v45, %s8367_s21 }
0x111c   : > { %5347 = vrot.lane.b32.xlu0 %v8543_v49, %s8367_s21  ;;  %s6813_s21 = scalar_lea.vmem %s9292_s7, %s7418_s23  ;;  %s7411_s23 = sshll.u32 %s8335_s25, 8 }
0x1120   : > { %5345 = vrot.lane.b32.xlu0 %v8543_v49, %s8366_s19 }
0x1183   : > { %v4772_v48 = vpop.xlane.xlu1 %4771 }
0x1184   : > { %8257 = vrcp.f32 %v4772_v48 }
0x1187   : > { %v4775_v50 = vpop.xlane.xlu0 %4774  ;;  %v5013_v54 = vpop.permute.xlu1 %5012 }
0x1188   : > { %8259 = vrcp.f32 %v4775_v50 }
0x118b   : > { %v4861_v57 = vpop.permute.xlu0 %4860  ;;  %v5190_v59 = vpop.permute.xlu1 %5189 }
0x118c   : > { %7898 = vmatpush3.msra.mxu0 %v4861_v57 }
0x118d   : > { %7900 = vmatmul.mubr.msk.f32.vlgmr.msra.gmra.mrb[60].mxu0 %vm621_vm3, %v4781_v56  ;;  %7907 = vmatprep.subr.mxu0 %v8353_v4 }
0x118e   : > { %v8258_v58 = vpop.eup %8257  ;;  %7908 = vmatpush3.msra.mxu0 %v5013_v54  ;;  %7909 = vmatprep.mubr.msk.f32.mxu0 %vm8354_vm2, %v8353_v4 }
0x118f   : > { %v4782_v60 = vmul.f32 %v8258_v58, %v8252_v38  ;;  %7920 = vmatprep.subr.mxu0 %v8353_v4  ;;  %v5192_v3 = vpop.permute.xlu0 %5191  ;;  %v5268_v7 = vpop.permute.xlu1 %5267 }
0x1190   : > { %v4856_v61 = vpop.f32.mrb[44].mxu1 }
0x1191   : > { %v7896_v62 = vpop.f32.mrb[45].mxu1  ;;  %7905 = vmatmul.mubr.msk.f32.vlgmr.msra.gmra.mrb[46].mxu1 %vm621_vm3, %v4782_v60 }
0x1192   : > { %v8260_v63 = vpop.eup %8259  ;;  %7914 = vmatprep.mubr.msk.f32.mxu1 %vm621_vm3, %v4856_v61  ;;  %7913 = vmatpush3.msra.mxu1 %v615_v44 }
0x1193   : > { %v4783_v1 = vmul.f32 %v8260_v63, %v8254_v40  ;;  %7930 = vmatprep.subr.mxu1 %v8353_v4  ;;  %v5270_v8 = vpop.permute.xlu0 %5269  ;;  %v5426_v9 = vpop.permute.xlu1 %5425 }
0x1195   : > { %7910 = vmatmul.mubr.msk.f32.vlgmr.msra.gmra.mrb[62].mxu0 %vm621_vm3, %v4783_v1 }
0x1196   : > { %7921 = vmatpush3.xpose.msk.msra.mxu0 %vm621_vm3, %v5192_v3  ;;  %7922 = vmatprep.mubr.msk.f32.mxu0 %vm8354_vm2, %v8353_v4 }
0x1197   : > { %7925 = vmatprep.subr.mxu0 %v8353_v4  ;;  %v5424_v10 = vpop.permute.xlu1 %5423  ;;  %v5348_v12 = vpop.permute.xlu0 %5347 }
0x1199   : > { %7923 = vmatmul.mubr.msk.f32.vlgmr.msra.gmra.mrb[64].mxu0 %vm621_vm3, %v5190_v59 }
0x119a   : > { %7926 = vmatpush3.xpose.msk.msra.mxu0 %vm621_vm3, %v5270_v8  ;;  %7927 = vmatprep.mubr.msk.f32.mxu0 %vm8354_vm2, %v8353_v4 }
0x119b   : > { %7935 = vmatprep.subr.mxu0 %v8353_v4  ;;  %v5346_v17 = vpop.permute.xlu0 %5345 }
0x119d   : > { %7928 = vmatmul.mubr.msk.f32.vlgmr.msra.gmra.mrb[66].mxu0 %vm621_vm3, %v5268_v7 }
0x119e   : > { %7936 = vmatpush3.xpose.msk.msra.mxu0 %vm621_vm3, %v5426_v9  ;;  %7937 = vmatprep.mubr.msk.f32.mxu0 %vm8354_vm2, %v8353_v4 }
0x119f   : > { %7945 = vmatprep.subr.mxu0 %v8353_v4 }
0x11a1   : > { %7938 = vmatmul.mubr.msk.f32.vlgmr.msra.gmra.mrb[68].mxu0 %vm621_vm3, %v5424_v10 }
0x11a2   : > { %7947 = vmatprep.mubr.msk.f32.mxu0 %vm8354_vm2, %v8353_v4 }
0x1260   : > { %v4932_v11 = vpop.f32.mrb[60].mxu0 }
0x1261   : > { %v7901_v13 = vpop.f32.mrb[61].mxu0  ;;  %7915 = vmatmul.mubr.msk.f32.vlgmr.msra.gmra.mrb[22].mxu1 %vm621_vm3, %v4932_v11 }
0x1262   : > { %7931 = vmatpush3.xpose.msk.msra.mxu1 %vm621_vm3, %v5348_v12  ;;  %v616_v12 = vld [vmem:[%s8682_s20 + $0x30] sm:$0xff] }
0x1263   : > { %7940 = vmatprep.subr.mxu1 %v8353_v4 }
0x1264   : > { %v5008_v14 = vpop.f32.mrb[46].mxu1 }
0x1265   : > { %v7906_v0 = vpop.f32.mrb[47].mxu1  ;;  %7917 = vmatprep.mubr.msk.f32.mxu1 %vm621_vm3, %v5008_v14 }
0x1268   : > { %v5084_v15 = vpop.f32.mrb[62].mxu0 }
0x1269   : > { %v7911_v16 = vpop.f32.mrb[63].mxu0  ;;  %7918 = vmatmul.mubr.msk.f32.gmra.mrb[24].mxu1 %vm621_vm3, %v5084_v15 }
0x126a   : > { %7932 = vmatprep.mubr.msk.f32.mxu1 %vm8354_vm2, %v8353_v4 }
0x126c   : > { %v5263_v18 = vpop.f32.mrb[64].mxu0 }
0x126d   : > { %v5501_v2 = vmul.f32 0.35355338, %v5263_v18  ;;  %v7924_v5 = vpop.f32.mrb[65].mxu0  ;;  %7933 = vmatmul.mubr.msk.f32.vlgmr.msra.gmra.mrb[48].mxu1 %vm621_vm3, %v5346_v17 }
0x126e   : > { %7942 = vmatprep.mubr.msk.f32.mxu1 %vm8354_vm2, %v8353_v4 }
0x126f   : > { %v5505_v6 = vsel %vm621_vm3, %v5501_v2, -inf }
0x1270   : > { %5506 = vmax.xlane.f32.xlu0 %v5505_v6  ;;  %v5341_v19 = vpop.f32.mrb[66].mxu0 }
0x1271   : > { %v5502_v20 = vmul.f32 0.35355338, %v5341_v19  ;;  %v7929_v21 = vpop.f32.mrb[67].mxu0 }
0x1273   : > { %v5508_v22 = vsel %vm621_vm3, %v5502_v20, -inf }
0x1274   : > { %5509 = vmax.xlane.f32.xlu1 %v5508_v22  ;;  %v5497_v23 = vpop.f32.mrb[68].mxu0 }
0x1275   : > { %v7939_v24 = vpop.f32.mrb[69].mxu0  ;;  %v5504_v46 = vmul.f32 0.35355338, %v5497_v23 }
0x1277   : > { %v5514_v50 = vsel %vm621_vm3, %v5504_v46, -inf }
0x12fd   : > { %v5507_v25 = vpop.xlane.xlu0 %5506 }
0x12fe   : > { %v5517_v26 = vsub.f32 %v5501_v2, %v5507_v25 }
0x1300   : > { %v5521_v31 = vmul.f32 1.442695, %v5517_v26 }
0x1301   : > { %v5510_v36 = vpop.xlane.xlu1 %5509 }
0x1302   : > { %8261 = vpow2.f32 %v5521_v31  ;;  %v5518_v38 = vsub.f32 %v5502_v20, %v5510_v36 }
0x1304   : > { %v5523_v39 = vmul.f32 1.442695, %v5518_v38 }
0x1306   : > { %8263 = vpow2.f32 %v5523_v39 }
0x130c   : > { %v8262_v32 = vpop.eup %8261 }
0x130d   : > { %v5529_v33 = vsel %vm621_vm3, %v8262_v32, 0.0 }
0x130e   : > { %5530 = vadd.xlane.f32.xlu1 %v5529_v33 }
0x1310   : > { %v8264_v52 = vpop.eup %8263 }
0x1311   : > { %v5532_v54 = vsel %vm621_vm3, %v8264_v52, 0.0 }
0x131f   : > { %5549 = vrot.lane.b32.xlu1 %v8535_v43, %s8366_s19 }
0x1323   : > { %5701 = vrot.lane.b32.xlu1 %v8545_v51, %s8366_s19 }
0x1340   : > { %v5419_v40 = vpop.f32.mrb[48].mxu1 }
0x1341   : > { %v5503_v42 = vmul.f32 0.35355338, %v5419_v40  ;;  %v7934_v44 = vpop.f32.mrb[49].mxu1 }
0x1343   : > { %v5511_v48 = vsel %vm621_vm3, %v5503_v42, -inf }
0x1344   : > { %5512 = vmax.xlane.f32.xlu0 %v5511_v48 }
0x1348   : > { %5515 = vmax.xlane.f32.xlu0 %v5514_v50 }
0x134c   : > { %5533 = vadd.xlane.f32.xlu0 %v5532_v54 }
0x139b   : > { %v5531_v56 = vpop.xlane.xlu1 %5530 }
0x139c   : > { %8265 = vrcp.f32 %v5531_v56 }
0x139f   : > { %v5550_v57 = vpop.permute.xlu1 %5549 }
0x13a0   : > { %7941 = vmatpush3.msra.mxu1 %v5550_v57 }
0x13a1   : > { %7950 = vmatprep.subr.mxu1 %v8353_v4 }
0x13a3   : > { %v5702_v60 = vpop.permute.xlu1 %5701 }
0x13a6   : > { %v8266_v58 = vpop.eup %8265 }
0x13a7   : > { %v5545_v59 = vmul.f32 %v8266_v58, %v8262_v32 }
0x13a9   : > { %7943 = vmatmul.mubr.msk.f32.vlgmr.msra.gmra.mrb[50].mxu1 %vm621_vm3, %v5545_v59 }
0x13aa   : > { %7951 = vmatpush3.msra.mxu1 %v5702_v60  ;;  %7952 = vmatprep.mubr.msk.f32.mxu1 %vm8354_vm2, %v8353_v4 }
0x13ab   : > { %7960 = vmatprep.subr.mxu1 %v616_v12 }
0x13d1   : > { %v5513_v61 = vpop.xlane.xlu0 %5512 }
0x13d2   : > { %v5519_v62 = vsub.f32 %v5503_v42, %v5513_v61 }
0x13d4   : > { %v5525_v63 = vmul.f32 1.442695, %v5519_v62 }
0x13d5   : > { %v5516_v1 = vpop.xlane.xlu0 %5515 }
0x13d6   : > { %8267 = vpow2.f32 %v5525_v63  ;;  %v5520_v3 = vsub.f32 %v5504_v46, %v5516_v1 }
0x13d8   : > { %v5527_v7 = vmul.f32 1.442695, %v5520_v3 }
0x13d9   : > { %v5534_v13 = vpop.xlane.xlu0 %5533 }
0x13da   : > { %8269 = vpow2.f32 %v5527_v7 }
0x13db   : > { %8271 = vrcp.f32 %v5534_v13 }
0x13e0   : > { %v8268_v8 = vpop.eup %8267 }
0x13e1   : > { %v5535_v9 = vsel %vm621_vm3, %v8268_v8, 0.0 }
0x13e2   : > { %5536 = vadd.xlane.f32.xlu1 %v5535_v9 }
0x13e4   : > { %v8270_v10 = vpop.eup %8269 }
0x13e5   : > { %v5538_v11 = vsel %vm621_vm3, %v8270_v10, 0.0  ;;  %v8272_v15 = vpop.eup %8271 }
0x13e6   : > { %5539 = vadd.xlane.f32.xlu0 %v5538_v11 }
0x13f3   : > { %5777 = vrot.lane.b32.xlu1 %v8550_v55, %s8366_s19 }
0x13f7   : > { %5954 = vrot.lane.b32.xlu1 %v8533_v41, %s8368_s24 }
0x13fb   : > { %6032 = vrot.lane.b32.xlu1 %v8538_v45, %s8368_s24 }
0x13fc   : > { %5625 = vrot.lane.b32.xlu0 %v8540_v47, %s8366_s19 }
0x13ff   : > { %6190 = vrot.lane.b32.xlu1 %v8548_v53, %s8369_s26 }
0x1400   : > { %5956 = vrot.lane.b32.xlu0 %v8533_v41, %s8369_s26  ;;  %v5546_v41 = vmul.f32 %v8272_v15, %v8264_v52 }
0x1403   : > { %6188 = vrot.lane.b32.xlu1 %v8548_v53, %s8368_s24 }
0x1404   : > { %6034 = vrot.lane.b32.xlu0 %v8538_v45, %s8369_s26 }
0x1408   : > { %6112 = vrot.lane.b32.xlu0 %v8543_v49, %s8369_s26  ;;  %s7085_s26 = scalar_lea.vmem %s9297_s12, %s8335_s25 }
0x140c   : > { %6110 = vrot.lane.b32.xlu0 %v8543_v49, %s8368_s24 }
0x146f   : > { %v5537_v14 = vpop.xlane.xlu1 %5536 }
0x1470   : > { %8273 = vrcp.f32 %v5537_v14 }
0x1473   : > { %v5540_v0 = vpop.xlane.xlu0 %5539  ;;  %v5778_v16 = vpop.permute.xlu1 %5777 }
0x1474   : > { %8275 = vrcp.f32 %v5540_v0 }
0x1477   : > { %v5626_v17 = vpop.permute.xlu0 %5625  ;;  %v5955_v53 = vpop.permute.xlu1 %5954 }
0x1478   : > { %7946 = vmatpush3.msra.mxu0 %v5626_v17 }
0x1479   : > { %7948 = vmatmul.mubr.msk.f32.vlgmr.msra.gmra.mrb[70].mxu0 %vm621_vm3, %v5546_v41  ;;  %7955 = vmatprep.subr.mxu0 %v8353_v4 }
0x147a   : > { %v8274_v45 = vpop.eup %8273  ;;  %7956 = vmatpush3.msra.mxu0 %v5778_v16  ;;  %7957 = vmatprep.mubr.msk.f32.mxu0 %vm8354_vm2, %v8353_v4 }
0x147b   : > { %v5547_v49 = vmul.f32 %v8274_v45, %v8268_v8  ;;  %7968 = vmatprep.subr.mxu0 %v8353_v4  ;;  %v5957_v19 = vpop.permute.xlu0 %5956  ;;  %v6033_v20 = vpop.permute.xlu1 %6032 }
0x147c   : > { %v5621_v18 = vpop.f32.mrb[50].mxu1 }
0x147d   : > { %v7944_v2 = vpop.f32.mrb[51].mxu1  ;;  %7953 = vmatmul.mubr.msk.f32.vlgmr.msra.gmra.mrb[52].mxu1 %vm621_vm3, %v5547_v49 }
0x147e   : > { %v8276_v5 = vpop.eup %8275  ;;  %7962 = vmatprep.mubr.msk.f32.mxu1 %vm621_vm3, %v5621_v18  ;;  %7961 = vmatpush3.msra.mxu1 %v616_v12 }
0x147f   : > { %v5548_v6 = vmul.f32 %v8276_v5, %v8270_v10  ;;  %7978 = vmatprep.subr.mxu1 %v8353_v4  ;;  %v6035_v21 = vpop.permute.xlu0 %6034  ;;  %v6191_v22 = vpop.permute.xlu1 %6190 }
0x1481   : > { %7958 = vmatmul.mubr.msk.f32.vlgmr.msra.gmra.mrb[72].mxu0 %vm621_vm3, %v5548_v6 }
0x1482   : > { %7969 = vmatpush3.xpose.msk.msra.mxu0 %vm621_vm3, %v5957_v19  ;;  %7970 = vmatprep.mubr.msk.f32.mxu0 %vm8354_vm2, %v8353_v4  ;;  %v617_v19 = vld [vmem:[%s8682_s20 + $0x38] sm:$0xff]  ;;  %s9159_s20 = scalar_lea.vmem %s9294_s9, %s7411_s23  ;;  %s6737_s23 = scalar_lea.vmem %s9291_s6, %s8335_s25 }
0x1483   : > { %7973 = vmatprep.subr.mxu0 %v8353_v4  ;;  %v6189_v23 = vpop.permute.xlu1 %6188  ;;  %v6113_v25 = vpop.permute.xlu0 %6112 }
0x1485   : > { %7971 = vmatmul.mubr.msk.f32.vlgmr.msra.gmra.mrb[74].mxu0 %vm621_vm3, %v5955_v53 }
0x1486   : > { %7974 = vmatpush3.xpose.msk.msra.mxu0 %vm621_vm3, %v6035_v21  ;;  %7975 = vmatprep.mubr.msk.f32.mxu0 %vm8354_vm2, %v8353_v4 }
0x1487   : > { %7983 = vmatprep.subr.mxu0 %v8353_v4  ;;  %v6111_v38 = vpop.permute.xlu0 %6110 }
0x1489   : > { %7976 = vmatmul.mubr.msk.f32.vlgmr.msra.gmra.mrb[76].mxu0 %vm621_vm3, %v6033_v20 }
0x148a   : > { %7984 = vmatpush3.xpose.msk.msra.mxu0 %vm621_vm3, %v6191_v22  ;;  %7985 = vmatprep.mubr.msk.f32.mxu0 %vm8354_vm2, %v8353_v4 }
0x148b   : > { %7993 = vmatprep.subr.mxu0 %v8353_v4 }
0x148d   : > { %7986 = vmatmul.mubr.msk.f32.vlgmr.msra.gmra.mrb[78].mxu0 %vm621_vm3, %v6189_v23 }
0x148e   : > { %7995 = vmatprep.mubr.msk.f32.mxu0 %vm8354_vm2, %v8353_v4 }
0x154c   : > { %v5697_v24 = vpop.f32.mrb[70].mxu0 }
0x154d   : > { %v7949_v26 = vpop.f32.mrb[71].mxu0  ;;  %7963 = vmatmul.mubr.msk.f32.vlgmr.msra.gmra.mrb[22].mxu1 %vm621_vm3, %v5697_v24 }
0x154e   : > { %7979 = vmatpush3.xpose.msk.msra.mxu1 %vm621_vm3, %v6113_v25 }
0x154f   : > { %7988 = vmatprep.subr.mxu1 %v8353_v4 }
0x1550   : > { %v5773_v31 = vpop.f32.mrb[52].mxu1 }
0x1551   : > { %v7954_v32 = vpop.f32.mrb[53].mxu1  ;;  %7965 = vmatprep.mubr.msk.f32.mxu1 %vm621_vm3, %v5773_v31 }
0x1554   : > { %v5849_v33 = vpop.f32.mrb[72].mxu0 }
0x1555   : > { %v7959_v36 = vpop.f32.mrb[73].mxu0  ;;  %7966 = vmatmul.mubr.msk.f32.gmra.mrb[24].mxu1 %vm621_vm3, %v5849_v33 }
0x1556   : > { %7980 = vmatprep.mubr.msk.f32.mxu1 %vm8354_vm2, %v8353_v4 }
0x1558   : > { %v6028_v39 = vpop.f32.mrb[74].mxu0 }
0x1559   : > { %v6266_v40 = vmul.f32 0.35355338, %v6028_v39  ;;  %v7972_v42 = vpop.f32.mrb[75].mxu0  ;;  %7981 = vmatmul.mubr.msk.f32.vlgmr.msra.gmra.mrb[54].mxu1 %vm621_vm3, %v6111_v38 }
0x155a   : > { %7990 = vmatprep.mubr.msk.f32.mxu1 %vm8354_vm2, %v8353_v4 }
0x155b   : > { %v6270_v44 = vsel %vm621_vm3, %v6266_v40, -inf }
0x155c   : > { %6271 = vmax.xlane.f32.xlu0 %v6270_v44  ;;  %v6106_v46 = vpop.f32.mrb[76].mxu0 }
0x155d   : > { %v6267_v48 = vmul.f32 0.35355338, %v6106_v46  ;;  %v7977_v50 = vpop.f32.mrb[77].mxu0 }
0x155e   : > { %v7403_v50 = vld [vmem:[%s6719_s17] ss:$0 sm:$0xff]  ;;  %s6986_s17 = scalar_lea.vmem %s9295_s10, %s8335_s25 }
0x155f   : > { %v6273_v52 = vsel %vm621_vm3, %v6267_v48, -inf }
0x1560   : > { %6274 = vmax.xlane.f32.xlu1 %v6273_v52  ;;  %v6262_v54 = vpop.f32.mrb[78].mxu0 }
0x1561   : > { %v7987_v56 = vpop.f32.mrb[79].mxu0  ;;  %v6269_v9 = vmul.f32 0.35355338, %v6262_v54 }
0x1563   : > { %v6279_v11 = vsel %vm621_vm3, %v6269_v9, -inf }
0x15e9   : > { %v6272_v57 = vpop.xlane.xlu0 %6271 }
0x15ea   : > { %v6282_v58 = vsub.f32 %v6266_v40, %v6272_v57 }
0x15ec   : > { %v6286_v59 = vmul.f32 1.442695, %v6282_v58 }
0x15ed   : > { %v6275_v62 = vpop.xlane.xlu1 %6274 }
0x15ee   : > { %8277 = vpow2.f32 %v6286_v59  ;;  %v6283_v63 = vsub.f32 %v6267_v48, %v6275_v62  ;;  %v8309_v59 = vld [vmem:[#allocation2 + $0x8] sm:$0xff] }
0x15f0   : > { %v6288_v1 = vmul.f32 1.442695, %v6283_v63 }
0x15f2   : > { %8279 = vpow2.f32 %v6288_v1 }
0x15f8   : > { %v8278_v60 = vpop.eup %8277 }
0x15f9   : > { %v6294_v61 = vsel %vm621_vm3, %v8278_v60, 0.0 }
0x15fa   : > { %6295 = vadd.xlane.f32.xlu1 %v6294_v61  ;;  %v8310_v61 = vld [vmem:[#allocation2] sm:$0xff] }
0x15fc   : > { %v8280_v12 = vpop.eup %8279 }
0x160b   : > { %6314 = vrot.lane.b32.xlu1 %v8535_v43, %s8368_s24  ;;  %v6297_v43 = vsel %vm621_vm3, %v8280_v12, 0.0 }
0x160f   : > { %6466 = vrot.lane.b32.xlu1 %v8545_v51, %s8368_s24 }
0x162c   : > { %v6184_v3 = vpop.f32.mrb[54].mxu1 }
0x162d   : > { %v6268_v7 = vmul.f32 0.35355338, %v6184_v3  ;;  %v7982_v8 = vpop.f32.mrb[55].mxu1 }
0x162f   : > { %v6276_v10 = vsel %vm621_vm3, %v6268_v7, -inf }
0x1630   : > { %6277 = vmax.xlane.f32.xlu0 %v6276_v10  ;;  %v8311_v10 = vld [vmem:[#allocation2 + $0x10] sm:$0xff] }
0x1634   : > { %6280 = vmax.xlane.f32.xlu0 %v6279_v11 }
0x1638   : > { %6298 = vadd.xlane.f32.xlu0 %v6297_v43  ;;  %v8312_v43 = vld [vmem:[#allocation2 + $0x18] sm:$0xff] }
0x1687   : > { %v6296_v13 = vpop.xlane.xlu1 %6295 }
0x1688   : > { %8281 = vrcp.f32 %v6296_v13 }
0x168b   : > { %v6315_v51 = vpop.permute.xlu1 %6314 }
0x168c   : > { %7989 = vmatpush3.msra.mxu1 %v6315_v51 }
0x168d   : > { %7998 = vmatprep.subr.mxu1 %v8353_v4 }
0x168f   : > { %v6467_v15 = vpop.permute.xlu1 %6466 }
0x1692   : > { %v8282_v14 = vpop.eup %8281 }
0x1693   : > { %v6310_v0 = vmul.f32 %v8282_v14, %v8278_v60 }
0x1695   : > { %7991 = vmatmul.mubr.msk.f32.vlgmr.msra.gmra.mrb[56].mxu1 %vm621_vm3, %v6310_v0 }
0x1696   : > { %7999 = vmatpush3.msra.mxu1 %v6467_v15  ;;  %8000 = vmatprep.mubr.msk.f32.mxu1 %vm8354_vm2, %v8353_v4 }
0x1697   : > { %8008 = vmatprep.subr.mxu1 %v617_v19 }
0x16bd   : > { %v6278_v16 = vpop.xlane.xlu0 %6277 }
0x16be   : > { %v6284_v41 = vsub.f32 %v6268_v7, %v6278_v16 }
0x16c0   : > { %v6290_v17 = vmul.f32 1.442695, %v6284_v41 }
0x16c1   : > { %v6281_v45 = vpop.xlane.xlu0 %6280 }
0x16c2   : > { %8283 = vpow2.f32 %v6290_v17  ;;  %v6285_v53 = vsub.f32 %v6269_v9, %v6281_v45 }
0x16c4   : > { %v6292_v49 = vmul.f32 1.442695, %v6285_v53 }
0x16c5   : > { %v6299_v20 = vpop.xlane.xlu0 %6298 }
0x16c6   : > { %8285 = vpow2.f32 %v6292_v49 }
0x16c7   : > { %8287 = vrcp.f32 %v6299_v20 }
0x16cc   : > { %v8284_v18 = vpop.eup %8283 }
0x16cd   : > { %v6300_v2 = vsel %vm621_vm3, %v8284_v18, 0.0 }
0x16ce   : > { %6301 = vadd.xlane.f32.xlu1 %v6300_v2 }
0x16d0   : > { %v8286_v5 = vpop.eup %8285 }
0x16d1   : > { %v6303_v6 = vsel %vm621_vm3, %v8286_v5, 0.0  ;;  %v8288_v23 = vpop.eup %8287 }
0x16d2   : > { %6304 = vadd.xlane.f32.xlu0 %v6303_v6  ;;  %v6311_v24 = vmul.f32 %v8288_v23, %v8280_v12 }
0x16df   : > { %6542 = vrot.lane.b32.xlu1 %v8550_v55, %s8368_s24 }
0x16e8   : > { %6390 = vrot.lane.b32.xlu0 %v8540_v47, %s8368_s24 }
0x175b   : > { %v6302_v21 = vpop.xlane.xlu1 %6301 }
0x175c   : > { %8289 = vrcp.f32 %v6302_v21 }
0x175f   : > { %v6305_v22 = vpop.xlane.xlu0 %6304  ;;  %v6543_v26 = vpop.permute.xlu1 %6542 }
0x1760   : > { %8291 = vrcp.f32 %v6305_v22 }
0x1763   : > { %v6391_v25 = vpop.permute.xlu0 %6390 }
0x1764   : > { %7994 = vmatpush3.msra.mxu0 %v6391_v25  ;;  %v6817_v25 = vld [vmem:[%s6813_s21 + $0x18] sm:$0xff] }
0x1765   : > { %7996 = vmatmul.mubr.msk.f32.vlgmr.msra.gmra.mrb[80].mxu0 %vm621_vm3, %v6311_v24  ;;  %8003 = vmatprep.subr.mxu0 %v8353_v4  ;;  %v6815_v24 = vld [vmem:[%s6813_s21 + $0x8] sm:$0xff] }
0x1766   : > { %v8290_v55 = vpop.eup %8289  ;;  %8004 = vmatpush3.msra.mxu0 %v6543_v26  ;;  %8005 = vmatprep.mubr.msk.f32.mxu0 %vm8354_vm2, %v8353_v4  ;;  %v8032_v26 = vpack.c.bf16 %v6817_v25, %v6815_v24  ;;  %v6964_v25 = vld [vmem:[%s9159_s20 + $0x50] sm:$0xff] }
0x1767   : > { %v6312_v47 = vmul.f32 %v8290_v55, %v8284_v18  ;;  %v6814_v55 = vld [vmem:[%s6813_s21] sm:$0xff] }
0x1768   : > { %v6386_v31 = vpop.f32.mrb[56].mxu1  ;;  %8033 = vmatprep.subr.bf16.mxu0 %v8032_v26  ;;  %v6965_v26 = vld [vmem:[%s9159_s20 + $0x58] sm:$0xff] }
0x1769   : > { %v7992_v32 = vpop.f32.mrb[57].mxu1  ;;  %8001 = vmatmul.mubr.msk.f32.vlgmr.msra.gmra.mrb[58].mxu1 %vm621_vm3, %v6312_v47  ;;  %v6816_v47 = vld [vmem:[%s6813_s21 + $0x10] sm:$0xff] }
0x176a   : > { %v8292_v33 = vpop.eup %8291  ;;  %8010 = vmatprep.mubr.msk.f32.mxu1 %vm621_vm3, %v6386_v31  ;;  %8009 = vmatpush3.msra.mxu1 %v617_v19  ;;  %v8034_v31 = vpack.c.bf16 %v6816_v47, %v6814_v55  ;;  %v6819_v32 = vld [vmem:[%s6813_s21 + $0x28] sm:$0xff]  ;;  %v6982_v55 = vld [vmem:[%s9159_s20 + $0xe0] sm:$0xff] }
0x176b   : > { %v6313_v36 = vmul.f32 %v8292_v33, %v8286_v5  ;;  %v6821_v33 = vld [vmem:[%s6813_s21 + $0x38] sm:$0xff]  ;;  %v6983_v47 = vld [vmem:[%s9159_s20 + $0xe8] sm:$0xff] }
0x176d   : > { %8006 = vmatmul.mubr.msk.f32.vlgmr.msra.gmra.mrb[82].mxu0 %vm621_vm3, %v6313_v36  ;;  %v8036_v36 = vpack.c.bf16 %v6821_v33, %v6819_v32  ;;  %v8072_v32 = vpack.c.bf16 %v6983_v47, %v6982_v55 }
0x176e   : > { %6919 = vmatprep.mubr.f32.mxu0 %v8353_v4  ;;  %8035 = vmatpush1.bf16.msra.mxu0 %v8034_v31  ;;  %v8070_v31 = vpack.c.bf16 %v6965_v26, %v6964_v25 }
0x176f   : > { %8037 = vmatprep.subr.bf16.mxu0 %v8036_v36 }
0x1838   : > { %v6462_v38 = vpop.f32.mrb[80].mxu0 }
0x1839   : > { %v7997_v39 = vpop.f32.mrb[81].mxu0  ;;  %8011 = vmatmul.mubr.msk.f32.vlgmr.msra.gmra.mrb[22].mxu1 %vm621_vm3, %v6462_v38  ;;  %v6818_v38 = vld [vmem:[%s6813_s21 + $0x20] sm:$0xff] }
0x183a   : > { %v6820_v39 = vld [vmem:[%s6813_s21 + $0x30] sm:$0xff] }
0x183c   : > { %v6538_v40 = vpop.f32.mrb[58].mxu1 }
0x183d   : > { %v8002_v42 = vpop.f32.mrb[59].mxu1  ;;  %8013 = vmatprep.mubr.msk.f32.mxu1 %vm621_vm3, %v6538_v40  ;;  %v8038_v40 = vpack.c.bf16 %v6820_v39, %v6818_v38 }
0x183e   : > { %v6823_v42 = vld [vmem:[%s6813_s21 + $0x48] sm:$0xff] }
0x183f   : > { %8039 = vmatpush1.bf16.msra.mxu0 %v8038_v40 }
0x1840   : > { %v6614_v44 = vpop.f32.mrb[82].mxu0 }
0x1841   : > { %v8007_v46 = vpop.f32.mrb[83].mxu0  ;;  %8014 = vmatmul.mubr.msk.f32.gmra.mrb[24].mxu1 %vm621_vm3, %v6614_v44  ;;  %v6825_v44 = vld [vmem:[%s6813_s21 + $0x58] sm:$0xff] }
0x1842   : > { %v8040_v46 = vpack.c.bf16 %v6825_v44, %v6823_v42 }
0x1844   : > { %8041 = vmatprep.subr.bf16.mxu0 %v8040_v46 }
0x190c   : > { %v8012_v48 = vpop.f32.mrb[22].mxu1 }
0x190d   : > { %v8080_v52 = vadd.f32 %v8012_v48, %v8733_v27  ;;  %v6696_v54 = vpop.f32.mrb[23].mxu1  ;;  %v6822_v48 = vld [vmem:[%s6813_s21 + $0x40] sm:$0xff] }
0x190e   : > { %v8081_v56 = vadd.f32 %v6696_v54, %v8735_v28  ;;  %v6827_v54 = vld [vmem:[%s6813_s21 + $0x68] sm:$0xff] }
0x190f   : > { %v6728_v57 = vadd.f32 %v8080_v52, %v7403_v50 }
0x1910   : > { %v6727_v58 = vadd.f32 %v8081_v56, %v7403_v50  ;;  %v6829_v56 = vld [vmem:[%s6813_s21 + $0x78] sm:$0xff] }
0x1911   : > { %v6732_v60 = vadd.f32 %v8309_v59, %v6728_v57  ;;  %v6826_v57 = vld [vmem:[%s6813_s21 + $0x60] sm:$0xff]  ;;  %v6828_v59 = vld [vmem:[%s6813_s21 + $0x70] sm:$0xff] }
0x1912   : > { %v6731_v62 = vadd.f32 %v8310_v61, %v6727_v58  ;;  %v8044_v58 = vpack.c.bf16 %v6829_v56, %v6827_v54  ;;  %v6970_v61 = vld [vmem:[%s9159_s20 + $0x80] sm:$0xff] }
0x1913   : > { %v6742_v63 = vsel %vm506_vm1, %v6732_v60, 0.0 }
0x1914   : > { %6743 = vadd.xlane.f32.xlu1 %v6742_v63  ;;  %v8015_v1 = vpop.f32.mrb[24].mxu1  ;;  %v6739_v3 = vsel %vm506_vm1, %v6731_v62, 0.0  ;;  %v6954_v63 = vld [vmem:[%s9159_s20] sm:$0xff] }
0x1915   : > { %v8082_v7 = vadd.f32 %v8015_v1, %v8737_v29  ;;  %6740 = vadd.xlane.f32.xlu0 %v6739_v3  ;;  %v6706_v8 = vpop.f32.mrb[25].mxu1  ;;  %v6955_v3 = vld [vmem:[%s9159_s20 + $0x8] sm:$0xff] }
0x1916   : > { %v8083_v27 = vadd.f32 %v6706_v8, %v8739_v30  ;;  %v6973_v8 = vld [vmem:[%s9159_s20 + $0x98] sm:$0xff] }
0x1917   : > { %v6730_v9 = vadd.f32 %v8082_v7, %v7403_v50  ;;  %v6972_v7 = vld [vmem:[%s9159_s20 + $0x90] sm:$0xff] }
0x1918   : > { %v6729_v28 = vadd.f32 %v8083_v27, %v7403_v50  ;;  %v6824_v50 = vld [vmem:[%s6813_s21 + $0x50] sm:$0xff]  ;;  %v8050_v27 = vpack.c.bf16 %v6955_v3, %v6954_v63  ;;  %s7083_s21 = scalar_lea.vmem %s9296_s11, %s8335_s25 }
0x1919   : > { %v6734_v13 = vadd.f32 %v8312_v43, %v6730_v9  ;;  %v8042_v52 = vpack.c.bf16 %v6824_v50, %v6822_v48  ;;  %v8052_v9 = vpack.c.bf16 %v6973_v8, %v6972_v7 }
0x191a   : > { %v6733_v11 = vadd.f32 %v8311_v10, %v6729_v28  ;;  %v6956_v28 = vld [vmem:[%s9159_s20 + $0x10] sm:$0xff]  ;;  %v6957_v10 = vld [vmem:[%s9159_s20 + $0x18] sm:$0xff] }
0x191b   : > { %v6748_v51 = vsel %vm506_vm1, %v6734_v13, 0.0  ;;  %8043 = vmatpush1.bf16.msra.mxu0 %v8042_v52  ;;  %v8054_v43 = vpack.c.bf16 %v6957_v10, %v6956_v28  ;;  %v6966_v10 = vld [vmem:[%s9159_s20 + $0x60] sm:$0xff] }
0x191c   : > { %v6745_v12 = vsel %vm506_vm1, %v6733_v11, 0.0  ;;  %8045 = vmatprep.subr.bf16.mxu0 %v8044_v58  ;;  %v7404_v58 = vld [vmem:[%s6735_s18] ss:$0 sm:$0xff] }
0x191d   : > { %6746 = vadd.xlane.f32.xlu0 %v6745_v12  ;;  %v6975_v12 = vld [vmem:[%s9159_s20 + $0xa8] sm:$0xff] }
0x1921   : > { %6749 = vadd.xlane.f32.xlu0 %v6748_v51  ;;  %v6958_v51 = vld [vmem:[%s9159_s20 + $0x20] sm:$0xff] }
0x19a1   : > { %v6744_v14 = vpop.xlane.xlu1 %6743 }
0x19a2   : > { %v6753_v0 = vmul.f32 0.015625, %v6744_v14  ;;  %v6741_v15 = vpop.xlane.xlu0 %6740  ;;  %v6959_v14 = vld [vmem:[%s9159_s20 + $0x28] sm:$0xff] }
0x19a3   : > { %v6752_v29 = vmul.f32 0.015625, %v6741_v15  ;;  %v6977_v15 = vld [vmem:[%s9159_s20 + $0xb8] sm:$0xff] }
0x19a4   : > { %v9130_v16 = vsub.f32 %v6732_v60, %v6753_v0  ;;  %v8046_v60 = vpack.c.bf16 %v6828_v59, %v6826_v57  ;;  %v6976_v0 = vld [vmem:[%s9159_s20 + $0xb0] sm:$0xff] }
0x19a5   : > { %v9132_v41 = vsub.f32 %v6731_v62, %v6752_v29  ;;  %v6971_v62 = vld [vmem:[%s9159_s20 + $0x88] sm:$0xff]  ;;  %v8058_v29 = vpack.c.bf16 %v6959_v14, %v6958_v51  ;;  %v6969_v14 = vld [vmem:[%s9159_s20 + $0x78] sm:$0xff] }
0x19a6   : > { %v6761_v30 = vmul.f32 %v9130_v16, %v9130_v16  ;;  %8047 = vmatpush1.bf16.msra.mxu0 %v8046_v60  ;;  %v8048_v1 = vpack.c.bf16 %v6971_v62, %v6970_v61  ;;  %v7405_v61 = vld [vmem:[%s6737_s23] ss:$0 sm:$0xff] }
0x19a7   : > { %v6760_v17 = vmul.f32 %v9132_v41, %v9132_v41 }
0x19a8   : > { %v6767_v45 = vsel %vm506_vm1, %v6761_v30, 0.0  ;;  %8049 = vmatprep.subr.bf16.mxu1 %v8048_v1  ;;  %v8060_v30 = vpack.c.bf16 %v6977_v15, %v6976_v0 }
0x19a9   : > { %6768 = vadd.xlane.f32.xlu0 %v6767_v45  ;;  %v6764_v53 = vsel %vm506_vm1, %v6760_v17, 0.0  ;;  %8051 = vmatpush3.bf16.msra.mxu1 %v8050_v27  ;;  %v6960_v17 = vld [vmem:[%s9159_s20 + $0x30] sm:$0xff]  ;;  %v6961_v45 = vld [vmem:[%s9159_s20 + $0x38] sm:$0xff] }
0x19aa   : > { %6765 = vadd.xlane.f32.xlu1 %v6764_v53  ;;  %v6747_v49 = vpop.xlane.xlu0 %6746  ;;  %8053 = vmatprep.subr.bf16.mxu1 %v8052_v9  ;;  %v6978_v53 = vld [vmem:[%s9159_s20 + $0xc0] sm:$0xff] }
0x19ab   : > { %v6754_v18 = vmul.f32 0.015625, %v6747_v49  ;;  %v6979_v49 = vld [vmem:[%s9159_s20 + $0xc8] sm:$0xff] }
0x19ad   : > { %v9140_v2 = vsub.f32 %v6733_v11, %v6754_v18  ;;  %v6974_v11 = vld [vmem:[%s9159_s20 + $0xa0] sm:$0xff]  ;;  %8055 = vmatpush3.bf16.msra.mxu1 %v8054_v43  ;;  %v8062_v18 = vpack.c.bf16 %v6961_v45, %v6960_v17  ;;  %v6984_v43 = vld [vmem:[%s9159_s20 + $0xf0] sm:$0xff] }
0x19ae   : > { %v6750_v5 = vpop.xlane.xlu0 %6749 }
0x19af   : > { %v6755_v6 = vmul.f32 0.015625, %v6750_v5  ;;  %v6762_v19 = vmul.f32 %v9140_v2, %v9140_v2  ;;  %v8064_v5 = vpack.c.bf16 %v6979_v49, %v6978_v53 }
0x19b1   : > { %v9144_v20 = vsub.f32 %v6734_v13, %v6755_v6  ;;  %v6770_v21 = vsel %vm506_vm1, %v6762_v19, 0.0  ;;  %v8056_v13 = vpack.c.bf16 %v6975_v12, %v6974_v11  ;;  %v6962_v6 = vld [vmem:[%s9159_s20 + $0x40] sm:$0xff]  ;;  %v6963_v19 = vld [vmem:[%s9159_s20 + $0x48] sm:$0xff] }
0x19b2   : > { %6771 = vadd.xlane.f32.xlu1 %v6770_v21  ;;  %v6980_v21 = vld [vmem:[%s9159_s20 + $0xd0] sm:$0xff]  ;;  %v6967_v11 = vld [vmem:[%s9159_s20 + $0x68] sm:$0xff] }
0x19b3   : > { %v6763_v22 = vmul.f32 %v9144_v20, %v9144_v20  ;;  %8057 = vmatprep.subr.bf16.mxu1 %v8056_v13  ;;  %v8074_v12 = vpack.c.bf16 %v6967_v11, %v6966_v10  ;;  %v6985_v13 = vld [vmem:[%s9159_s20 + $0xf8] sm:$0xff] }
0x19b4   : > { %8059 = vmatpush3.bf16.msra.mxu1 %v8058_v29  ;;  %v8076_v51 = vpack.c.bf16 %v6985_v13, %v6984_v43 }
0x19b5   : > { %v6773_v23 = vsel %vm506_vm1, %v6763_v22, 0.0  ;;  %8061 = vmatprep.subr.bf16.mxu1 %v8060_v30  ;;  %v6981_v22 = vld [vmem:[%s9159_s20 + $0xd8] sm:$0xff] }
0x19b6   : > { %6774 = vadd.xlane.f32.xlu0 %v6773_v23  ;;  %v8066_v23 = vpack.c.bf16 %v6963_v19, %v6962_v6  ;;  %v8068_v24 = vpack.c.bf16 %v6981_v22, %v6980_v21 }
0x19b8   : > { %8063 = vmatpush3.bf16.msra.mxu1 %v8062_v18 }
0x19b9   : > { %8065 = vmatprep.subr.bf16.mxu1 %v8064_v5 }
0x19bc   : > { %8067 = vmatpush3.bf16.msra.mxu1 %v8066_v23 }
0x19bd   : > { %8069 = vmatprep.subr.bf16.mxu1 %v8068_v24 }
0x19c0   : > { %8071 = vmatpush3.bf16.msra.mxu1 %v8070_v31 }
0x19c1   : > { %8073 = vmatprep.subr.bf16.mxu1 %v8072_v32 }
0x19c4   : > { %8075 = vmatpush3.bf16.msra.mxu1 %v8074_v12 }
0x19c5   : > { %8077 = vmatprep.subr.bf16.mxu1 %v8076_v51 }
0x1a36   : > { %v6769_v33 = vpop.xlane.xlu0 %6768 }
0x1a37   : > { %v6777_v36 = vmul.f32 0.015625, %v6769_v33  ;;  %v6766_v38 = vpop.xlane.xlu1 %6765 }
0x1a38   : > { %v6776_v39 = vmul.f32 0.015625, %v6766_v38 }
0x1a39   : > { %v6781_v40 = vadd.f32 1e-05, %v6777_v36 }
0x1a3a   : > { %v6780_v42 = vadd.f32 1e-05, %v6776_v39  ;;  %v7412_v39 = vld [vmem:[%s6986_s17] ss:$0 sm:$0xff] }
0x1a3b   : > { %8293 = vrsqrt.f32 %v6781_v40 }
0x1a3c   : > { %8295 = vrsqrt.f32 %v6780_v42 }
0x1a3f   : > { %v6772_v44 = vpop.xlane.xlu1 %6771 }
0x1a40   : > { %v6778_v46 = vmul.f32 0.015625, %v6772_v44 }
0x1a42   : > { %v6782_v48 = vadd.f32 1e-05, %v6778_v46 }
0x1a43   : > { %v6775_v50 = vpop.xlane.xlu0 %6774 }
0x1a44   : > { %8297 = vrsqrt.f32 %v6782_v48  ;;  %v6779_v52 = vmul.f32 0.015625, %v6775_v50 }
0x1a45   : > { %v8294_v54 = vpop.eup %8293 }
0x1a46   : > { %v8296_v56 = vpop.eup %8295  ;;  %v6783_v57 = vadd.f32 1e-05, %v6779_v52  ;;  %v6789_v60 = vmul.f32 %v8294_v54, %v9130_v16 }
0x1a47   : > { %v6788_v59 = vmul.f32 %v8296_v56, %v9132_v41 }
0x1a48   : > { %8299 = vrsqrt.f32 %v6783_v57  ;;  %v6799_v1 = vmul.f32 %v7404_v58, %v6789_v60 }
0x1a49   : > { %v6798_v62 = vmul.f32 %v7404_v58, %v6788_v59 }
0x1a4a   : > { %v9202_v7 = vadd.f32 %v7405_v61, %v6799_v1 }
0x1a4b   : > { %v9197_v63 = vadd.f32 %v7405_v61, %v6798_v62 }
0x1a4d   : > { %7407 = vmatmul.mubr.msk.f32.vlgmr.msra.gmra.mrb[84].mxu0 %vm506_vm1, %v9197_v63 }
0x1a4e   : > { %v8298_v3 = vpop.eup %8297  ;;  %6925 = vmatprep.mubr.f32.mxu0 %v8353_v4 }
0x1a4f   : > { %v6790_v41 = vmul.f32 %v8298_v3, %v9140_v2 }
0x1a51   : > { %7408 = vmatmul.mubr.msk.f32.gmra.mrb[86].mxu0 %vm506_vm1, %v9202_v7  ;;  %v6800_v16 = vmul.f32 %v7404_v58, %v6790_v41 }
0x1a52   : > { %v8300_v8 = vpop.eup %8299  ;;  %6931 = vmatprep.mubr.f32.mxu0 %v8353_v4 }
0x1a53   : > { %v9208_v27 = vadd.f32 %v7405_v61, %v6800_v16  ;;  %v6791_v9 = vmul.f32 %v8300_v8, %v9144_v20  ;;  %v6968_v20 = vld [vmem:[%s9159_s20 + $0x70] sm:$0xff] }
0x1a54   : > { %v8078_v0 = vpack.c.bf16 %v6969_v14, %v6968_v20 }
0x1a55   : > { %7409 = vmatmul.mubr.msk.f32.gmra.mrb[88].mxu0 %vm506_vm1, %v9208_v27  ;;  %v6801_v28 = vmul.f32 %v7404_v58, %v6791_v9 }
0x1a56   : > { %6937 = vmatprep.mubr.f32.mxu0 %v8353_v4  ;;  %8079 = vmatpush3.bf16.msra.mxu1 %v8078_v0  ;;  %v6831_v4 = vld [vmem:[%s6830_s15] sm:$0x3] }
0x1a57   : > { %v9214_v2 = vadd.f32 %v7405_v61, %v6801_v28  ;;  %v6836_v15 = vrot.slane %v6831_v4, %v498_v35  ;;  %v6840_v29 = vrot.slane %v6831_v4, %v502_v37 }
0x1a59   : > { %7410 = vmatmul.mubr.msk.f32.gmra.mrb[90].mxu0 %vm506_vm1, %v9214_v2 }
0x1b20   : > { %v6921_v30 = vpop.f32.mrb[84].mxu0 }
0x1b21   : > { %v6922_v17 = vadd.f32 %v6921_v30, %v6836_v15  ;;  %v6923_v45 = vpop.f32.mrb[85].mxu0 }
0x1b22   : > { %v6924_v53 = vadd.f32 %v6923_v45, %v6840_v29 }
0x1b23   : > { %v6944_v5 = vmax.f32 %v6922_v17, 0.0 }
0x1b24   : > { %v6945_v49 = vmax.f32 %v6924_v53, 0.0  ;;  %v6927_v18 = vpop.f32.mrb[86].mxu0 }
0x1b25   : > { %v6928_v6 = vadd.f32 %v6927_v18, %v6836_v15  ;;  %v6929_v19 = vpop.f32.mrb[87].mxu0 }
0x1b26   : > { %v6930_v21 = vadd.f32 %v6929_v19, %v6840_v29  ;;  %7058 = vmatprep.mubr.f32.mxu1 %v6945_v49 }
0x1b27   : > { %7059 = vmatmul.mubr.f32.vlgmr.msra.gmra.mrb[60].mxu1 %v6944_v5  ;;  %v6946_v24 = vmax.f32 %v6928_v6, 0.0 }
0x1b28   : > { %v6947_v22 = vmax.f32 %v6930_v21, 0.0  ;;  %v6933_v23 = vpop.f32.mrb[88].mxu0 }
0x1b29   : > { %v6934_v25 = vadd.f32 %v6933_v23, %v6836_v15  ;;  %v6935_v35 = vpop.f32.mrb[89].mxu0 }
0x1b2a   : > { %v6936_v34 = vadd.f32 %v6935_v35, %v6840_v29  ;;  %7063 = vmatprep.mubr.f32.mxu1 %v6947_v22 }
0x1b2b   : > { %7064 = vmatmul.mubr.f32.gmra.mrb[62].mxu1 %v6946_v24  ;;  %v6948_v55 = vmax.f32 %v6934_v25, 0.0 }
0x1b2c   : > { %v6949_v37 = vmax.f32 %v6936_v34, 0.0  ;;  %v6939_v26 = vpop.f32.mrb[90].mxu0 }
0x1b2d   : > { %v6940_v47 = vadd.f32 %v6939_v26, %v6836_v15  ;;  %v6941_v31 = vpop.f32.mrb[91].mxu0  ;;  %v7413_v26 = vld [vmem:[%s7083_s21] ss:$0 sm:$0xff] }
0x1b2e   : > { %v6942_v32 = vadd.f32 %v6941_v31, %v6840_v29  ;;  %7068 = vmatprep.mubr.f32.mxu1 %v6949_v37  ;;  %v7414_v31 = vld [vmem:[%s7085_s26] ss:$0 sm:$0xff] }
0x1b2f   : > { %7069 = vmatmul.mubr.f32.gmra.mrb[64].mxu1 %v6948_v55  ;;  %v6950_v36 = vmax.f32 %v6940_v47, 0.0 }
0x1b30   : > { %v6951_v33 = vmax.f32 %v6942_v32, 0.0 }
0x1b32   : > { %7073 = vmatprep.mubr.f32.mxu1 %v6951_v33 }
0x1b33   : > { %7074 = vmatmul.mubr.f32.gmra.mrb[66].mxu1 %v6950_v36 }
0x1bfa   : > { %v7620_v38 = vpop.f32.mrb[60].mxu1 }
0x1bfb   : > { %v7621_v40 = vpop.f32.mrb[61].mxu1 }
0x1bfc   : > { %v7622_v42 = vadd.f32 %v7621_v40, %v7620_v38 }
0x1bfe   : > { %v7061_v44 = vadd.f32 %v7622_v42, %v7412_v39  ;;  %v7623_v46 = vpop.f32.mrb[62].mxu1 }
0x1bff   : > { %v7624_v48 = vpop.f32.mrb[63].mxu1 }
0x1c00   : > { %v7625_v50 = vadd.f32 %v7624_v48, %v7623_v46  ;;  %v7079_v52 = vadd.f32 %v7061_v44, %v9197_v63 }
0x1c02   : > { %v7066_v54 = vadd.f32 %v7625_v50, %v7412_v39  ;;  %v7626_v56 = vpop.f32.mrb[64].mxu1  ;;  %v7087_v57 = vsel %vm506_vm1, %v7079_v52, 0.0 }
0x1c03   : > { %v7627_v58 = vpop.f32.mrb[65].mxu1  ;;  %7088 = vadd.xlane.f32.xlu1 %v7087_v57 }
0x1c04   : > { %v7628_v59 = vadd.f32 %v7627_v58, %v7626_v56  ;;  %v7080_v60 = vadd.f32 %v7066_v54, %v9202_v7 }
0x1c06   : > { %v7071_v61 = vadd.f32 %v7628_v59, %v7412_v39  ;;  %v7629_v62 = vpop.f32.mrb[66].mxu1  ;;  %v7090_v1 = vsel %vm506_vm1, %v7080_v60, 0.0 }
0x1c07   : > { %v7630_v3 = vpop.f32.mrb[67].mxu1  ;;  %7091 = vadd.xlane.f32.xlu0 %v7090_v1 }
0x1c08   : > { %v7631_v41 = vadd.f32 %v7630_v3, %v7629_v62  ;;  %v7081_v16 = vadd.f32 %v7071_v61, %v9208_v27 }
0x1c0a   : > { %v7076_v8 = vadd.f32 %v7631_v41, %v7412_v39  ;;  %v7093_v63 = vsel %vm506_vm1, %v7081_v16, 0.0 }
0x1c0b   : > { %7094 = vadd.xlane.f32.xlu1 %v7093_v63 }
0x1c0c   : > { %v7082_v9 = vadd.f32 %v7076_v8, %v9214_v2 }
0x1c0e   : > { %v7096_v28 = vsel %vm506_vm1, %v7082_v9, 0.0 }
0x1c0f   : > { %7097 = vadd.xlane.f32.xlu0 %v7096_v28 }
0x1c90   : > { %v7089_v10 = vpop.xlane.xlu1 %7088 }
0x1c91   : > { %v7099_v7 = vmul.f32 0.015625, %v7089_v10 }
0x1c93   : > { %v7103_v11 = vsub.f32 %v7079_v52, %v7099_v7 }
0x1c94   : > { %v7092_v12 = vpop.xlane.xlu0 %7091 }
0x1c95   : > { %v7100_v43 = vmul.f32 0.015625, %v7092_v12  ;;  %v7107_v13 = vmul.f32 %v7103_v11, %v7103_v11 }
0x1c97   : > { %v7104_v51 = vsub.f32 %v7080_v60, %v7100_v43  ;;  %v7111_v20 = vsel %vm506_vm1, %v7107_v13, 0.0 }
0x1c98   : > { %7112 = vadd.xlane.f32.xlu1 %v7111_v20  ;;  %v7095_v27 = vpop.xlane.xlu1 %7094 }
0x1c99   : > { %v7101_v14 = vmul.f32 0.015625, %v7095_v27  ;;  %v7108_v0 = vmul.f32 %v7104_v51, %v7104_v51 }
0x1c9b   : > { %v7105_v4 = vsub.f32 %v7081_v16, %v7101_v14  ;;  %v7114_v15 = vsel %vm506_vm1, %v7108_v0, 0.0 }
0x1c9c   : > { %7115 = vadd.xlane.f32.xlu0 %v7114_v15  ;;  %v7098_v2 = vpop.xlane.xlu0 %7097 }
0x1c9d   : > { %v7102_v29 = vmul.f32 0.015625, %v7098_v2  ;;  %v7109_v30 = vmul.f32 %v7105_v4, %v7105_v4 }
0x1c9f   : > { %v7106_v17 = vsub.f32 %v7082_v9, %v7102_v29  ;;  %v7117_v45 = vsel %vm506_vm1, %v7109_v30, 0.0 }
0x1ca0   : > { %7118 = vadd.xlane.f32.xlu1 %v7117_v45 }
0x1ca1   : > { %v7110_v53 = vmul.f32 %v7106_v17, %v7106_v17 }
0x1ca3   : > { %v7120_v49 = vsel %vm506_vm1, %v7110_v53, 0.0 }
0x1ca4   : > { %7121 = vadd.xlane.f32.xlu0 %v7120_v49 }
0x1d25   : > { %v7113_v18 = vpop.xlane.xlu1 %7112 }
0x1d26   : > { %v7123_v5 = vmul.f32 0.015625, %v7113_v18 }
0x1d28   : > { %v7127_v6 = vadd.f32 1e-05, %v7123_v5 }
0x1d29   : > { %v7116_v19 = vpop.xlane.xlu0 %7115 }
0x1d2a   : > { %8301 = vrsqrt.f32 %v7127_v6  ;;  %v7124_v21 = vmul.f32 0.015625, %v7116_v19 }
0x1d2c   : > { %v7128_v22 = vadd.f32 1e-05, %v7124_v21 }
0x1d2d   : > { %v7119_v23 = vpop.xlane.xlu1 %7118 }
0x1d2e   : > { %8303 = vrsqrt.f32 %v7128_v22  ;;  %v7125_v24 = vmul.f32 0.015625, %v7119_v23 }
0x1d30   : > { %v7129_v25 = vadd.f32 1e-05, %v7125_v24 }
0x1d31   : > { %v7122_v35 = vpop.xlane.xlu0 %7121 }
0x1d32   : > { %8305 = vrsqrt.f32 %v7129_v25  ;;  %v7126_v34 = vmul.f32 0.015625, %v7122_v35 }
0x1d34   : > { %v8302_v37 = vpop.eup %8301  ;;  %v7130_v55 = vadd.f32 1e-05, %v7126_v34 }
0x1d35   : > { %v7135_v47 = vmul.f32 %v8302_v37, %v7103_v11 }
0x1d36   : > { %8307 = vrsqrt.f32 %v7130_v55 }
0x1d37   : > { %v7145_v32 = vmul.f32 %v7413_v26, %v7135_v47 }
0x1d38   : > { %v8304_v33 = vpop.eup %8303 }
0x1d39   : > { %v7155_v36 = vadd.f32 %v7414_v31, %v7145_v32  ;;  %v7136_v38 = vmul.f32 %v8304_v33, %v7104_v51 }
0x1d3b   : > { %7159 = vst.msk [vmem:[#allocation2] sm:$0xff] %vm506_vm1, %v7155_v36  ;;  %v7146_v39 = vmul.f32 %v7413_v26, %v7136_v38  ;;  %7167 = vst.msk [vmem:[%s8478_s22] sm:$0xff] (!%p7415_p7), %vm506_vm1, %v7155_v36 }
0x1d3c   : > { %v8306_v40 = vpop.eup %8305 }
0x1d3d   : > { %v7156_v42 = vadd.f32 %v7414_v31, %v7146_v39  ;;  %v7137_v44 = vmul.f32 %v8306_v40, %v7105_v4 }
0x1d3f   : > { %7160 = vst.msk [vmem:[#allocation2 + $0x8] sm:$0xff] %vm506_vm1, %v7156_v42  ;;  %v7147_v46 = vmul.f32 %v7413_v26, %v7137_v44  ;;  %7168 = vst.msk [vmem:[%s8478_s22 + $0x8] sm:$0xff] (!%p7415_p7), %vm506_vm1, %v7156_v42 }
0x1d40   : > { %v8308_v48 = vpop.eup %8307 }
0x1d41   : > { %v7157_v50 = vadd.f32 %v7414_v31, %v7147_v46  ;;  %v7138_v52 = vmul.f32 %v8308_v48, %v7106_v17  ;;  %7166 = sbr.rel (%p7415_p7) target bundleno = 7496 (0x1d48), region = 80 }
0x1d43   : > { %7161 = vst.msk [vmem:[#allocation2 + $0x10] sm:$0xff] %vm506_vm1, %v7157_v50  ;;  %v7148_v54 = vmul.f32 %v7413_v26, %v7138_v52  ;;  %7169 = vst.msk [vmem:[%s8478_s22 + $0x10] sm:$0xff] (!%p7415_p7), %vm506_vm1, %v7157_v50 }
0x1d45   : > { %v7158_v56 = vadd.f32 %v7414_v31, %v7148_v54 }
0x1d47   : > { %7162 = vst.msk [vmem:[#allocation2 + $0x18] sm:$0xff] %vm506_vm1, %v7158_v56  ;;  %7170 = vst.msk [vmem:[%s8478_s22 + $0x18] sm:$0xff] (!%p7415_p7), %vm506_vm1, %v7158_v56 }
0x1d48 PF: > { %s23_s29 = sadd.s32 1, %s8351_s29   ;;  %s9299_s25 = smov %s8343_s27 }
0x1d49   : > { %p20_p8 = scmp.ge.s32.totalorder %s23_s29, 14   ;;  %s9300_s26 = smov %s8347_s28 }
0x1d4a   : > { %s9301_s27 = smov %s9304_s30  ;;  %s9302_s28 = smov %s9308_s14 }
0x1d4b   :  { %22 = sbr.rel (!%p20_p8) target bundleno = 3 (0x3), region = 122 }

</bundles_post_ra>
